<compile_context>
chip_gen: v6e
topology: v6e:2x2x1
jax: 0.10.0
libtpu: 0.0.40
codegen_flags: <defaults>
</compile_context>

<pallas_src>
import functools
import math

import jax
import jax.numpy as jnp
from jax.experimental import pallas as pl
from jax.experimental.pallas import tpu as pltpu

_LN_EPS = 1e-6          # MCAN's LayerNorm uses 1e-6
_NEG_INF = -1e9


def _default_vmem_limit():
    # v7x: 64 MiB physical VMEM -> cap at 48 MiB; v5e/v6e: 128 MiB -> ~96 MiB.
    try:
        cap = getattr(pltpu.get_tpu_info(), "vmem_capacity_bytes", None)
        if cap:
            return int(min(cap * 3 // 4, 100 * 1024 * 1024))
    except Exception:
        pass
    return 48 * 1024 * 1024


_VMEM_LIMIT = _default_vmem_limit()


# ----------------------------- tiling helpers -----------------------------

def _round_up(x, m):
    return (x + m - 1) // m * m


def _tile(dim, cap):
    """Pick a block size and padded dim. cap must be a multiple of 8/128."""
    if dim <= cap:
        return dim, dim                       # full-dim block (always legal)
    return cap, _round_up(dim, cap)           # aligned tile, pad array up


# ----------------------------- tiled linear -----------------------------

def _matmul_bias_kernel(x_ref, w_ref, b_ref, o_ref, acc_ref, *, relu):
    @pl.when(pl.program_id(2) == 0)
    def _init():
        acc_ref[...] = jnp.zeros_like(acc_ref)

    acc_ref[...] += jnp.dot(x_ref[...].astype(jnp.bfloat16),
                            w_ref[...].astype(jnp.bfloat16),
                            preferred_element_type=jnp.float32)

    @pl.when(pl.program_id(2) == pl.num_programs(2) - 1)
    def _finalize():
        acc = acc_ref[...] + b_ref[...]
        if relu:
            acc = jnp.maximum(acc, 0.0)
        o_ref[...] = acc.astype(o_ref.dtype)


def pallas_linear(x, w, b, relu=False):
    """(..., K) @ (K, N) + (N,) -> (..., N), tiled & pipelined, bf16 MXU."""
    orig = x.shape
    K = orig[-1]
    N = w.shape[1]
    x2 = x.reshape(-1, K)
    M = x2.shape[0]

    tm, Mp = _tile(M, 256)
    tn, Np = _tile(N, 256)
    tk, Kp = _tile(K, 512)

    if (Mp, Kp) != (M, K):
        x2 = jnp.pad(x2, ((0, Mp - M), (0, Kp - K)))
    wp = w if (Kp, Np) == (K, N) else jnp.pad(w, ((0, Kp - K), (0, Np - N)))
    bp = b if Np == N else jnp.pad(b, (0, Np - N))

    grid = (Mp // tm, Np // tn, Kp // tk)
    out = pl.pallas_call(
        functools.partial(_matmul_bias_kernel, relu=relu),
        grid=grid,
        in_specs=[
            pl.BlockSpec((tm, tk), lambda i, j, k: (i, k)),
            pl.BlockSpec((tk, tn), lambda i, j, k: (k, j)),
            pl.BlockSpec((1, tn), lambda i, j, k: (0, j)),
        ],
        out_specs=pl.BlockSpec((tm, tn), lambda i, j, k: (i, j)),
        out_shape=jax.ShapeDtypeStruct((Mp, Np), jnp.float32),
        scratch_shapes=[pltpu.VMEM((tm, tn), jnp.float32)],
        compiler_params=pltpu.CompilerParams(
            dimension_semantics=("parallel", "parallel", "arbitrary"),
            vmem_limit_bytes=_VMEM_LIMIT),
    )(x2, wp, bp.reshape(1, Np))
    if (Mp, Np) != (M, N):
        out = out[:M, :N]
    return out.reshape(orig[:-1] + (N,))


# ----------------------------- LayerNorm bodies -----------------------------

def _layernorm_body(x, g, b, eps):
    mu = jnp.mean(x, axis=-1, keepdims=True)
    var = jnp.mean((x - mu) ** 2, axis=-1, keepdims=True)
    return (x - mu) * jax.lax.rsqrt(var + eps) * g + b


def _layernorm_kernel(x_ref, g_ref, b_ref, o_ref, *, eps):
    o_ref[...] = _layernorm_body(x_ref[...], g_ref[...], b_ref[...], eps
                                 ).astype(o_ref.dtype)


def _add_layernorm_kernel(x_ref, r_ref, g_ref, b_ref, o_ref, *, eps):
    o_ref[...] = _layernorm_body(x_ref[...] + r_ref[...], g_ref[...],
                                 b_ref[...], eps).astype(o_ref.dtype)


def pallas_layernorm(x, gamma, beta, residual=None, eps=_LN_EPS):
    """LayerNorm(residual + x) with the residual add fused in-kernel."""
    orig = x.shape
    D = orig[-1]
    x2 = x.reshape(-1, D)
    M = x2.shape[0]
    tm, Mp = _tile(M, 512)
    if Mp != M:
        x2 = jnp.pad(x2, ((0, Mp - M), (0, 0)))

    args = [x2]
    in_specs = [pl.BlockSpec((tm, D), lambda i: (i, 0))]
    if residual is not None:
        r2 = residual.reshape(-1, D)
        if Mp != M:
            r2 = jnp.pad(r2, ((0, Mp - M), (0, 0)))
        args.append(r2)
        in_specs.append(pl.BlockSpec((tm, D), lambda i: (i, 0)))
        kernel = functools.partial(_add_layernorm_kernel, eps=eps)
    else:
        kernel = functools.partial(_layernorm_kernel, eps=eps)
    args += [gamma.reshape(1, D), beta.reshape(1, D)]
    in_specs += [pl.BlockSpec((1, D), lambda i: (0, 0)),
                 pl.BlockSpec((1, D), lambda i: (0, 0))]

    out = pl.pallas_call(
        kernel,
        grid=(Mp // tm,),
        in_specs=in_specs,
        out_specs=pl.BlockSpec((tm, D), lambda i: (i, 0)),
        out_shape=jax.ShapeDtypeStruct((Mp, D), jnp.float32),
        compiler_params=pltpu.CompilerParams(
            dimension_semantics=("parallel",), vmem_limit_bytes=_VMEM_LIMIT),
    )(*args)
    if Mp != M:
        out = out[:M]
    return out.reshape(orig)


# ----------------------------- fused FFN + residual + LN ---------------------

def _ffn_ln_kernel(x_ref, w1_ref, b1_ref, w2_ref, b2_ref, g_ref, bb_ref, o_ref,
                   *, eps):
    x = x_ref[...]                                               # (tm, H) f32
    h = jnp.dot(x.astype(jnp.bfloat16), w1_ref[...],
                preferred_element_type=jnp.float32) + b1_ref[...]
    h = jnp.maximum(h, 0.0)
    y = jnp.dot(h.astype(jnp.bfloat16), w2_ref[...],
                preferred_element_type=jnp.float32) + b2_ref[...]
    o_ref[...] = _layernorm_body(x + y, g_ref[...], bb_ref[...], eps
                                 ).astype(o_ref.dtype)


def pallas_ffn_ln(x, w1, b1, w2, b2, gamma, beta):
    """LN(x + Linear(ReLU(Linear(x)))); intermediate & pre-LN stay in VMEM."""
    orig = x.shape
    K = orig[-1]
    F = w1.shape[1]
    N = w2.shape[1]
    x2 = x.reshape(-1, K)
    M = x2.shape[0]
    tm, Mp = _tile(M, 256)
    if Mp != M:
        x2 = jnp.pad(x2, ((0, Mp - M), (0, 0)))
    out = pl.pallas_call(
        functools.partial(_ffn_ln_kernel, eps=_LN_EPS),
        grid=(Mp // tm,),
        in_specs=[
            pl.BlockSpec((tm, K), lambda i: (i, 0)),
            pl.BlockSpec((K, F), lambda i: (0, 0)),
            pl.BlockSpec((1, F), lambda i: (0, 0)),
            pl.BlockSpec((F, N), lambda i: (0, 0)),
            pl.BlockSpec((1, N), lambda i: (0, 0)),
            pl.BlockSpec((1, N), lambda i: (0, 0)),
            pl.BlockSpec((1, N), lambda i: (0, 0)),
        ],
        out_specs=pl.BlockSpec((tm, N), lambda i: (i, 0)),
        out_shape=jax.ShapeDtypeStruct((Mp, N), jnp.float32),
        compiler_params=pltpu.CompilerParams(
            dimension_semantics=("parallel",), vmem_limit_bytes=_VMEM_LIMIT),
    )(x2, w1, b1.reshape(1, F), w2, b2.reshape(1, N),
      gamma.reshape(1, N), beta.reshape(1, N))
    if Mp != M:
        out = out[:M]
    return out.reshape(orig)


# -------------- fused multi-head attention + o-proj + residual + LN ----------

def _mha_ln_kernel(*refs, scale, masked, eps):
    if masked:
        (q_ref, k_ref, v_ref, m_ref, res_ref,
         wo_ref, bo_ref, g_ref, b_ref, o_ref) = refs
    else:
        (q_ref, k_ref, v_ref, res_ref,
         wo_ref, bo_ref, g_ref, b_ref, o_ref) = refs

    q = (q_ref[...] * scale).astype(jnp.bfloat16)          # (nh, Sq, D)
    k = k_ref[...].astype(jnp.bfloat16)                    # (nh, Sk, D)
    v = v_ref[...].astype(jnp.bfloat16)                    # (nh, Sk, D)

    # Head-batched scores: one batched MXU pass instead of a per-head loop.
    s = jnp.einsum('hqd,hkd->hqk', q, k,
                   preferred_element_type=jnp.float32)     # (nh, Sq, Sk)
    if masked:
        s = jnp.where(m_ref[...][None, :, :] > 0.5, _NEG_INF, s)
    s = s - jnp.max(s, axis=-1, keepdims=True)
    p = jnp.exp(s)
    p = p * pl.reciprocal(jnp.sum(p, axis=-1, keepdims=True), approx=True)

    oh = jnp.einsum('hqk,hkd->hqd', p.astype(jnp.bfloat16), v,
                    preferred_element_type=jnp.float32)    # (nh, Sq, D)

    # Fused output projection: Wo reshaped to (nh, D, Ho) in the wrapper.
    proj = jnp.einsum('hqd,hdo->hqo', oh.astype(jnp.bfloat16), wo_ref[...],
                      preferred_element_type=jnp.float32)  # (nh, Sq, Ho)
    out = jnp.sum(proj, axis=0) + bo_ref[...] + res_ref[...]
    o_ref[...] = _layernorm_body(out, g_ref[...], b_ref[...], eps
                                 ).astype(o_ref.dtype)


def pallas_attention_ln(q, k, v, key_mask, residual, o_params, gamma, beta):
    """q/k/v: (B, nh, S, D); returns LN(residual + MHA(...) @ Wo + bo)."""
    B, nh, Sq, D = q.shape
    Sk = k.shape[2]
    wo, bo = o_params
    Ho = wo.shape[1]
    wo3 = wo.reshape(nh, D, Ho)                 # contiguous split of Wo's rows
    scale = 1.0 / math.sqrt(D)
    masked = key_mask is not None

    args = [q, k, v]
    in_specs = [pl.BlockSpec((None, nh, Sq, D), lambda b: (b, 0, 0, 0)),
                pl.BlockSpec((None, nh, Sk, D), lambda b: (b, 0, 0, 0)),
                pl.BlockSpec((None, nh, Sk, D), lambda b: (b, 0, 0, 0))]
    if masked:
        args.append(key_mask)
        in_specs.append(pl.BlockSpec((None, 1, Sk), lambda b: (b, 0, 0)))
    args += [residual, wo3, bo.reshape(1, Ho),
             gamma.reshape(1, Ho), beta.reshape(1, Ho)]
    in_specs += [pl.BlockSpec((None, Sq, Ho), lambda b: (b, 0, 0)),
                 pl.BlockSpec((nh, D, Ho), lambda b: (0, 0, 0)),
                 pl.BlockSpec((1, Ho), lambda b: (0, 0)),
                 pl.BlockSpec((1, Ho), lambda b: (0, 0)),
                 pl.BlockSpec((1, Ho), lambda b: (0, 0))]

    return pl.pallas_call(
        functools.partial(_mha_ln_kernel, scale=scale, masked=masked,
                          eps=_LN_EPS),
        grid=(B,),
        in_specs=in_specs,
        out_specs=pl.BlockSpec((None, Sq, Ho), lambda b: (b, 0, 0)),
        out_shape=jax.ShapeDtypeStruct((B, Sq, Ho), jnp.float32),
        compiler_params=pltpu.CompilerParams(
            dimension_semantics=("parallel",), vmem_limit_bytes=_VMEM_LIMIT),
    )(*args)


def _split_heads(x, num_heads):
    """(B, S, H) -> (B, nh, S, D); head dim D stays in lanes."""
    B, S, H = x.shape
    D = H // num_heads
    return jnp.transpose(x.reshape(B, S, num_heads, D), (0, 2, 1, 3))


def self_mha_ln(p, x, key_mask, num_heads, gamma, beta):
    H = x.shape[-1]
    qkv = pallas_linear(x, *p['qkv'])                      # fused (H -> 3H)
    q = _split_heads(qkv[..., :H], num_heads)
    k = _split_heads(qkv[..., H:2 * H], num_heads)
    v = _split_heads(qkv[..., 2 * H:], num_heads)
    return pallas_attention_ln(q, k, v, key_mask, x, p['o'], gamma, beta)


def cross_mha_ln(p, x, y, y_key_mask, num_heads, gamma, beta):
    H = x.shape[-1]
    q = _split_heads(pallas_linear(x, *p['q']), num_heads)
    kv = pallas_linear(y, *p['kv'])                        # fused (H -> 2H)
    k = _split_heads(kv[..., :H], num_heads)
    v = _split_heads(kv[..., H:], num_heads)
    return pallas_attention_ln(q, k, v, y_key_mask, x, p['o'], gamma, beta)


# ----------------------------- AttFlat (fused) -----------------------------

def _attflat_kernel(*refs, masked):
    if masked:
        x_ref, m_ref, w1_ref, b1_ref, w2_ref, b2_ref, o_ref = refs
    else:
        x_ref, w1_ref, b1_ref, w2_ref, b2_ref, o_ref = refs
    x = x_ref[...]                                              # (S, H) f32
    a = jnp.dot(x.astype(jnp.bfloat16), w1_ref[...],
                preferred_element_type=jnp.float32) + b1_ref[...]
    a = jnp.maximum(a, 0.0)
    a = jnp.dot(a.astype(jnp.bfloat16), w2_ref[...],
                preferred_element_type=jnp.float32) + b2_ref[...]
    if masked:
        a = jnp.where(m_ref[...] > 0.5, _NEG_INF, a)            # (S,1) over (S,G)
    a = a - jnp.max(a, axis=0, keepdims=True)
    p = jnp.exp(a)
    p = p * pl.reciprocal(jnp.sum(p, axis=0, keepdims=True), approx=True)
    pooled = jax.lax.dot_general(p, x, (((0,), (0,)), ((), ())),
                                 preferred_element_type=jnp.float32)  # (G, H)
    o_ref[...] = pooled.astype(o_ref.dtype)


def attflat(p, x, x_mask):
    """AttFlat: fused MLP + masked softmax(seq) + glimpse pooling, then merge."""
    B, S, H = x.shape
    w1, b1 = p['mlp1']
    w2, b2 = p['mlp2']
    Fm = w1.shape[1]
    G = w2.shape[1]
    masked = x_mask is not None
    in_specs = [pl.BlockSpec((None, S, H), lambda b: (b, 0, 0))]
    args = [x]
    if masked:
        m = x_mask.reshape(B, S, 1).astype(jnp.float32)  # squeeze(1,1).unsqueeze(2)
        in_specs.append(pl.BlockSpec((None, S, 1), lambda b: (b, 0, 0)))
        args.append(m)
    in_specs += [pl.BlockSpec((H, Fm), lambda b: (0, 0)),
                 pl.BlockSpec((1, Fm), lambda b: (0, 0)),
                 pl.BlockSpec((Fm, G), lambda b: (0, 0)),
                 pl.BlockSpec((1, G), lambda b: (0, 0))]
    args += [w1, b1.reshape(1, Fm), w2, b2.reshape(1, G)]
    pooled = pl.pallas_call(
        functools.partial(_attflat_kernel, masked=masked),
        grid=(B,),
        in_specs=in_specs,
        out_specs=pl.BlockSpec((None, G, H), lambda b: (b, 0, 0)),
        out_shape=jax.ShapeDtypeStruct((B, G, H), jnp.float32),
        compiler_params=pltpu.CompilerParams(
            dimension_semantics=("parallel",), vmem_limit_bytes=_VMEM_LIMIT),
    )(*args)
    pooled = pooled.reshape(B, G * H)                    # glimpse-major concat
    return pallas_linear(pooled, *p['linear_merge'])


# ----------------------------- model pieces -----------------------------

def lstm_forward(x, w_ih, w_hh, b_ih, b_hh, hidden_size):
    # TODO(synk): LSTM recurrence is inherently sequential; the bulk input
    # projection runs in the tiled Pallas matmul, the tiny per-step recurrence
    # stays in lax.scan (plain JAX).
    B, S, _ = x.shape
    H = hidden_size
    xp = pallas_linear(x, w_ih, b_ih)                    # (B, S, 4H)
    xp_t = jnp.swapaxes(xp, 0, 1)                        # (S, B, 4H)

    def step(carry, xt):
        h, c = carry
        gates = xt + h @ w_hh + b_hh                     # gate order: i, f, g, o
        i = jax.nn.sigmoid(gates[:, 0 * H:1 * H])
        f = jax.nn.sigmoid(gates[:, 1 * H:2 * H])
        g = jnp.tanh(gates[:, 2 * H:3 * H])
        o = jax.nn.sigmoid(gates[:, 3 * H:4 * H])
        c = f * c + i * g
        h = o * jnp.tanh(c)
        return (h, c), h

    init = (jnp.zeros((B, H), jnp.float32), jnp.zeros((B, H), jnp.float32))
    _, hs = jax.lax.scan(step, init, xp_t)
    return jnp.swapaxes(hs, 0, 1)                        # (B, S, H)


def sa_layer(p, x, x_mask, num_heads):
    x = self_mha_ln(p['mha'], x, x_mask, num_heads, p['ln1_g'], p['ln1_b'])
    x = pallas_ffn_ln(x, *p['ffn1'], *p['ffn2'], p['ln2_g'], p['ln2_b'])
    return x


def sga_layer(p, x, y, x_mask, y_mask, num_heads):
    x = self_mha_ln(p['mha1'], x, x_mask, num_heads, p['ln1_g'], p['ln1_b'])
    x = cross_mha_ln(p['mha2'], x, y, y_mask, num_heads, p['ln2_g'], p['ln2_b'])
    x = pallas_ffn_ln(x, *p['ffn1'], *p['ffn2'], p['ln3_g'], p['ln3_b'])
    return x


def mca_ed(p, lang, lang_mask, kg_feat, kg_mask, img, num_heads):
    # TODO(synk): MCA_ED source was not provided with the module; this is the
    # standard MCAN encoder-decoder (SA stack on lang, SGA stack on img guided
    # by lang); the role of kg_feat / kg_mask inside the original backbone is
    # unspecified, so kg is computed (as in Net.forward) but left unused here.
    del kg_feat, kg_mask
    for enc in p['enc']:
        lang = sa_layer(enc, lang, lang_mask, num_heads)
    for dec in p['dec']:
        img = sga_layer(dec, img, lang, None, lang_mask, num_heads)
    return lang, img


# ----------------------------- parameters -----------------------------

def _dense(key, fan_in, fan_out, scale=0.05):
    kw, kb = jax.random.split(key)
    w = (jax.random.normal(kw, (fan_in, fan_out), jnp.float32) * scale
         ).astype(jnp.bfloat16)                          # MXU-native weights
    b = jax.random.normal(kb, (fan_out,), jnp.float32) * scale
    return (w, b)


def init_params(key, cfg):
    H, E = cfg['hidden_size'], cfg['word_embedsize']
    keys = iter(jax.random.split(key, 256))
    nk = lambda: next(keys)

    def mha_self_params():
        return {'qkv': _dense(nk(), H, 3 * H), 'o': _dense(nk(), H, H)}

    def mha_cross_params():
        return {'q': _dense(nk(), H, H), 'kv': _dense(nk(), H, 2 * H),
                'o': _dense(nk(), H, H)}

    def sa_params():
        return {'mha': mha_self_params(),
                'ffn1': _dense(nk(), H, cfg['ff_size']),
                'ffn2': _dense(nk(), cfg['ff_size'], H),
                'ln1_g': jnp.ones((H,), jnp.float32), 'ln1_b': jnp.zeros((H,), jnp.float32),
                'ln2_g': jnp.ones((H,), jnp.float32), 'ln2_b': jnp.zeros((H,), jnp.float32)}

    def sga_params():
        return {'mha1': mha_self_params(), 'mha2': mha_cross_params(),
                'ffn1': _dense(nk(), H, cfg['ff_size']),
                'ffn2': _dense(nk(), cfg['ff_size'], H),
                'ln1_g': jnp.ones((H,), jnp.float32), 'ln1_b': jnp.zeros((H,), jnp.float32),
                'ln2_g': jnp.ones((H,), jnp.float32), 'ln2_b': jnp.zeros((H,), jnp.float32),
                'ln3_g': jnp.ones((H,), jnp.float32), 'ln3_b': jnp.zeros((H,), jnp.float32)}

    def attflat_params():
        return {'mlp1': _dense(nk(), H, cfg['flat_mlp_size']),
                'mlp2': _dense(nk(), cfg['flat_mlp_size'], cfg['flat_glimpses']),
                'linear_merge': _dense(nk(), H * cfg['flat_glimpses'], cfg['flat_out_size'])}

    return {
        'embedding': jax.random.normal(nk(), (cfg['token_size'], E), jnp.float32) * 0.1,
        'lstm': (jax.random.normal(nk(), (E, 4 * H), jnp.float32) * 0.05,
                 jax.random.normal(nk(), (H, 4 * H), jnp.float32) * 0.05,
                 jax.random.normal(nk(), (4 * H,), jnp.float32) * 0.05,
                 jax.random.normal(nk(), (4 * H,), jnp.float32) * 0.05),
        'img_feat_linear': _dense(nk(), cfg['img_feat_size'], H),
        'loc_feat_linear': _dense(nk(), cfg['img_loc_size'], H),
        'kg_proj': _dense(nk(), E, H),
        'backbone': {'enc': [sa_params() for _ in range(cfg['layers'])],
                     'dec': [sga_params() for _ in range(cfg['layers'])]},
        'attflat_lang': attflat_params(),
        'attflat_img': attflat_params(),
        'proj_norm_g': jnp.ones((cfg['flat_out_size'],), jnp.float32),
        'proj_norm_b': jnp.zeros((cfg['flat_out_size'],), jnp.float32),
        'proj': _dense(nk(), cfg['flat_out_size'], cfg['answer_size']),
    }


# ----------------------------- Net.forward -----------------------------

def make_forward(cfg):
    nh = cfg['multi_head']
    H = cfg['hidden_size']

    def forward(params, ques, ques_mask, kg, kg_mask, img_feat, img_loc):
        B, Sq = ques.shape
        Sk = kg.shape[1]
        emb = params['embedding']
        lang_feat = emb[ques]                                      # (B, Sq, E)
        lang_feat = lstm_forward(lang_feat, *params['lstm'], H)    # (B, Sq, H)
        kg_feat = emb[kg]                                          # (B, Sk, E)
        kg_feat = pallas_linear(kg_feat, *params['kg_proj'])       # (B, Sk, H)

        # img_feat / img_loc projections merged into one matmul.
        w_img = jnp.concatenate([params['img_feat_linear'][0],
                                 params['loc_feat_linear'][0]], axis=0)
        b_img = params['img_feat_linear'][1] + params['loc_feat_linear'][1]
        img = pallas_linear(jnp.concatenate([img_feat, img_loc], axis=-1),
                            w_img, b_img)

        lang_key_mask = ques_mask.reshape(B, 1, Sq).astype(jnp.float32)
        kg_key_mask = kg_mask.reshape(B, 1, Sk).astype(jnp.float32)

        lang, img = mca_ed(params['backbone'], lang_feat, lang_key_mask,
                           kg_feat, kg_key_mask, img, nh)

        lang_flat = attflat(params['attflat_lang'], lang, ques_mask)
        img_flat = attflat(params['attflat_img'], img, None)
        proj = pallas_layernorm(lang_flat, params['proj_norm_g'],
                                params['proj_norm_b'], residual=img_flat)
        return pallas_linear(proj, *params['proj'])                # (B, answer)

    return jax.jit(forward)


if __name__ == "__main__":
    cfg = dict(token_size=50, word_embedsize=32, hidden_size=32, multi_head=4,
               ff_size=64, layers=2, flat_mlp_size=32, flat_glimpses=1,
               flat_out_size=64, answer_size=10, img_feat_size=64,
               img_loc_size=8, rnn_num_layers=1, dropout_r=0.0)

    key = jax.random.PRNGKey(0)
    kp, kq, kkg, kimg, kloc = jax.random.split(key, 5)
    params = init_params(kp, cfg)

    B, Sq, Sk, Nimg = 2, 8, 8, 16
    ques = jax.random.randint(kq, (B, Sq), 1, cfg['token_size'])
    ques = ques.at[:, 6:].set(0)                       # last 2 tokens are padding
    kg = jax.random.randint(kkg, (B, Sk), 1, cfg['token_size'])
    kg = kg.at[:, 5:].set(0)
    ques_mask = (ques == 0).astype(jnp.float32)[:, None, None, :]   # (B,1,1,Sq)
    kg_mask = (kg == 0).astype(jnp.float32)[:, None, None, :]       # (B,1,1,Sk)
    img_feat = jax.random.normal(kimg, (B, Nimg, cfg['img_feat_size']), jnp.float32)
    img_loc = jax.random.normal(kloc, (B, Nimg, cfg['img_loc_size']), jnp.float32)

    fwd = make_forward(cfg)
    out = fwd(params, ques, ques_mask, kg, kg_mask, img_feat, img_loc)
    out = jax.block_until_ready(out)
    assert out.shape == (B, cfg['answer_size'])
    assert bool(jnp.all(jnp.isfinite(out)))
    print("KERNEL_OK")
</pallas_src>

<mosaic_0001>
module attributes {stable_mosaic.version = 11 : i64} {
  func.func @_matmul_bias_kernel(%arg0: i32, %arg1: i32, %arg2: i32, %arg3: memref<16x32xf32, #tpu.memory_space<vmem>>, %arg4: memref<32x128xf32, #tpu.memory_space<vmem>>, %arg5: memref<1x128xf32, #tpu.memory_space<vmem>>, %arg6: memref<16x128xf32, #tpu.memory_space<vmem>>, %arg7: memref<16x128xf32, #tpu.memory_space<vmem>>) attributes {dimension_semantics = [#tpu.dimension_semantics<parallel>, #tpu.dimension_semantics<parallel>, #tpu.dimension_semantics<arbitrary>], iteration_bounds = array<i64: 1, 1, 1>, scalar_prefetch = 0 : i64, scratch_operands = 1 : i64, tpu.core_type = #tpu.core_type<tc>, window_params = [{transform_indices = @transform_0, window_bounds = array<i64: 16, 32>}, {transform_indices = @transform_1, window_bounds = array<i64: 32, 128>}, {transform_indices = @transform_2, window_bounds = array<i64: 1, 128>}, {transform_indices = @transform_3, window_bounds = array<i64: 16, 128>}]} {
    %c0_i32 = arith.constant 0 : i32
    %0 = arith.cmpi eq, %arg2, %c0_i32 : i32
    %1 = arith.extui %0 : i1 to i32
    %c0_i32_0 = arith.constant 0 : i32
    %2 = arith.cmpi ne, %1, %c0_i32_0 : i32
    scf.if %2 {
      %cst_10 = arith.constant 0.000000e+00 : f32
      %14 = vector.broadcast %cst_10 : f32 to vector<16x128xf32>
      %c0_11 = arith.constant 0 : index
      %c0_12 = arith.constant 0 : index
      %15 = vector.load %arg7[%c0_11, %c0_12] : memref<16x128xf32, #tpu.memory_space<vmem>>, vector<16x128xf32>
      tpu.vector_store %arg7[%c0_11, %c0_12], %14 {strides = array<i32>} : memref<16x128xf32, #tpu.memory_space<vmem>>, vector<16x128xf32>,
    } else {
    }
    %c0 = arith.constant 0 : index
    %c0_1 = arith.constant 0 : index
    %3 = vector.load %arg7[%c0, %c0_1] : memref<16x128xf32, #tpu.memory_space<vmem>>, vector<16x128xf32>
    %c0_2 = arith.constant 0 : index
    %c0_3 = arith.constant 0 : index
    %4 = vector.load %arg3[%c0_2, %c0_3] : memref<16x32xf32, #tpu.memory_space<vmem>>, vector<16x32xf32>
    %5 = arith.truncf %4 : vector<16x32xf32> to vector<16x32xbf16>
    %c0_4 = arith.constant 0 : index
    %c0_5 = arith.constant 0 : index
    %6 = vector.load %arg4[%c0_4, %c0_5] : memref<32x128xf32, #tpu.memory_space<vmem>>, vector<32x128xf32>
    %7 = arith.truncf %6 : vector<32x128xf32> to vector<32x128xbf16>
    %cst = arith.constant dense<0.000000e+00> : vector<16x128xf32>
    %8 = tpu.matmul %5, %7, %cst {dimension_numbers = #tpu.dot_dimension_numbers<[1], [0], [0], [1], [0, 0, 1, 1], [], []>} : vector<16x32xbf16>, vector<32x128xbf16>, vector<16x128xf32> -> vector<16x128xf32>
    %9 = arith.addf %3, %8 : vector<16x128xf32>
    %c0_6 = arith.constant 0 : index
    %c0_7 = arith.constant 0 : index
    %10 = vector.load %arg7[%c0_6, %c0_7] : memref<16x128xf32, #tpu.memory_space<vmem>>, vector<16x128xf32>
    tpu.vector_store %arg7[%c0_6, %c0_7], %9 {strides = array<i32>} : memref<16x128xf32, #tpu.memory_space<vmem>>, vector<16x128xf32>,
    %c0_i32_8 = arith.constant 0 : i32
    %11 = arith.cmpi eq, %arg2, %c0_i32_8 : i32
    %12 = arith.extui %11 : i1 to i32
    %c0_i32_9 = arith.constant 0 : i32
    %13 = arith.cmpi ne, %12, %c0_i32_9 : i32
    scf.if %13 {
      %c0_10 = arith.constant 0 : index
      %c0_11 = arith.constant 0 : index
      %14 = vector.load %arg7[%c0_10, %c0_11] : memref<16x128xf32, #tpu.memory_space<vmem>>, vector<16x128xf32>
      %c0_12 = arith.constant 0 : index
      %c0_13 = arith.constant 0 : index
      %15 = vector.load %arg5[%c0_12, %c0_13] : memref<1x128xf32, #tpu.memory_space<vmem>>, vector<1x128xf32>
      %16 = vector.broadcast %15 : vector<1x128xf32> to vector<16x128xf32>
      %17 = arith.addf %14, %16 : vector<16x128xf32>
      %c0_14 = arith.constant 0 : index
      %c0_15 = arith.constant 0 : index
      %18 = vector.load %arg6[%c0_14, %c0_15] : memref<16x128xf32, #tpu.memory_space<vmem>>, vector<16x128xf32>
      tpu.vector_store %arg6[%c0_14, %c0_15], %17 {strides = array<i32>} : memref<16x128xf32, #tpu.memory_space<vmem>>, vector<16x128xf32>,
    } else {
    }
    return
  }
  func.func @transform_0(%arg0: i32, %arg1: i32, %arg2: i32) -> (i32, i32) {
    %c0_i32 = arith.constant 0 : i32
    return %arg0, %arg2 : i32, i32
  }
  func.func @transform_1(%arg0: i32, %arg1: i32, %arg2: i32) -> (i32, i32) {
    %c0_i32 = arith.constant 0 : i32
    return %arg2, %arg1 : i32, i32
  }
  func.func @transform_2(%arg0: i32, %arg1: i32, %arg2: i32) -> (i32, i32) {
    %c0_i32 = arith.constant 0 : i32
    %c0_i32_0 = arith.constant 0 : i32
    return %c0_i32, %arg1 : i32, i32
  }
  func.func @transform_3(%arg0: i32, %arg1: i32, %arg2: i32) -> (i32, i32) {
    %c0_i32 = arith.constant 0 : i32
    return %arg0, %arg1 : i32, i32
  }
}

module attributes {stable_mosaic.version = 11 : i64} {
  func.func @_matmul_bias_kernel(%arg0: i32, %arg1: i32, %arg2: i32, %arg3: memref<16x32xf32, #tpu.memory_space<vmem>>, %arg4: memref<32x96xbf16, #tpu.memory_space<vmem>>, %arg5: memref<1x96xf32, #tpu.memory_space<vmem>>, %arg6: memref<16x96xf32, #tpu.memory_space<vmem>>, %arg7: memref<16x96xf32, #tpu.memory_space<vmem>>) attributes {dimension_semantics = [#tpu.dimension_semantics<parallel>, #tpu.dimension_semantics<parallel>, #tpu.dimension_semantics<arbitrary>], iteration_bounds = array<i64: 1, 1, 1>, scalar_prefetch = 0 : i64, scratch_operands = 1 : i64, tpu.core_type = #tpu.core_type<tc>, window_params = [{transform_indices = @transform_0, window_bounds = array<i64: 16, 32>}, {transform_indices = @transform_1, window_bounds = array<i64: 32, 96>}, {transform_indices = @transform_2, window_bounds = array<i64: 1, 96>}, {transform_indices = @transform_3, window_bounds = array<i64: 16, 96>}]} {
    %c0_i32 = arith.constant 0 : i32
    %0 = arith.cmpi eq, %arg2, %c0_i32 : i32
    %1 = arith.extui %0 : i1 to i32
    %c0_i32_0 = arith.constant 0 : i32
    %2 = arith.cmpi ne, %1, %c0_i32_0 : i32
    scf.if %2 {
      %cst_10 = arith.constant 0.000000e+00 : f32
      %13 = vector.broadcast %cst_10 : f32 to vector<16x96xf32>
      %c0_11 = arith.constant 0 : index
      %c0_12 = arith.constant 0 : index
      %14 = vector.load %arg7[%c0_11, %c0_12] : memref<16x96xf32, #tpu.memory_space<vmem>>, vector<16x96xf32>
      tpu.vector_store %arg7[%c0_11, %c0_12], %13 {strides = array<i32>} : memref<16x96xf32, #tpu.memory_space<vmem>>, vector<16x96xf32>,
    } else {
    }
    %c0 = arith.constant 0 : index
    %c0_1 = arith.constant 0 : index
    %3 = vector.load %arg7[%c0, %c0_1] : memref<16x96xf32, #tpu.memory_space<vmem>>, vector<16x96xf32>
    %c0_2 = arith.constant 0 : index
    %c0_3 = arith.constant 0 : index
    %4 = vector.load %arg3[%c0_2, %c0_3] : memref<16x32xf32, #tpu.memory_space<vmem>>, vector<16x32xf32>
    %5 = arith.truncf %4 : vector<16x32xf32> to vector<16x32xbf16>
    %c0_4 = arith.constant 0 : index
    %c0_5 = arith.constant 0 : index
    %6 = vector.load %arg4[%c0_4, %c0_5] : memref<32x96xbf16, #tpu.memory_space<vmem>>, vector<32x96xbf16>
    %cst = arith.constant dense<0.000000e+00> : vector<16x96xf32>
    %7 = tpu.matmul %5, %6, %cst {dimension_numbers = #tpu.dot_dimension_numbers<[1], [0], [0], [1], [0, 0, 1, 1], [], []>} : vector<16x32xbf16>, vector<32x96xbf16>, vector<16x96xf32> -> vector<16x96xf32>
    %8 = arith.addf %3, %7 : vector<16x96xf32>
    %c0_6 = arith.constant 0 : index
    %c0_7 = arith.constant 0 : index
    %9 = vector.load %arg7[%c0_6, %c0_7] : memref<16x96xf32, #tpu.memory_space<vmem>>, vector<16x96xf32>
    tpu.vector_store %arg7[%c0_6, %c0_7], %8 {strides = array<i32>} : memref<16x96xf32, #tpu.memory_space<vmem>>, vector<16x96xf32>,
    %c0_i32_8 = arith.constant 0 : i32
    %10 = arith.cmpi eq, %arg2, %c0_i32_8 : i32
    %11 = arith.extui %10 : i1 to i32
    %c0_i32_9 = arith.constant 0 : i32
    %12 = arith.cmpi ne, %11, %c0_i32_9 : i32
    scf.if %12 {
      %c0_10 = arith.constant 0 : index
      %c0_11 = arith.constant 0 : index
      %13 = vector.load %arg7[%c0_10, %c0_11] : memref<16x96xf32, #tpu.memory_space<vmem>>, vector<16x96xf32>
      %c0_12 = arith.constant 0 : index
      %c0_13 = arith.constant 0 : index
      %14 = vector.load %arg5[%c0_12, %c0_13] : memref<1x96xf32, #tpu.memory_space<vmem>>, vector<1x96xf32>
      %15 = vector.broadcast %14 : vector<1x96xf32> to vector<16x96xf32>
      %16 = arith.addf %13, %15 : vector<16x96xf32>
      %c0_14 = arith.constant 0 : index
      %c0_15 = arith.constant 0 : index
      %17 = vector.load %arg6[%c0_14, %c0_15] : memref<16x96xf32, #tpu.memory_space<vmem>>, vector<16x96xf32>
      tpu.vector_store %arg6[%c0_14, %c0_15], %16 {strides = array<i32>} : memref<16x96xf32, #tpu.memory_space<vmem>>, vector<16x96xf32>,
    } else {
    }
    return
  }
  func.func @transform_0(%arg0: i32, %arg1: i32, %arg2: i32) -> (i32, i32) {
    %c0_i32 = arith.constant 0 : i32
    return %arg0, %arg2 : i32, i32
  }
  func.func @transform_1(%arg0: i32, %arg1: i32, %arg2: i32) -> (i32, i32) {
    %c0_i32 = arith.constant 0 : i32
    return %arg2, %arg1 : i32, i32
  }
  func.func @transform_2(%arg0: i32, %arg1: i32, %arg2: i32) -> (i32, i32) {
    %c0_i32 = arith.constant 0 : i32
    %c0_i32_0 = arith.constant 0 : i32
    return %c0_i32, %arg1 : i32, i32
  }
  func.func @transform_3(%arg0: i32, %arg1: i32, %arg2: i32) -> (i32, i32) {
    %c0_i32 = arith.constant 0 : i32
    return %arg0, %arg1 : i32, i32
  }
}

module attributes {stable_mosaic.version = 11 : i64} {
  func.func @_mha_ln_kernel(%arg0: i32, %arg1: memref<1x4x8x8xf32, #tpu.memory_space<vmem>>, %arg2: memref<1x4x8x8xf32, #tpu.memory_space<vmem>>, %arg3: memref<1x4x8x8xf32, #tpu.memory_space<vmem>>, %arg4: memref<1x1x8xf32, #tpu.memory_space<vmem>>, %arg5: memref<1x8x32xf32, #tpu.memory_space<vmem>>, %arg6: memref<4x8x32xbf16, #tpu.memory_space<vmem>>, %arg7: memref<1x32xf32, #tpu.memory_space<vmem>>, %arg8: memref<1x32xf32, #tpu.memory_space<vmem>>, %arg9: memref<1x32xf32, #tpu.memory_space<vmem>>, %arg10: memref<1x8x32xf32, #tpu.memory_space<vmem>>) attributes {dimension_semantics = [#tpu.dimension_semantics<parallel>], iteration_bounds = array<i64: 2>, scalar_prefetch = 0 : i64, scratch_operands = 0 : i64, tpu.core_type = #tpu.core_type<tc>, window_params = [{transform_indices = @transform_0, window_bounds = array<i64: 1, 4, 8, 8>}, {transform_indices = @transform_1, window_bounds = array<i64: 1, 4, 8, 8>}, {transform_indices = @transform_2, window_bounds = array<i64: 1, 4, 8, 8>}, {transform_indices = @transform_3, window_bounds = array<i64: 1, 1, 8>}, {transform_indices = @transform_4, window_bounds = array<i64: 1, 8, 32>}, {pipeline_mode = #tpu.pipeline_mode<synchronous>, transform_indices = @transform_5, window_bounds = array<i64: 4, 8, 32>}, {pipeline_mode = #tpu.pipeline_mode<synchronous>, transform_indices = @transform_6, window_bounds = array<i64: 1, 32>}, {pipeline_mode = #tpu.pipeline_mode<synchronous>, transform_indices = @transform_7, window_bounds = array<i64: 1, 32>}, {pipeline_mode = #tpu.pipeline_mode<synchronous>, transform_indices = @transform_8, window_bounds = array<i64: 1, 32>}, {transform_indices = @transform_9, window_bounds = array<i64: 1, 8, 32>}]} {
    %c0 = arith.constant 0 : index
    %c0_0 = arith.constant 0 : index
    %c0_1 = arith.constant 0 : index
    %c0_2 = arith.constant 0 : index
    %0 = vector.load %arg1[%c0, %c0_0, %c0_1, %c0_2] : memref<1x4x8x8xf32, #tpu.memory_space<vmem>>, vector<1x4x8x8xf32>
    %1 = vector.shape_cast %0 : vector<1x4x8x8xf32> to vector<4x8x8xf32>
    %cst = arith.constant 0.353553385 : f32
    %2 = vector.broadcast %cst : f32 to vector<4x8x8xf32>
    %3 = arith.mulf %1, %2 : vector<4x8x8xf32>
    %4 = arith.truncf %3 : vector<4x8x8xf32> to vector<4x8x8xbf16>
    %c0_3 = arith.constant 0 : index
    %c0_4 = arith.constant 0 : index
    %c0_5 = arith.constant 0 : index
    %c0_6 = arith.constant 0 : index
    %5 = vector.load %arg2[%c0_3, %c0_4, %c0_5, %c0_6] : memref<1x4x8x8xf32, #tpu.memory_space<vmem>>, vector<1x4x8x8xf32>
    %6 = vector.shape_cast %5 : vector<1x4x8x8xf32> to vector<4x8x8xf32>
    %7 = arith.truncf %6 : vector<4x8x8xf32> to vector<4x8x8xbf16>
    %c0_7 = arith.constant 0 : index
    %c0_8 = arith.constant 0 : index
    %c0_9 = arith.constant 0 : index
    %c0_10 = arith.constant 0 : index
    %8 = vector.load %arg3[%c0_7, %c0_8, %c0_9, %c0_10] : memref<1x4x8x8xf32, #tpu.memory_space<vmem>>, vector<1x4x8x8xf32>
    %9 = vector.shape_cast %8 : vector<1x4x8x8xf32> to vector<4x8x8xf32>
    %10 = arith.truncf %9 : vector<4x8x8xf32> to vector<4x8x8xbf16>
    "tpu.trace_start"() <{level = 10 : i32, message = "hqd,hkd->hqk"}> : () -> ()
    %cst_11 = arith.constant dense<0.000000e+00> : vector<4x8x8xf32>
    %11 = tpu.matmul %4, %7, %cst_11 {dimension_numbers = #tpu.dot_dimension_numbers<[2], [2], [1], [1], [0, 0, 0, 1, 1, 1], [0], [0]>} : vector<4x8x8xbf16>, vector<4x8x8xbf16>, vector<4x8x8xf32> -> vector<4x8x8xf32>
    "tpu.trace_stop"() : () -> ()
    %c0_12 = arith.constant 0 : index
    %c0_13 = arith.constant 0 : index
    %c0_14 = arith.constant 0 : index
    %12 = vector.load %arg4[%c0_12, %c0_13, %c0_14] : memref<1x1x8xf32, #tpu.memory_space<vmem>>, vector<1x1x8xf32>
    %13 = vector.shape_cast %12 : vector<1x1x8xf32> to vector<1x8xf32>
    %14 = vector.shape_cast %13 : vector<1x8xf32> to vector<1x1x8xf32>
    %cst_15 = arith.constant 5.000000e-01 : f32
    %15 = vector.broadcast %cst_15 : f32 to vector<1x1x8xf32>
    %16 = arith.cmpf ogt, %14, %15 : vector<1x1x8xf32>
    %cst_16 = arith.constant -1.000000e+09 : f32
    %17 = vector.shape_cast %16 : vector<1x1x8xi1> to vector<1x1x8xi1>
    %18 = vector.broadcast %17 : vector<1x1x8xi1> to vector<4x8x8xi1>
    %19 = vector.broadcast %cst_16 : f32 to vector<4x8x8xf32>
    %20 = arith.select %18, %19, %11 : vector<4x8x8xi1>, vector<4x8x8xf32>
    %cst_17 = arith.constant dense<0xFF800000> : vector<4x8xf32>
    %21 = vector.multi_reduction <maximumf>, %20, %cst_17 [2] : vector<4x8x8xf32> to vector<4x8xf32>
    %22 = vector.shape_cast %21 : vector<4x8xf32> to vector<4x8x1xf32>
    %23 = vector.broadcast %22 : vector<4x8x1xf32> to vector<4x8x8xf32>
    %24 = arith.subf %20, %23 : vector<4x8x8xf32>
    %25 = math.exp %24 : vector<4x8x8xf32>
    %cst_18 = arith.constant dense<0.000000e+00> : vector<4x8xf32>
    %26 = vector.multi_reduction <add>, %25, %cst_18 [2] : vector<4x8x8xf32> to vector<4x8xf32>
    %27 = vector.shape_cast %26 : vector<4x8xf32> to vector<4x8x1xf32>
    %28 = tpu.reciprocal %27 {approx = true} : vector<4x8x1xf32> -> vector<4x8x1xf32>
    %29 = vector.broadcast %28 : vector<4x8x1xf32> to vector<4x8x8xf32>
    %30 = arith.mulf %25, %29 : vector<4x8x8xf32>
    %31 = arith.truncf %30 : vector<4x8x8xf32> to vector<4x8x8xbf16>
    "tpu.trace_start"() <{level = 10 : i32, message = "hqk,hkd->hqd"}> : () -> ()
    %cst_19 = arith.constant dense<0.000000e+00> : vector<4x8x8xf32>
    %32 = tpu.matmul %31, %10, %cst_19 {dimension_numbers = #tpu.dot_dimension_numbers<[2], [1], [1], [2], [0, 0, 0, 1, 1, 2], [0], [0]>} : vector<4x8x8xbf16>, vector<4x8x8xbf16>, vector<4x8x8xf32> -> vector<4x8x8xf32>
    "tpu.trace_stop"() : () -> ()
    %33 = arith.truncf %32 : vector<4x8x8xf32> to vector<4x8x8xbf16>
    %c0_20 = arith.constant 0 : index
    %c0_21 = arith.constant 0 : index
    %c0_22 = arith.constant 0 : index
    %34 = vector.load %arg6[%c0_20, %c0_21, %c0_22] : memref<4x8x32xbf16, #tpu.memory_space<vmem>>, vector<4x8x32xbf16>
    "tpu.trace_start"() <{level = 10 : i32, message = "hqd,hdo->hqo"}> : () -> ()
    %cst_23 = arith.constant dense<0.000000e+00> : vector<4x8x32xf32>
    %35 = tpu.matmul %33, %34, %cst_23 {dimension_numbers = #tpu.dot_dimension_numbers<[2], [1], [1], [2], [0, 0, 0, 1, 1, 2], [0], [0]>} : vector<4x8x8xbf16>, vector<4x8x32xbf16>, vector<4x8x32xf32> -> vector<4x8x32xf32>
    "tpu.trace_stop"() : () -> ()
    %cst_24 = arith.constant dense<0.000000e+00> : vector<8x32xf32>
    %36 = vector.multi_reduction <add>, %35, %cst_24 [0] : vector<4x8x32xf32> to vector<8x32xf32>
    %c0_25 = arith.constant 0 : index
    %c0_26 = arith.constant 0 : index
    %37 = vector.load %arg7[%c0_25, %c0_26] : memref<1x32xf32, #tpu.memory_space<vmem>>, vector<1x32xf32>
    %38 = vector.broadcast %37 : vector<1x32xf32> to vector<8x32xf32>
    %39 = arith.addf %36, %38 : vector<8x32xf32>
    %c0_27 = arith.constant 0 : index
    %c0_28 = arith.constant 0 : index
    %c0_29 = arith.constant 0 : index
    %40 = vector.load %arg5[%c0_27, %c0_28, %c0_29] : memref<1x8x32xf32, #tpu.memory_space<vmem>>, vector<1x8x32xf32>
    %41 = vector.shape_cast %40 : vector<1x8x32xf32> to vector<8x32xf32>
    %42 = arith.addf %39, %41 : vector<8x32xf32>
    %c0_30 = arith.constant 0 : index
    %c0_31 = arith.constant 0 : index
    %43 = vector.load %arg8[%c0_30, %c0_31] : memref<1x32xf32, #tpu.memory_space<vmem>>, vector<1x32xf32>
    %c0_32 = arith.constant 0 : index
    %c0_33 = arith.constant 0 : index
    %44 = vector.load %arg9[%c0_32, %c0_33] : memref<1x32xf32, #tpu.memory_space<vmem>>, vector<1x32xf32>
    %cst_34 = arith.constant dense<0.000000e+00> : vector<8xf32>
    %45 = vector.multi_reduction <add>, %42, %cst_34 [1] : vector<8x32xf32> to vector<8xf32>
    %46 = vector.shape_cast %45 : vector<8xf32> to vector<8x1xf32>
    %cst_35 = arith.constant 3.200000e+01 : f32
    %47 = vector.broadcast %cst_35 : f32 to vector<8x1xf32>
    %48 = arith.divf %46, %47 : vector<8x1xf32>
    %49 = vector.broadcast %48 : vector<8x1xf32> to vector<8x32xf32>
    %50 = arith.subf %42, %49 : vector<8x32xf32>
    %51 = arith.mulf %50, %50 : vector<8x32xf32>
    %cst_36 = arith.constant dense<0.000000e+00> : vector<8xf32>
    %52 = vector.multi_reduction <add>, %51, %cst_36 [1] : vector<8x32xf32> to vector<8xf32>
    %53 = vector.shape_cast %52 : vector<8xf32> to vector<8x1xf32>
    %cst_37 = arith.constant 3.200000e+01 : f32
    %54 = vector.broadcast %cst_37 : f32 to vector<8x1xf32>
    %55 = arith.divf %53, %54 : vector<8x1xf32>
    %56 = vector.broadcast %48 : vector<8x1xf32> to vector<8x32xf32>
    %57 = arith.subf %42, %56 : vector<8x32xf32>
    %cst_38 = arith.constant 9.99999997E-7 : f32
    %58 = vector.broadcast %cst_38 : f32 to vector<8x1xf32>
    %59 = arith.addf %55, %58 : vector<8x1xf32>
    %60 = math.rsqrt %59 : vector<8x1xf32>
    %61 = vector.broadcast %60 : vector<8x1xf32> to vector<8x32xf32>
    %62 = arith.mulf %57, %61 : vector<8x32xf32>
    %63 = vector.broadcast %43 : vector<1x32xf32> to vector<8x32xf32>
    %64 = arith.mulf %62, %63 : vector<8x32xf32>
    %65 = vector.broadcast %44 : vector<1x32xf32> to vector<8x32xf32>
    %66 = arith.addf %64, %65 : vector<8x32xf32>
    %c0_39 = arith.constant 0 : index
    %c0_40 = arith.constant 0 : index
    %c0_41 = arith.constant 0 : index
    %67 = vector.load %arg10[%c0_39, %c0_40, %c0_41] : memref<1x8x32xf32, #tpu.memory_space<vmem>>, vector<1x8x32xf32>
    %68 = vector.shape_cast %67 : vector<1x8x32xf32> to vector<8x32xf32>
    %69 = vector.shape_cast %66 : vector<8x32xf32> to vector<1x8x32xf32>
    tpu.vector_store %arg10[%c0_39, %c0_40, %c0_41], %69 {strides = array<i32>} : memref<1x8x32xf32, #tpu.memory_space<vmem>>, vector<1x8x32xf32>,
    return
  }
  func.func @transform_0(%arg0: i32) -> (i32, i32, i32, i32) {
    %c0_i32 = arith.constant 0 : i32
    %c0_i32_0 = arith.constant 0 : i32
    %c0_i32_1 = arith.constant 0 : i32
    %c0_i32_2 = arith.constant 0 : i32
    return %arg0, %c0_i32, %c0_i32_0, %c0_i32_1 : i32, i32, i32, i32
  }
  func.func @transform_1(%arg0: i32) -> (i32, i32, i32, i32) {
    %c0_i32 = arith.constant 0 : i32
    %c0_i32_0 = arith.constant 0 : i32
    %c0_i32_1 = arith.constant 0 : i32
    %c0_i32_2 = arith.constant 0 : i32
    return %arg0, %c0_i32, %c0_i32_0, %c0_i32_1 : i32, i32, i32, i32
  }
  func.func @transform_2(%arg0: i32) -> (i32, i32, i32, i32) {
    %c0_i32 = arith.constant 0 : i32
    %c0_i32_0 = arith.constant 0 : i32
    %c0_i32_1 = arith.constant 0 : i32
    %c0_i32_2 = arith.constant 0 : i32
    return %arg0, %c0_i32, %c0_i32_0, %c0_i32_1 : i32, i32, i32, i32
  }
  func.func @transform_3(%arg0: i32) -> (i32, i32, i32) {
    %c0_i32 = arith.constant 0 : i32
    %c0_i32_0 = arith.constant 0 : i32
    %c0_i32_1 = arith.constant 0 : i32
    return %arg0, %c0_i32, %c0_i32_0 : i32, i32, i32
  }
  func.func @transform_4(%arg0: i32) -> (i32, i32, i32) {
    %c0_i32 = arith.constant 0 : i32
    %c0_i32_0 = arith.constant 0 : i32
    %c0_i32_1 = arith.constant 0 : i32
    return %arg0, %c0_i32, %c0_i32_0 : i32, i32, i32
  }
  func.func @transform_5(%arg0: i32) -> (i32, i32, i32) {
    %c0_i32 = arith.constant 0 : i32
    %c0_i32_0 = arith.constant 0 : i32
    %c0_i32_1 = arith.constant 0 : i32
    %c0_i32_2 = arith.constant 0 : i32
    return %c0_i32, %c0_i32_0, %c0_i32_1 : i32, i32, i32
  }
  func.func @transform_6(%arg0: i32) -> (i32, i32) {
    %c0_i32 = arith.constant 0 : i32
    %c0_i32_0 = arith.constant 0 : i32
    %c0_i32_1 = arith.constant 0 : i32
    return %c0_i32, %c0_i32_0 : i32, i32
  }
  func.func @transform_7(%arg0: i32) -> (i32, i32) {
    %c0_i32 = arith.constant 0 : i32
    %c0_i32_0 = arith.constant 0 : i32
    %c0_i32_1 = arith.constant 0 : i32
    return %c0_i32, %c0_i32_0 : i32, i32
  }
  func.func @transform_8(%arg0: i32) -> (i32, i32) {
    %c0_i32 = arith.constant 0 : i32
    %c0_i32_0 = arith.constant 0 : i32
    %c0_i32_1 = arith.constant 0 : i32
    return %c0_i32, %c0_i32_0 : i32, i32
  }
  func.func @transform_9(%arg0: i32) -> (i32, i32, i32) {
    %c0_i32 = arith.constant 0 : i32
    %c0_i32_0 = arith.constant 0 : i32
    %c0_i32_1 = arith.constant 0 : i32
    return %arg0, %c0_i32, %c0_i32_0 : i32, i32, i32
  }
}

module attributes {stable_mosaic.version = 11 : i64} {
  func.func @_ffn_ln_kernel(%arg0: i32, %arg1: memref<16x32xf32, #tpu.memory_space<vmem>>, %arg2: memref<32x64xbf16, #tpu.memory_space<vmem>>, %arg3: memref<1x64xf32, #tpu.memory_space<vmem>>, %arg4: memref<64x32xbf16, #tpu.memory_space<vmem>>, %arg5: memref<1x32xf32, #tpu.memory_space<vmem>>, %arg6: memref<1x32xf32, #tpu.memory_space<vmem>>, %arg7: memref<1x32xf32, #tpu.memory_space<vmem>>, %arg8: memref<16x32xf32, #tpu.memory_space<vmem>>) attributes {dimension_semantics = [#tpu.dimension_semantics<parallel>], iteration_bounds = array<i64: 1>, scalar_prefetch = 0 : i64, scratch_operands = 0 : i64, tpu.core_type = #tpu.core_type<tc>, window_params = [{transform_indices = @transform_0, window_bounds = array<i64: 16, 32>}, {pipeline_mode = #tpu.pipeline_mode<synchronous>, transform_indices = @transform_1, window_bounds = array<i64: 32, 64>}, {pipeline_mode = #tpu.pipeline_mode<synchronous>, transform_indices = @transform_2, window_bounds = array<i64: 1, 64>}, {pipeline_mode = #tpu.pipeline_mode<synchronous>, transform_indices = @transform_3, window_bounds = array<i64: 64, 32>}, {pipeline_mode = #tpu.pipeline_mode<synchronous>, transform_indices = @transform_4, window_bounds = array<i64: 1, 32>}, {pipeline_mode = #tpu.pipeline_mode<synchronous>, transform_indices = @transform_5, window_bounds = array<i64: 1, 32>}, {pipeline_mode = #tpu.pipeline_mode<synchronous>, transform_indices = @transform_6, window_bounds = array<i64: 1, 32>}, {transform_indices = @transform_7, window_bounds = array<i64: 16, 32>}]} {
    %c0 = arith.constant 0 : index
    %c0_0 = arith.constant 0 : index
    %0 = vector.load %arg1[%c0, %c0_0] : memref<16x32xf32, #tpu.memory_space<vmem>>, vector<16x32xf32>
    %1 = arith.truncf %0 : vector<16x32xf32> to vector<16x32xbf16>
    %c0_1 = arith.constant 0 : index
    %c0_2 = arith.constant 0 : index
    %2 = vector.load %arg2[%c0_1, %c0_2] : memref<32x64xbf16, #tpu.memory_space<vmem>>, vector<32x64xbf16>
    %cst = arith.constant dense<0.000000e+00> : vector<16x64xf32>
    %3 = tpu.matmul %1, %2, %cst {dimension_numbers = #tpu.dot_dimension_numbers<[1], [0], [0], [1], [0, 0, 1, 1], [], []>} : vector<16x32xbf16>, vector<32x64xbf16>, vector<16x64xf32> -> vector<16x64xf32>
    %c0_3 = arith.constant 0 : index
    %c0_4 = arith.constant 0 : index
    %4 = vector.load %arg3[%c0_3, %c0_4] : memref<1x64xf32, #tpu.memory_space<vmem>>, vector<1x64xf32>
    %5 = vector.broadcast %4 : vector<1x64xf32> to vector<16x64xf32>
    %6 = arith.addf %3, %5 : vector<16x64xf32>
    %cst_5 = arith.constant 0.000000e+00 : f32
    %7 = vector.broadcast %cst_5 : f32 to vector<16x64xf32>
    %8 = arith.maximumf %6, %7 : vector<16x64xf32>
    %9 = arith.truncf %8 : vector<16x64xf32> to vector<16x64xbf16>
    %c0_6 = arith.constant 0 : index
    %c0_7 = arith.constant 0 : index
    %10 = vector.load %arg4[%c0_6, %c0_7] : memref<64x32xbf16, #tpu.memory_space<vmem>>, vector<64x32xbf16>
    %cst_8 = arith.constant dense<0.000000e+00> : vector<16x32xf32>
    %11 = tpu.matmul %9, %10, %cst_8 {dimension_numbers = #tpu.dot_dimension_numbers<[1], [0], [0], [1], [0, 0, 1, 1], [], []>} : vector<16x64xbf16>, vector<64x32xbf16>, vector<16x32xf32> -> vector<16x32xf32>
    %c0_9 = arith.constant 0 : index
    %c0_10 = arith.constant 0 : index
    %12 = vector.load %arg5[%c0_9, %c0_10] : memref<1x32xf32, #tpu.memory_space<vmem>>, vector<1x32xf32>
    %13 = vector.broadcast %12 : vector<1x32xf32> to vector<16x32xf32>
    %14 = arith.addf %11, %13 : vector<16x32xf32>
    %15 = arith.addf %0, %14 : vector<16x32xf32>
    %c0_11 = arith.constant 0 : index
    %c0_12 = arith.constant 0 : index
    %16 = vector.load %arg6[%c0_11, %c0_12] : memref<1x32xf32, #tpu.memory_space<vmem>>, vector<1x32xf32>
    %c0_13 = arith.constant 0 : index
    %c0_14 = arith.constant 0 : index
    %17 = vector.load %arg7[%c0_13, %c0_14] : memref<1x32xf32, #tpu.memory_space<vmem>>, vector<1x32xf32>
    %cst_15 = arith.constant dense<0.000000e+00> : vector<16xf32>
    %18 = vector.multi_reduction <add>, %15, %cst_15 [1] : vector<16x32xf32> to vector<16xf32>
    %19 = vector.shape_cast %18 : vector<16xf32> to vector<16x1xf32>
    %cst_16 = arith.constant 3.200000e+01 : f32
    %20 = vector.broadcast %cst_16 : f32 to vector<16x1xf32>
    %21 = arith.divf %19, %20 : vector<16x1xf32>
    %22 = vector.broadcast %21 : vector<16x1xf32> to vector<16x32xf32>
    %23 = arith.subf %15, %22 : vector<16x32xf32>
    %24 = arith.mulf %23, %23 : vector<16x32xf32>
    %cst_17 = arith.constant dense<0.000000e+00> : vector<16xf32>
    %25 = vector.multi_reduction <add>, %24, %cst_17 [1] : vector<16x32xf32> to vector<16xf32>
    %26 = vector.shape_cast %25 : vector<16xf32> to vector<16x1xf32>
    %cst_18 = arith.constant 3.200000e+01 : f32
    %27 = vector.broadcast %cst_18 : f32 to vector<16x1xf32>
    %28 = arith.divf %26, %27 : vector<16x1xf32>
    %29 = vector.broadcast %21 : vector<16x1xf32> to vector<16x32xf32>
    %30 = arith.subf %15, %29 : vector<16x32xf32>
    %cst_19 = arith.constant 9.99999997E-7 : f32
    %31 = vector.broadcast %cst_19 : f32 to vector<16x1xf32>
    %32 = arith.addf %28, %31 : vector<16x1xf32>
    %33 = math.rsqrt %32 : vector<16x1xf32>
    %34 = vector.broadcast %33 : vector<16x1xf32> to vector<16x32xf32>
    %35 = arith.mulf %30, %34 : vector<16x32xf32>
    %36 = vector.broadcast %16 : vector<1x32xf32> to vector<16x32xf32>
    %37 = arith.mulf %35, %36 : vector<16x32xf32>
    %38 = vector.broadcast %17 : vector<1x32xf32> to vector<16x32xf32>
    %39 = arith.addf %37, %38 : vector<16x32xf32>
    %c0_20 = arith.constant 0 : index
    %c0_21 = arith.constant 0 : index
    %40 = vector.load %arg8[%c0_20, %c0_21] : memref<16x32xf32, #tpu.memory_space<vmem>>, vector<16x32xf32>
    tpu.vector_store %arg8[%c0_20, %c0_21], %39 {strides = array<i32>} : memref<16x32xf32, #tpu.memory_space<vmem>>, vector<16x32xf32>,
    return
  }
  func.func @transform_0(%arg0: i32) -> (i32, i32) {
    %c0_i32 = arith.constant 0 : i32
    %c0_i32_0 = arith.constant 0 : i32
    return %arg0, %c0_i32 : i32, i32
  }
  func.func @transform_1(%arg0: i32) -> (i32, i32) {
    %c0_i32 = arith.constant 0 : i32
    %c0_i32_0 = arith.constant 0 : i32
    %c0_i32_1 = arith.constant 0 : i32
    return %c0_i32, %c0_i32_0 : i32, i32
  }
  func.func @transform_2(%arg0: i32) -> (i32, i32) {
    %c0_i32 = arith.constant 0 : i32
    %c0_i32_0 = arith.constant 0 : i32
    %c0_i32_1 = arith.constant 0 : i32
    return %c0_i32, %c0_i32_0 : i32, i32
  }
  func.func @transform_3(%arg0: i32) -> (i32, i32) {
    %c0_i32 = arith.constant 0 : i32
    %c0_i32_0 = arith.constant 0 : i32
    %c0_i32_1 = arith.constant 0 : i32
    return %c0_i32, %c0_i32_0 : i32, i32
  }
  func.func @transform_4(%arg0: i32) -> (i32, i32) {
    %c0_i32 = arith.constant 0 : i32
    %c0_i32_0 = arith.constant 0 : i32
    %c0_i32_1 = arith.constant 0 : i32
    return %c0_i32, %c0_i32_0 : i32, i32
  }
  func.func @transform_5(%arg0: i32) -> (i32, i32) {
    %c0_i32 = arith.constant 0 : i32
    %c0_i32_0 = arith.constant 0 : i32
    %c0_i32_1 = arith.constant 0 : i32
    return %c0_i32, %c0_i32_0 : i32, i32
  }
  func.func @transform_6(%arg0: i32) -> (i32, i32) {
    %c0_i32 = arith.constant 0 : i32
    %c0_i32_0 = arith.constant 0 : i32
    %c0_i32_1 = arith.constant 0 : i32
    return %c0_i32, %c0_i32_0 : i32, i32
  }
  func.func @transform_7(%arg0: i32) -> (i32, i32) {
    %c0_i32 = arith.constant 0 : i32
    %c0_i32_0 = arith.constant 0 : i32
    return %arg0, %c0_i32 : i32, i32
  }
}

module attributes {stable_mosaic.version = 11 : i64} {
  func.func @_attflat_kernel(%arg0: i32, %arg1: memref<1x8x32xf32, #tpu.memory_space<vmem>>, %arg2: memref<1x8x1xf32, #tpu.memory_space<vmem>>, %arg3: memref<32x32xbf16, #tpu.memory_space<vmem>>, %arg4: memref<1x32xf32, #tpu.memory_space<vmem>>, %arg5: memref<32x1xbf16, #tpu.memory_space<vmem>>, %arg6: memref<1x1xf32, #tpu.memory_space<vmem>>, %arg7: memref<1x1x32xf32, #tpu.memory_space<vmem>>) attributes {dimension_semantics = [#tpu.dimension_semantics<parallel>], iteration_bounds = array<i64: 2>, scalar_prefetch = 0 : i64, scratch_operands = 0 : i64, tpu.core_type = #tpu.core_type<tc>, window_params = [{transform_indices = @transform_0, window_bounds = array<i64: 1, 8, 32>}, {transform_indices = @transform_1, window_bounds = array<i64: 1, 8, 1>}, {pipeline_mode = #tpu.pipeline_mode<synchronous>, transform_indices = @transform_2, window_bounds = array<i64: 32, 32>}, {pipeline_mode = #tpu.pipeline_mode<synchronous>, transform_indices = @transform_3, window_bounds = array<i64: 1, 32>}, {pipeline_mode = #tpu.pipeline_mode<synchronous>, transform_indices = @transform_4, window_bounds = array<i64: 32, 1>}, {pipeline_mode = #tpu.pipeline_mode<synchronous>, transform_indices = @transform_5, window_bounds = array<i64: 1, 1>}, {transform_indices = @transform_6, window_bounds = array<i64: 1, 1, 32>}]} {
    %c0 = arith.constant 0 : index
    %c0_0 = arith.constant 0 : index
    %c0_1 = arith.constant 0 : index
    %0 = vector.load %arg1[%c0, %c0_0, %c0_1] : memref<1x8x32xf32, #tpu.memory_space<vmem>>, vector<1x8x32xf32>
    %1 = vector.shape_cast %0 : vector<1x8x32xf32> to vector<8x32xf32>
    %2 = arith.truncf %1 : vector<8x32xf32> to vector<8x32xbf16>
    %c0_2 = arith.constant 0 : index
    %c0_3 = arith.constant 0 : index
    %3 = vector.load %arg3[%c0_2, %c0_3] : memref<32x32xbf16, #tpu.memory_space<vmem>>, vector<32x32xbf16>
    %cst = arith.constant dense<0.000000e+00> : vector<8x32xf32>
    %4 = tpu.matmul %2, %3, %cst {dimension_numbers = #tpu.dot_dimension_numbers<[1], [0], [0], [1], [0, 0, 1, 1], [], []>} : vector<8x32xbf16>, vector<32x32xbf16>, vector<8x32xf32> -> vector<8x32xf32>
    %c0_4 = arith.constant 0 : index
    %c0_5 = arith.constant 0 : index
    %5 = vector.load %arg4[%c0_4, %c0_5] : memref<1x32xf32, #tpu.memory_space<vmem>>, vector<1x32xf32>
    %6 = vector.broadcast %5 : vector<1x32xf32> to vector<8x32xf32>
    %7 = arith.addf %4, %6 : vector<8x32xf32>
    %cst_6 = arith.constant 0.000000e+00 : f32
    %8 = vector.broadcast %cst_6 : f32 to vector<8x32xf32>
    %9 = arith.maximumf %7, %8 : vector<8x32xf32>
    %10 = arith.truncf %9 : vector<8x32xf32> to vector<8x32xbf16>
    %c0_7 = arith.constant 0 : index
    %c0_8 = arith.constant 0 : index
    %11 = vector.load %arg5[%c0_7, %c0_8] : memref<32x1xbf16, #tpu.memory_space<vmem>>, vector<32x1xbf16>
    %cst_9 = arith.constant dense<0.000000e+00> : vector<8x1xf32>
    %12 = tpu.matmul %10, %11, %cst_9 {dimension_numbers = #tpu.dot_dimension_numbers<[1], [0], [0], [1], [0, 0, 1, 1], [], []>} : vector<8x32xbf16>, vector<32x1xbf16>, vector<8x1xf32> -> vector<8x1xf32>
    %c0_10 = arith.constant 0 : index
    %c0_11 = arith.constant 0 : index
    %13 = vector.load %arg6[%c0_10, %c0_11] : memref<1x1xf32, #tpu.memory_space<vmem>>, vector<1x1xf32>
    %14 = vector.broadcast %13 : vector<1x1xf32> to vector<8x1xf32>
    %15 = arith.addf %12, %14 : vector<8x1xf32>
    %c0_12 = arith.constant 0 : index
    %c0_13 = arith.constant 0 : index
    %c0_14 = arith.constant 0 : index
    %16 = vector.load %arg2[%c0_12, %c0_13, %c0_14] : memref<1x8x1xf32, #tpu.memory_space<vmem>>, vector<1x8x1xf32>
    %17 = vector.shape_cast %16 : vector<1x8x1xf32> to vector<8x1xf32>
    %cst_15 = arith.constant 5.000000e-01 : f32
    %18 = vector.broadcast %cst_15 : f32 to vector<8x1xf32>
    %19 = arith.cmpf ogt, %17, %18 : vector<8x1xf32>
    %cst_16 = arith.constant -1.000000e+09 : f32
    %20 = vector.broadcast %cst_16 : f32 to vector<8x1xf32>
    %21 = arith.select %19, %20, %15 : vector<8x1xi1>, vector<8x1xf32>
    %cst_17 = arith.constant dense<0xFF800000> : vector<1xf32>
    %22 = vector.multi_reduction <maximumf>, %21, %cst_17 [0] : vector<8x1xf32> to vector<1xf32>
    %23 = vector.shape_cast %22 : vector<1xf32> to vector<1x1xf32>
    %24 = vector.broadcast %23 : vector<1x1xf32> to vector<8x1xf32>
    %25 = arith.subf %21, %24 : vector<8x1xf32>
    %26 = math.exp %25 : vector<8x1xf32>
    %cst_18 = arith.constant dense<0.000000e+00> : vector<1xf32>
    %27 = vector.multi_reduction <add>, %26, %cst_18 [0] : vector<8x1xf32> to vector<1xf32>
    %28 = vector.shape_cast %27 : vector<1xf32> to vector<1x1xf32>
    %29 = tpu.reciprocal %28 {approx = true} : vector<1x1xf32> -> vector<1x1xf32>
    %30 = vector.broadcast %29 : vector<1x1xf32> to vector<8x1xf32>
    %31 = arith.mulf %26, %30 : vector<8x1xf32>
    %cst_19 = arith.constant dense<0.000000e+00> : vector<1x32xf32>
    %32 = tpu.matmul %31, %1, %cst_19 {dimension_numbers = #tpu.dot_dimension_numbers<[0], [0], [1], [1], [0, 1, 1, 1], [], []>} : vector<8x1xf32>, vector<8x32xf32>, vector<1x32xf32> -> vector<1x32xf32>
    %c0_20 = arith.constant 0 : index
    %c0_21 = arith.constant 0 : index
    %c0_22 = arith.constant 0 : index
    %33 = vector.load %arg7[%c0_20, %c0_21, %c0_22] : memref<1x1x32xf32, #tpu.memory_space<vmem>>, vector<1x1x32xf32>
    %34 = vector.shape_cast %33 : vector<1x1x32xf32> to vector<1x32xf32>
    %35 = vector.shape_cast %32 : vector<1x32xf32> to vector<1x1x32xf32>
    tpu.vector_store %arg7[%c0_20, %c0_21, %c0_22], %35 {strides = array<i32>} : memref<1x1x32xf32, #tpu.memory_space<vmem>>, vector<1x1x32xf32>,
    return
  }
  func.func @transform_0(%arg0: i32) -> (i32, i32, i32) {
    %c0_i32 = arith.constant 0 : i32
    %c0_i32_0 = arith.constant 0 : i32
    %c0_i32_1 = arith.constant 0 : i32
    return %arg0, %c0_i32, %c0_i32_0 : i32, i32, i32
  }
  func.func @transform_1(%arg0: i32) -> (i32, i32, i32) {
    %c0_i32 = arith.constant 0 : i32
    %c0_i32_0 = arith.constant 0 : i32
    %c0_i32_1 = arith.constant 0 : i32
    return %arg0, %c0_i32, %c0_i32_0 : i32, i32, i32
  }
  func.func @transform_2(%arg0: i32) -> (i32, i32) {
    %c0_i32 = arith.constant 0 : i32
    %c0_i32_0 = arith.constant 0 : i32
    %c0_i32_1 = arith.constant 0 : i32
    return %c0_i32, %c0_i32_0 : i32, i32
  }
  func.func @transform_3(%arg0: i32) -> (i32, i32) {
    %c0_i32 = arith.constant 0 : i32
    %c0_i32_0 = arith.constant 0 : i32
    %c0_i32_1 = arith.constant 0 : i32
    return %c0_i32, %c0_i32_0 : i32, i32
  }
  func.func @transform_4(%arg0: i32) -> (i32, i32) {
    %c0_i32 = arith.constant 0 : i32
    %c0_i32_0 = arith.constant 0 : i32
    %c0_i32_1 = arith.constant 0 : i32
    return %c0_i32, %c0_i32_0 : i32, i32
  }
  func.func @transform_5(%arg0: i32) -> (i32, i32) {
    %c0_i32 = arith.constant 0 : i32
    %c0_i32_0 = arith.constant 0 : i32
    %c0_i32_1 = arith.constant 0 : i32
    return %c0_i32, %c0_i32_0 : i32, i32
  }
  func.func @transform_6(%arg0: i32) -> (i32, i32, i32) {
    %c0_i32 = arith.constant 0 : i32
    %c0_i32_0 = arith.constant 0 : i32
    %c0_i32_1 = arith.constant 0 : i32
    return %arg0, %c0_i32, %c0_i32_0 : i32, i32, i32
  }
}

module attributes {stable_mosaic.version = 11 : i64} {
  func.func @_matmul_bias_kernel(%arg0: i32, %arg1: i32, %arg2: i32, %arg3: memref<2x32xf32, #tpu.memory_space<vmem>>, %arg4: memref<32x64xbf16, #tpu.memory_space<vmem>>, %arg5: memref<1x64xf32, #tpu.memory_space<vmem>>, %arg6: memref<2x64xf32, #tpu.memory_space<vmem>>, %arg7: memref<2x64xf32, #tpu.memory_space<vmem>>) attributes {dimension_semantics = [#tpu.dimension_semantics<parallel>, #tpu.dimension_semantics<parallel>, #tpu.dimension_semantics<arbitrary>], iteration_bounds = array<i64: 1, 1, 1>, scalar_prefetch = 0 : i64, scratch_operands = 1 : i64, tpu.core_type = #tpu.core_type<tc>, window_params = [{transform_indices = @transform_0, window_bounds = array<i64: 2, 32>}, {transform_indices = @transform_1, window_bounds = array<i64: 32, 64>}, {transform_indices = @transform_2, window_bounds = array<i64: 1, 64>}, {transform_indices = @transform_3, window_bounds = array<i64: 2, 64>}]} {
    %c0_i32 = arith.constant 0 : i32
    %0 = arith.cmpi eq, %arg2, %c0_i32 : i32
    %1 = arith.extui %0 : i1 to i32
    %c0_i32_0 = arith.constant 0 : i32
    %2 = arith.cmpi ne, %1, %c0_i32_0 : i32
    scf.if %2 {
      %cst_10 = arith.constant 0.000000e+00 : f32
      %13 = vector.broadcast %cst_10 : f32 to vector<2x64xf32>
      %c0_11 = arith.constant 0 : index
      %c0_12 = arith.constant 0 : index
      %14 = vector.load %arg7[%c0_11, %c0_12] : memref<2x64xf32, #tpu.memory_space<vmem>>, vector<2x64xf32>
      tpu.vector_store %arg7[%c0_11, %c0_12], %13 {strides = array<i32>} : memref<2x64xf32, #tpu.memory_space<vmem>>, vector<2x64xf32>,
    } else {
    }
    %c0 = arith.constant 0 : index
    %c0_1 = arith.constant 0 : index
    %3 = vector.load %arg7[%c0, %c0_1] : memref<2x64xf32, #tpu.memory_space<vmem>>, vector<2x64xf32>
    %c0_2 = arith.constant 0 : index
    %c0_3 = arith.constant 0 : index
    %4 = vector.load %arg3[%c0_2, %c0_3] : memref<2x32xf32, #tpu.memory_space<vmem>>, vector<2x32xf32>
    %5 = arith.truncf %4 : vector<2x32xf32> to vector<2x32xbf16>
    %c0_4 = arith.constant 0 : index
    %c0_5 = arith.constant 0 : index
    %6 = vector.load %arg4[%c0_4, %c0_5] : memref<32x64xbf16, #tpu.memory_space<vmem>>, vector<32x64xbf16>
    %cst = arith.constant dense<0.000000e+00> : vector<2x64xf32>
    %7 = tpu.matmul %5, %6, %cst {dimension_numbers = #tpu.dot_dimension_numbers<[1], [0], [0], [1], [0, 0, 1, 1], [], []>} : vector<2x32xbf16>, vector<32x64xbf16>, vector<2x64xf32> -> vector<2x64xf32>
    %8 = arith.addf %3, %7 : vector<2x64xf32>
    %c0_6 = arith.constant 0 : index
    %c0_7 = arith.constant 0 : index
    %9 = vector.load %arg7[%c0_6, %c0_7] : memref<2x64xf32, #tpu.memory_space<vmem>>, vector<2x64xf32>
    tpu.vector_store %arg7[%c0_6, %c0_7], %8 {strides = array<i32>} : memref<2x64xf32, #tpu.memory_space<vmem>>, vector<2x64xf32>,
    %c0_i32_8 = arith.constant 0 : i32
    %10 = arith.cmpi eq, %arg2, %c0_i32_8 : i32
    %11 = arith.extui %10 : i1 to i32
    %c0_i32_9 = arith.constant 0 : i32
    %12 = arith.cmpi ne, %11, %c0_i32_9 : i32
    scf.if %12 {
      %c0_10 = arith.constant 0 : index
      %c0_11 = arith.constant 0 : index
      %13 = vector.load %arg7[%c0_10, %c0_11] : memref<2x64xf32, #tpu.memory_space<vmem>>, vector<2x64xf32>
      %c0_12 = arith.constant 0 : index
      %c0_13 = arith.constant 0 : index
      %14 = vector.load %arg5[%c0_12, %c0_13] : memref<1x64xf32, #tpu.memory_space<vmem>>, vector<1x64xf32>
      %15 = vector.broadcast %14 : vector<1x64xf32> to vector<2x64xf32>
      %16 = arith.addf %13, %15 : vector<2x64xf32>
      %c0_14 = arith.constant 0 : index
      %c0_15 = arith.constant 0 : index
      %17 = vector.load %arg6[%c0_14, %c0_15] : memref<2x64xf32, #tpu.memory_space<vmem>>, vector<2x64xf32>
      tpu.vector_store %arg6[%c0_14, %c0_15], %16 {strides = array<i32>} : memref<2x64xf32, #tpu.memory_space<vmem>>, vector<2x64xf32>,
    } else {
    }
    return
  }
  func.func @transform_0(%arg0: i32, %arg1: i32, %arg2: i32) -> (i32, i32) {
    %c0_i32 = arith.constant 0 : i32
    return %arg0, %arg2 : i32, i32
  }
  func.func @transform_1(%arg0: i32, %arg1: i32, %arg2: i32) -> (i32, i32) {
    %c0_i32 = arith.constant 0 : i32
    return %arg2, %arg1 : i32, i32
  }
  func.func @transform_2(%arg0: i32, %arg1: i32, %arg2: i32) -> (i32, i32) {
    %c0_i32 = arith.constant 0 : i32
    %c0_i32_0 = arith.constant 0 : i32
    return %c0_i32, %arg1 : i32, i32
  }
  func.func @transform_3(%arg0: i32, %arg1: i32, %arg2: i32) -> (i32, i32) {
    %c0_i32 = arith.constant 0 : i32
    return %arg0, %arg1 : i32, i32
  }
}

module attributes {stable_mosaic.version = 11 : i64} {
  func.func @_matmul_bias_kernel(%arg0: i32, %arg1: i32, %arg2: i32, %arg3: memref<32x72xf32, #tpu.memory_space<vmem>>, %arg4: memref<72x32xbf16, #tpu.memory_space<vmem>>, %arg5: memref<1x32xf32, #tpu.memory_space<vmem>>, %arg6: memref<32x32xf32, #tpu.memory_space<vmem>>, %arg7: memref<32x32xf32, #tpu.memory_space<vmem>>) attributes {dimension_semantics = [#tpu.dimension_semantics<parallel>, #tpu.dimension_semantics<parallel>, #tpu.dimension_semantics<arbitrary>], iteration_bounds = array<i64: 1, 1, 1>, scalar_prefetch = 0 : i64, scratch_operands = 1 : i64, tpu.core_type = #tpu.core_type<tc>, window_params = [{transform_indices = @transform_0, window_bounds = array<i64: 32, 72>}, {transform_indices = @transform_1, window_bounds = array<i64: 72, 32>}, {transform_indices = @transform_2, window_bounds = array<i64: 1, 32>}, {transform_indices = @transform_3, window_bounds = array<i64: 32, 32>}]} {
    %c0_i32 = arith.constant 0 : i32
    %0 = arith.cmpi eq, %arg2, %c0_i32 : i32
    %1 = arith.extui %0 : i1 to i32
    %c0_i32_0 = arith.constant 0 : i32
    %2 = arith.cmpi ne, %1, %c0_i32_0 : i32
    scf.if %2 {
      %cst_10 = arith.constant 0.000000e+00 : f32
      %13 = vector.broadcast %cst_10 : f32 to vector<32x32xf32>
      %c0_11 = arith.constant 0 : index
      %c0_12 = arith.constant 0 : index
      %14 = vector.load %arg7[%c0_11, %c0_12] : memref<32x32xf32, #tpu.memory_space<vmem>>, vector<32x32xf32>
      tpu.vector_store %arg7[%c0_11, %c0_12], %13 {strides = array<i32>} : memref<32x32xf32, #tpu.memory_space<vmem>>, vector<32x32xf32>,
    } else {
    }
    %c0 = arith.constant 0 : index
    %c0_1 = arith.constant 0 : index
    %3 = vector.load %arg7[%c0, %c0_1] : memref<32x32xf32, #tpu.memory_space<vmem>>, vector<32x32xf32>
    %c0_2 = arith.constant 0 : index
    %c0_3 = arith.constant 0 : index
    %4 = vector.load %arg3[%c0_2, %c0_3] : memref<32x72xf32, #tpu.memory_space<vmem>>, vector<32x72xf32>
    %5 = arith.truncf %4 : vector<32x72xf32> to vector<32x72xbf16>
    %c0_4 = arith.constant 0 : index
    %c0_5 = arith.constant 0 : index
    %6 = vector.load %arg4[%c0_4, %c0_5] : memref<72x32xbf16, #tpu.memory_space<vmem>>, vector<72x32xbf16>
    %cst = arith.constant dense<0.000000e+00> : vector<32x32xf32>
    %7 = tpu.matmul %5, %6, %cst {dimension_numbers = #tpu.dot_dimension_numbers<[1], [0], [0], [1], [0, 0, 1, 1], [], []>} : vector<32x72xbf16>, vector<72x32xbf16>, vector<32x32xf32> -> vector<32x32xf32>
    %8 = arith.addf %3, %7 : vector<32x32xf32>
    %c0_6 = arith.constant 0 : index
    %c0_7 = arith.constant 0 : index
    %9 = vector.load %arg7[%c0_6, %c0_7] : memref<32x32xf32, #tpu.memory_space<vmem>>, vector<32x32xf32>
    tpu.vector_store %arg7[%c0_6, %c0_7], %8 {strides = array<i32>} : memref<32x32xf32, #tpu.memory_space<vmem>>, vector<32x32xf32>,
    %c0_i32_8 = arith.constant 0 : i32
    %10 = arith.cmpi eq, %arg2, %c0_i32_8 : i32
    %11 = arith.extui %10 : i1 to i32
    %c0_i32_9 = arith.constant 0 : i32
    %12 = arith.cmpi ne, %11, %c0_i32_9 : i32
    scf.if %12 {
      %c0_10 = arith.constant 0 : index
      %c0_11 = arith.constant 0 : index
      %13 = vector.load %arg7[%c0_10, %c0_11] : memref<32x32xf32, #tpu.memory_space<vmem>>, vector<32x32xf32>
      %c0_12 = arith.constant 0 : index
      %c0_13 = arith.constant 0 : index
      %14 = vector.load %arg5[%c0_12, %c0_13] : memref<1x32xf32, #tpu.memory_space<vmem>>, vector<1x32xf32>
      %15 = vector.broadcast %14 : vector<1x32xf32> to vector<32x32xf32>
      %16 = arith.addf %13, %15 : vector<32x32xf32>
      %c0_14 = arith.constant 0 : index
      %c0_15 = arith.constant 0 : index
      %17 = vector.load %arg6[%c0_14, %c0_15] : memref<32x32xf32, #tpu.memory_space<vmem>>, vector<32x32xf32>
      tpu.vector_store %arg6[%c0_14, %c0_15], %16 {strides = array<i32>} : memref<32x32xf32, #tpu.memory_space<vmem>>, vector<32x32xf32>,
    } else {
    }
    return
  }
  func.func @transform_0(%arg0: i32, %arg1: i32, %arg2: i32) -> (i32, i32) {
    %c0_i32 = arith.constant 0 : i32
    return %arg0, %arg2 : i32, i32
  }
  func.func @transform_1(%arg0: i32, %arg1: i32, %arg2: i32) -> (i32, i32) {
    %c0_i32 = arith.constant 0 : i32
    return %arg2, %arg1 : i32, i32
  }
  func.func @transform_2(%arg0: i32, %arg1: i32, %arg2: i32) -> (i32, i32) {
    %c0_i32 = arith.constant 0 : i32
    %c0_i32_0 = arith.constant 0 : i32
    return %c0_i32, %arg1 : i32, i32
  }
  func.func @transform_3(%arg0: i32, %arg1: i32, %arg2: i32) -> (i32, i32) {
    %c0_i32 = arith.constant 0 : i32
    return %arg0, %arg1 : i32, i32
  }
}

module attributes {stable_mosaic.version = 11 : i64} {
  func.func @_mha_ln_kernel(%arg0: i32, %arg1: memref<1x4x16x8xf32, #tpu.memory_space<vmem>>, %arg2: memref<1x4x16x8xf32, #tpu.memory_space<vmem>>, %arg3: memref<1x4x16x8xf32, #tpu.memory_space<vmem>>, %arg4: memref<1x16x32xf32, #tpu.memory_space<vmem>>, %arg5: memref<4x8x32xbf16, #tpu.memory_space<vmem>>, %arg6: memref<1x32xf32, #tpu.memory_space<vmem>>, %arg7: memref<1x32xf32, #tpu.memory_space<vmem>>, %arg8: memref<1x32xf32, #tpu.memory_space<vmem>>, %arg9: memref<1x16x32xf32, #tpu.memory_space<vmem>>) attributes {dimension_semantics = [#tpu.dimension_semantics<parallel>], iteration_bounds = array<i64: 2>, scalar_prefetch = 0 : i64, scratch_operands = 0 : i64, tpu.core_type = #tpu.core_type<tc>, window_params = [{transform_indices = @transform_0, window_bounds = array<i64: 1, 4, 16, 8>}, {transform_indices = @transform_1, window_bounds = array<i64: 1, 4, 16, 8>}, {transform_indices = @transform_2, window_bounds = array<i64: 1, 4, 16, 8>}, {transform_indices = @transform_3, window_bounds = array<i64: 1, 16, 32>}, {pipeline_mode = #tpu.pipeline_mode<synchronous>, transform_indices = @transform_4, window_bounds = array<i64: 4, 8, 32>}, {pipeline_mode = #tpu.pipeline_mode<synchronous>, transform_indices = @transform_5, window_bounds = array<i64: 1, 32>}, {pipeline_mode = #tpu.pipeline_mode<synchronous>, transform_indices = @transform_6, window_bounds = array<i64: 1, 32>}, {pipeline_mode = #tpu.pipeline_mode<synchronous>, transform_indices = @transform_7, window_bounds = array<i64: 1, 32>}, {transform_indices = @transform_8, window_bounds = array<i64: 1, 16, 32>}]} {
    %c0 = arith.constant 0 : index
    %c0_0 = arith.constant 0 : index
    %c0_1 = arith.constant 0 : index
    %c0_2 = arith.constant 0 : index
    %0 = vector.load %arg1[%c0, %c0_0, %c0_1, %c0_2] : memref<1x4x16x8xf32, #tpu.memory_space<vmem>>, vector<1x4x16x8xf32>
    %1 = vector.shape_cast %0 : vector<1x4x16x8xf32> to vector<4x16x8xf32>
    %cst = arith.constant 0.353553385 : f32
    %2 = vector.broadcast %cst : f32 to vector<4x16x8xf32>
    %3 = arith.mulf %1, %2 : vector<4x16x8xf32>
    %4 = arith.truncf %3 : vector<4x16x8xf32> to vector<4x16x8xbf16>
    %c0_3 = arith.constant 0 : index
    %c0_4 = arith.constant 0 : index
    %c0_5 = arith.constant 0 : index
    %c0_6 = arith.constant 0 : index
    %5 = vector.load %arg2[%c0_3, %c0_4, %c0_5, %c0_6] : memref<1x4x16x8xf32, #tpu.memory_space<vmem>>, vector<1x4x16x8xf32>
    %6 = vector.shape_cast %5 : vector<1x4x16x8xf32> to vector<4x16x8xf32>
    %7 = arith.truncf %6 : vector<4x16x8xf32> to vector<4x16x8xbf16>
    %c0_7 = arith.constant 0 : index
    %c0_8 = arith.constant 0 : index
    %c0_9 = arith.constant 0 : index
    %c0_10 = arith.constant 0 : index
    %8 = vector.load %arg3[%c0_7, %c0_8, %c0_9, %c0_10] : memref<1x4x16x8xf32, #tpu.memory_space<vmem>>, vector<1x4x16x8xf32>
    %9 = vector.shape_cast %8 : vector<1x4x16x8xf32> to vector<4x16x8xf32>
    %10 = arith.truncf %9 : vector<4x16x8xf32> to vector<4x16x8xbf16>
    "tpu.trace_start"() <{level = 10 : i32, message = "hqd,hkd->hqk"}> : () -> ()
    %cst_11 = arith.constant dense<0.000000e+00> : vector<4x16x16xf32>
    %11 = tpu.matmul %4, %7, %cst_11 {dimension_numbers = #tpu.dot_dimension_numbers<[2], [2], [1], [1], [0, 0, 0, 1, 1, 1], [0], [0]>} : vector<4x16x8xbf16>, vector<4x16x8xbf16>, vector<4x16x16xf32> -> vector<4x16x16xf32>
    "tpu.trace_stop"() : () -> ()
    %cst_12 = arith.constant dense<0xFF800000> : vector<4x16xf32>
    %12 = vector.multi_reduction <maximumf>, %11, %cst_12 [2] : vector<4x16x16xf32> to vector<4x16xf32>
    %13 = vector.shape_cast %12 : vector<4x16xf32> to vector<4x16x1xf32>
    %14 = vector.broadcast %13 : vector<4x16x1xf32> to vector<4x16x16xf32>
    %15 = arith.subf %11, %14 : vector<4x16x16xf32>
    %16 = math.exp %15 : vector<4x16x16xf32>
    %cst_13 = arith.constant dense<0.000000e+00> : vector<4x16xf32>
    %17 = vector.multi_reduction <add>, %16, %cst_13 [2] : vector<4x16x16xf32> to vector<4x16xf32>
    %18 = vector.shape_cast %17 : vector<4x16xf32> to vector<4x16x1xf32>
    %19 = tpu.reciprocal %18 {approx = true} : vector<4x16x1xf32> -> vector<4x16x1xf32>
    %20 = vector.broadcast %19 : vector<4x16x1xf32> to vector<4x16x16xf32>
    %21 = arith.mulf %16, %20 : vector<4x16x16xf32>
    %22 = arith.truncf %21 : vector<4x16x16xf32> to vector<4x16x16xbf16>
    "tpu.trace_start"() <{level = 10 : i32, message = "hqk,hkd->hqd"}> : () -> ()
    %cst_14 = arith.constant dense<0.000000e+00> : vector<4x16x8xf32>
    %23 = tpu.matmul %22, %10, %cst_14 {dimension_numbers = #tpu.dot_dimension_numbers<[2], [1], [1], [2], [0, 0, 0, 1, 1, 2], [0], [0]>} : vector<4x16x16xbf16>, vector<4x16x8xbf16>, vector<4x16x8xf32> -> vector<4x16x8xf32>
    "tpu.trace_stop"() : () -> ()
    %24 = arith.truncf %23 : vector<4x16x8xf32> to vector<4x16x8xbf16>
    %c0_15 = arith.constant 0 : index
    %c0_16 = arith.constant 0 : index
    %c0_17 = arith.constant 0 : index
    %25 = vector.load %arg5[%c0_15, %c0_16, %c0_17] : memref<4x8x32xbf16, #tpu.memory_space<vmem>>, vector<4x8x32xbf16>
    "tpu.trace_start"() <{level = 10 : i32, message = "hqd,hdo->hqo"}> : () -> ()
    %cst_18 = arith.constant dense<0.000000e+00> : vector<4x16x32xf32>
    %26 = tpu.matmul %24, %25, %cst_18 {dimension_numbers = #tpu.dot_dimension_numbers<[2], [1], [1], [2], [0, 0, 0, 1, 1, 2], [0], [0]>} : vector<4x16x8xbf16>, vector<4x8x32xbf16>, vector<4x16x32xf32> -> vector<4x16x32xf32>
    "tpu.trace_stop"() : () -> ()
    %cst_19 = arith.constant dense<0.000000e+00> : vector<16x32xf32>
    %27 = vector.multi_reduction <add>, %26, %cst_19 [0] : vector<4x16x32xf32> to vector<16x32xf32>
    %c0_20 = arith.constant 0 : index
    %c0_21 = arith.constant 0 : index
    %28 = vector.load %arg6[%c0_20, %c0_21] : memref<1x32xf32, #tpu.memory_space<vmem>>, vector<1x32xf32>
    %29 = vector.broadcast %28 : vector<1x32xf32> to vector<16x32xf32>
    %30 = arith.addf %27, %29 : vector<16x32xf32>
    %c0_22 = arith.constant 0 : index
    %c0_23 = arith.constant 0 : index
    %c0_24 = arith.constant 0 : index
    %31 = vector.load %arg4[%c0_22, %c0_23, %c0_24] : memref<1x16x32xf32, #tpu.memory_space<vmem>>, vector<1x16x32xf32>
    %32 = vector.shape_cast %31 : vector<1x16x32xf32> to vector<16x32xf32>
    %33 = arith.addf %30, %32 : vector<16x32xf32>
    %c0_25 = arith.constant 0 : index
    %c0_26 = arith.constant 0 : index
    %34 = vector.load %arg7[%c0_25, %c0_26] : memref<1x32xf32, #tpu.memory_space<vmem>>, vector<1x32xf32>
    %c0_27 = arith.constant 0 : index
    %c0_28 = arith.constant 0 : index
    %35 = vector.load %arg8[%c0_27, %c0_28] : memref<1x32xf32, #tpu.memory_space<vmem>>, vector<1x32xf32>
    %cst_29 = arith.constant dense<0.000000e+00> : vector<16xf32>
    %36 = vector.multi_reduction <add>, %33, %cst_29 [1] : vector<16x32xf32> to vector<16xf32>
    %37 = vector.shape_cast %36 : vector<16xf32> to vector<16x1xf32>
    %cst_30 = arith.constant 3.200000e+01 : f32
    %38 = vector.broadcast %cst_30 : f32 to vector<16x1xf32>
    %39 = arith.divf %37, %38 : vector<16x1xf32>
    %40 = vector.broadcast %39 : vector<16x1xf32> to vector<16x32xf32>
    %41 = arith.subf %33, %40 : vector<16x32xf32>
    %42 = arith.mulf %41, %41 : vector<16x32xf32>
    %cst_31 = arith.constant dense<0.000000e+00> : vector<16xf32>
    %43 = vector.multi_reduction <add>, %42, %cst_31 [1] : vector<16x32xf32> to vector<16xf32>
    %44 = vector.shape_cast %43 : vector<16xf32> to vector<16x1xf32>
    %cst_32 = arith.constant 3.200000e+01 : f32
    %45 = vector.broadcast %cst_32 : f32 to vector<16x1xf32>
    %46 = arith.divf %44, %45 : vector<16x1xf32>
    %47 = vector.broadcast %39 : vector<16x1xf32> to vector<16x32xf32>
    %48 = arith.subf %33, %47 : vector<16x32xf32>
    %cst_33 = arith.constant 9.99999997E-7 : f32
    %49 = vector.broadcast %cst_33 : f32 to vector<16x1xf32>
    %50 = arith.addf %46, %49 : vector<16x1xf32>
    %51 = math.rsqrt %50 : vector<16x1xf32>
    %52 = vector.broadcast %51 : vector<16x1xf32> to vector<16x32xf32>
    %53 = arith.mulf %48, %52 : vector<16x32xf32>
    %54 = vector.broadcast %34 : vector<1x32xf32> to vector<16x32xf32>
    %55 = arith.mulf %53, %54 : vector<16x32xf32>
    %56 = vector.broadcast %35 : vector<1x32xf32> to vector<16x32xf32>
    %57 = arith.addf %55, %56 : vector<16x32xf32>
    %c0_34 = arith.constant 0 : index
    %c0_35 = arith.constant 0 : index
    %c0_36 = arith.constant 0 : index
    %58 = vector.load %arg9[%c0_34, %c0_35, %c0_36] : memref<1x16x32xf32, #tpu.memory_space<vmem>>, vector<1x16x32xf32>
    %59 = vector.shape_cast %58 : vector<1x16x32xf32> to vector<16x32xf32>
    %60 = vector.shape_cast %57 : vector<16x32xf32> to vector<1x16x32xf32>
    tpu.vector_store %arg9[%c0_34, %c0_35, %c0_36], %60 {strides = array<i32>} : memref<1x16x32xf32, #tpu.memory_space<vmem>>, vector<1x16x32xf32>,
    return
  }
  func.func @transform_0(%arg0: i32) -> (i32, i32, i32, i32) {
    %c0_i32 = arith.constant 0 : i32
    %c0_i32_0 = arith.constant 0 : i32
    %c0_i32_1 = arith.constant 0 : i32
    %c0_i32_2 = arith.constant 0 : i32
    return %arg0, %c0_i32, %c0_i32_0, %c0_i32_1 : i32, i32, i32, i32
  }
  func.func @transform_1(%arg0: i32) -> (i32, i32, i32, i32) {
    %c0_i32 = arith.constant 0 : i32
    %c0_i32_0 = arith.constant 0 : i32
    %c0_i32_1 = arith.constant 0 : i32
    %c0_i32_2 = arith.constant 0 : i32
    return %arg0, %c0_i32, %c0_i32_0, %c0_i32_1 : i32, i32, i32, i32
  }
  func.func @transform_2(%arg0: i32) -> (i32, i32, i32, i32) {
    %c0_i32 = arith.constant 0 : i32
    %c0_i32_0 = arith.constant 0 : i32
    %c0_i32_1 = arith.constant 0 : i32
    %c0_i32_2 = arith.constant 0 : i32
    return %arg0, %c0_i32, %c0_i32_0, %c0_i32_1 : i32, i32, i32, i32
  }
  func.func @transform_3(%arg0: i32) -> (i32, i32, i32) {
    %c0_i32 = arith.constant 0 : i32
    %c0_i32_0 = arith.constant 0 : i32
    %c0_i32_1 = arith.constant 0 : i32
    return %arg0, %c0_i32, %c0_i32_0 : i32, i32, i32
  }
  func.func @transform_4(%arg0: i32) -> (i32, i32, i32) {
    %c0_i32 = arith.constant 0 : i32
    %c0_i32_0 = arith.constant 0 : i32
    %c0_i32_1 = arith.constant 0 : i32
    %c0_i32_2 = arith.constant 0 : i32
    return %c0_i32, %c0_i32_0, %c0_i32_1 : i32, i32, i32
  }
  func.func @transform_5(%arg0: i32) -> (i32, i32) {
    %c0_i32 = arith.constant 0 : i32
    %c0_i32_0 = arith.constant 0 : i32
    %c0_i32_1 = arith.constant 0 : i32
    return %c0_i32, %c0_i32_0 : i32, i32
  }
  func.func @transform_6(%arg0: i32) -> (i32, i32) {
    %c0_i32 = arith.constant 0 : i32
    %c0_i32_0 = arith.constant 0 : i32
    %c0_i32_1 = arith.constant 0 : i32
    return %c0_i32, %c0_i32_0 : i32, i32
  }
  func.func @transform_7(%arg0: i32) -> (i32, i32) {
    %c0_i32 = arith.constant 0 : i32
    %c0_i32_0 = arith.constant 0 : i32
    %c0_i32_1 = arith.constant 0 : i32
    return %c0_i32, %c0_i32_0 : i32, i32
  }
  func.func @transform_8(%arg0: i32) -> (i32, i32, i32) {
    %c0_i32 = arith.constant 0 : i32
    %c0_i32_0 = arith.constant 0 : i32
    %c0_i32_1 = arith.constant 0 : i32
    return %arg0, %c0_i32, %c0_i32_0 : i32, i32, i32
  }
}

module attributes {stable_mosaic.version = 11 : i64} {
  func.func @_matmul_bias_kernel(%arg0: i32, %arg1: i32, %arg2: i32, %arg3: memref<32x32xf32, #tpu.memory_space<vmem>>, %arg4: memref<32x96xbf16, #tpu.memory_space<vmem>>, %arg5: memref<1x96xf32, #tpu.memory_space<vmem>>, %arg6: memref<32x96xf32, #tpu.memory_space<vmem>>, %arg7: memref<32x96xf32, #tpu.memory_space<vmem>>) attributes {dimension_semantics = [#tpu.dimension_semantics<parallel>, #tpu.dimension_semantics<parallel>, #tpu.dimension_semantics<arbitrary>], iteration_bounds = array<i64: 1, 1, 1>, scalar_prefetch = 0 : i64, scratch_operands = 1 : i64, tpu.core_type = #tpu.core_type<tc>, window_params = [{transform_indices = @transform_0, window_bounds = array<i64: 32, 32>}, {transform_indices = @transform_1, window_bounds = array<i64: 32, 96>}, {transform_indices = @transform_2, window_bounds = array<i64: 1, 96>}, {transform_indices = @transform_3, window_bounds = array<i64: 32, 96>}]} {
    %c0_i32 = arith.constant 0 : i32
    %0 = arith.cmpi eq, %arg2, %c0_i32 : i32
    %1 = arith.extui %0 : i1 to i32
    %c0_i32_0 = arith.constant 0 : i32
    %2 = arith.cmpi ne, %1, %c0_i32_0 : i32
    scf.if %2 {
      %cst_10 = arith.constant 0.000000e+00 : f32
      %13 = vector.broadcast %cst_10 : f32 to vector<32x96xf32>
      %c0_11 = arith.constant 0 : index
      %c0_12 = arith.constant 0 : index
      %14 = vector.load %arg7[%c0_11, %c0_12] : memref<32x96xf32, #tpu.memory_space<vmem>>, vector<32x96xf32>
      tpu.vector_store %arg7[%c0_11, %c0_12], %13 {strides = array<i32>} : memref<32x96xf32, #tpu.memory_space<vmem>>, vector<32x96xf32>,
    } else {
    }
    %c0 = arith.constant 0 : index
    %c0_1 = arith.constant 0 : index
    %3 = vector.load %arg7[%c0, %c0_1] : memref<32x96xf32, #tpu.memory_space<vmem>>, vector<32x96xf32>
    %c0_2 = arith.constant 0 : index
    %c0_3 = arith.constant 0 : index
    %4 = vector.load %arg3[%c0_2, %c0_3] : memref<32x32xf32, #tpu.memory_space<vmem>>, vector<32x32xf32>
    %5 = arith.truncf %4 : vector<32x32xf32> to vector<32x32xbf16>
    %c0_4 = arith.constant 0 : index
    %c0_5 = arith.constant 0 : index
    %6 = vector.load %arg4[%c0_4, %c0_5] : memref<32x96xbf16, #tpu.memory_space<vmem>>, vector<32x96xbf16>
    %cst = arith.constant dense<0.000000e+00> : vector<32x96xf32>
    %7 = tpu.matmul %5, %6, %cst {dimension_numbers = #tpu.dot_dimension_numbers<[1], [0], [0], [1], [0, 0, 1, 1], [], []>} : vector<32x32xbf16>, vector<32x96xbf16>, vector<32x96xf32> -> vector<32x96xf32>
    %8 = arith.addf %3, %7 : vector<32x96xf32>
    %c0_6 = arith.constant 0 : index
    %c0_7 = arith.constant 0 : index
    %9 = vector.load %arg7[%c0_6, %c0_7] : memref<32x96xf32, #tpu.memory_space<vmem>>, vector<32x96xf32>
    tpu.vector_store %arg7[%c0_6, %c0_7], %8 {strides = array<i32>} : memref<32x96xf32, #tpu.memory_space<vmem>>, vector<32x96xf32>,
    %c0_i32_8 = arith.constant 0 : i32
    %10 = arith.cmpi eq, %arg2, %c0_i32_8 : i32
    %11 = arith.extui %10 : i1 to i32
    %c0_i32_9 = arith.constant 0 : i32
    %12 = arith.cmpi ne, %11, %c0_i32_9 : i32
    scf.if %12 {
      %c0_10 = arith.constant 0 : index
      %c0_11 = arith.constant 0 : index
      %13 = vector.load %arg7[%c0_10, %c0_11] : memref<32x96xf32, #tpu.memory_space<vmem>>, vector<32x96xf32>
      %c0_12 = arith.constant 0 : index
      %c0_13 = arith.constant 0 : index
      %14 = vector.load %arg5[%c0_12, %c0_13] : memref<1x96xf32, #tpu.memory_space<vmem>>, vector<1x96xf32>
      %15 = vector.broadcast %14 : vector<1x96xf32> to vector<32x96xf32>
      %16 = arith.addf %13, %15 : vector<32x96xf32>
      %c0_14 = arith.constant 0 : index
      %c0_15 = arith.constant 0 : index
      %17 = vector.load %arg6[%c0_14, %c0_15] : memref<32x96xf32, #tpu.memory_space<vmem>>, vector<32x96xf32>
      tpu.vector_store %arg6[%c0_14, %c0_15], %16 {strides = array<i32>} : memref<32x96xf32, #tpu.memory_space<vmem>>, vector<32x96xf32>,
    } else {
    }
    return
  }
  func.func @transform_0(%arg0: i32, %arg1: i32, %arg2: i32) -> (i32, i32) {
    %c0_i32 = arith.constant 0 : i32
    return %arg0, %arg2 : i32, i32
  }
  func.func @transform_1(%arg0: i32, %arg1: i32, %arg2: i32) -> (i32, i32) {
    %c0_i32 = arith.constant 0 : i32
    return %arg2, %arg1 : i32, i32
  }
  func.func @transform_2(%arg0: i32, %arg1: i32, %arg2: i32) -> (i32, i32) {
    %c0_i32 = arith.constant 0 : i32
    %c0_i32_0 = arith.constant 0 : i32
    return %c0_i32, %arg1 : i32, i32
  }
  func.func @transform_3(%arg0: i32, %arg1: i32, %arg2: i32) -> (i32, i32) {
    %c0_i32 = arith.constant 0 : i32
    return %arg0, %arg1 : i32, i32
  }
}

module attributes {stable_mosaic.version = 11 : i64} {
  func.func @_matmul_bias_kernel(%arg0: i32, %arg1: i32, %arg2: i32, %arg3: memref<32x32xf32, #tpu.memory_space<vmem>>, %arg4: memref<32x32xbf16, #tpu.memory_space<vmem>>, %arg5: memref<1x32xf32, #tpu.memory_space<vmem>>, %arg6: memref<32x32xf32, #tpu.memory_space<vmem>>, %arg7: memref<32x32xf32, #tpu.memory_space<vmem>>) attributes {dimension_semantics = [#tpu.dimension_semantics<parallel>, #tpu.dimension_semantics<parallel>, #tpu.dimension_semantics<arbitrary>], iteration_bounds = array<i64: 1, 1, 1>, scalar_prefetch = 0 : i64, scratch_operands = 1 : i64, tpu.core_type = #tpu.core_type<tc>, window_params = [{transform_indices = @transform_0, window_bounds = array<i64: 32, 32>}, {transform_indices = @transform_1, window_bounds = array<i64: 32, 32>}, {transform_indices = @transform_2, window_bounds = array<i64: 1, 32>}, {transform_indices = @transform_3, window_bounds = array<i64: 32, 32>}]} {
    %c0_i32 = arith.constant 0 : i32
    %0 = arith.cmpi eq, %arg2, %c0_i32 : i32
    %1 = arith.extui %0 : i1 to i32
    %c0_i32_0 = arith.constant 0 : i32
    %2 = arith.cmpi ne, %1, %c0_i32_0 : i32
    scf.if %2 {
      %cst_10 = arith.constant 0.000000e+00 : f32
      %13 = vector.broadcast %cst_10 : f32 to vector<32x32xf32>
      %c0_11 = arith.constant 0 : index
      %c0_12 = arith.constant 0 : index
      %14 = vector.load %arg7[%c0_11, %c0_12] : memref<32x32xf32, #tpu.memory_space<vmem>>, vector<32x32xf32>
      tpu.vector_store %arg7[%c0_11, %c0_12], %13 {strides = array<i32>} : memref<32x32xf32, #tpu.memory_space<vmem>>, vector<32x32xf32>,
    } else {
    }
    %c0 = arith.constant 0 : index
    %c0_1 = arith.constant 0 : index
    %3 = vector.load %arg7[%c0, %c0_1] : memref<32x32xf32, #tpu.memory_space<vmem>>, vector<32x32xf32>
    %c0_2 = arith.constant 0 : index
    %c0_3 = arith.constant 0 : index
    %4 = vector.load %arg3[%c0_2, %c0_3] : memref<32x32xf32, #tpu.memory_space<vmem>>, vector<32x32xf32>
    %5 = arith.truncf %4 : vector<32x32xf32> to vector<32x32xbf16>
    %c0_4 = arith.constant 0 : index
    %c0_5 = arith.constant 0 : index
    %6 = vector.load %arg4[%c0_4, %c0_5] : memref<32x32xbf16, #tpu.memory_space<vmem>>, vector<32x32xbf16>
    %cst = arith.constant dense<0.000000e+00> : vector<32x32xf32>
    %7 = tpu.matmul %5, %6, %cst {dimension_numbers = #tpu.dot_dimension_numbers<[1], [0], [0], [1], [0, 0, 1, 1], [], []>} : vector<32x32xbf16>, vector<32x32xbf16>, vector<32x32xf32> -> vector<32x32xf32>
    %8 = arith.addf %3, %7 : vector<32x32xf32>
    %c0_6 = arith.constant 0 : index
    %c0_7 = arith.constant 0 : index
    %9 = vector.load %arg7[%c0_6, %c0_7] : memref<32x32xf32, #tpu.memory_space<vmem>>, vector<32x32xf32>
    tpu.vector_store %arg7[%c0_6, %c0_7], %8 {strides = array<i32>} : memref<32x32xf32, #tpu.memory_space<vmem>>, vector<32x32xf32>,
    %c0_i32_8 = arith.constant 0 : i32
    %10 = arith.cmpi eq, %arg2, %c0_i32_8 : i32
    %11 = arith.extui %10 : i1 to i32
    %c0_i32_9 = arith.constant 0 : i32
    %12 = arith.cmpi ne, %11, %c0_i32_9 : i32
    scf.if %12 {
      %c0_10 = arith.constant 0 : index
      %c0_11 = arith.constant 0 : index
      %13 = vector.load %arg7[%c0_10, %c0_11] : memref<32x32xf32, #tpu.memory_space<vmem>>, vector<32x32xf32>
      %c0_12 = arith.constant 0 : index
      %c0_13 = arith.constant 0 : index
      %14 = vector.load %arg5[%c0_12, %c0_13] : memref<1x32xf32, #tpu.memory_space<vmem>>, vector<1x32xf32>
      %15 = vector.broadcast %14 : vector<1x32xf32> to vector<32x32xf32>
      %16 = arith.addf %13, %15 : vector<32x32xf32>
      %c0_14 = arith.constant 0 : index
      %c0_15 = arith.constant 0 : index
      %17 = vector.load %arg6[%c0_14, %c0_15] : memref<32x32xf32, #tpu.memory_space<vmem>>, vector<32x32xf32>
      tpu.vector_store %arg6[%c0_14, %c0_15], %16 {strides = array<i32>} : memref<32x32xf32, #tpu.memory_space<vmem>>, vector<32x32xf32>,
    } else {
    }
    return
  }
  func.func @transform_0(%arg0: i32, %arg1: i32, %arg2: i32) -> (i32, i32) {
    %c0_i32 = arith.constant 0 : i32
    return %arg0, %arg2 : i32, i32
  }
  func.func @transform_1(%arg0: i32, %arg1: i32, %arg2: i32) -> (i32, i32) {
    %c0_i32 = arith.constant 0 : i32
    return %arg2, %arg1 : i32, i32
  }
  func.func @transform_2(%arg0: i32, %arg1: i32, %arg2: i32) -> (i32, i32) {
    %c0_i32 = arith.constant 0 : i32
    %c0_i32_0 = arith.constant 0 : i32
    return %c0_i32, %arg1 : i32, i32
  }
  func.func @transform_3(%arg0: i32, %arg1: i32, %arg2: i32) -> (i32, i32) {
    %c0_i32 = arith.constant 0 : i32
    return %arg0, %arg1 : i32, i32
  }
}

module attributes {stable_mosaic.version = 11 : i64} {
  func.func @_matmul_bias_kernel(%arg0: i32, %arg1: i32, %arg2: i32, %arg3: memref<16x32xf32, #tpu.memory_space<vmem>>, %arg4: memref<32x64xbf16, #tpu.memory_space<vmem>>, %arg5: memref<1x64xf32, #tpu.memory_space<vmem>>, %arg6: memref<16x64xf32, #tpu.memory_space<vmem>>, %arg7: memref<16x64xf32, #tpu.memory_space<vmem>>) attributes {dimension_semantics = [#tpu.dimension_semantics<parallel>, #tpu.dimension_semantics<parallel>, #tpu.dimension_semantics<arbitrary>], iteration_bounds = array<i64: 1, 1, 1>, scalar_prefetch = 0 : i64, scratch_operands = 1 : i64, tpu.core_type = #tpu.core_type<tc>, window_params = [{transform_indices = @transform_0, window_bounds = array<i64: 16, 32>}, {transform_indices = @transform_1, window_bounds = array<i64: 32, 64>}, {transform_indices = @transform_2, window_bounds = array<i64: 1, 64>}, {transform_indices = @transform_3, window_bounds = array<i64: 16, 64>}]} {
    %c0_i32 = arith.constant 0 : i32
    %0 = arith.cmpi eq, %arg2, %c0_i32 : i32
    %1 = arith.extui %0 : i1 to i32
    %c0_i32_0 = arith.constant 0 : i32
    %2 = arith.cmpi ne, %1, %c0_i32_0 : i32
    scf.if %2 {
      %cst_10 = arith.constant 0.000000e+00 : f32
      %13 = vector.broadcast %cst_10 : f32 to vector<16x64xf32>
      %c0_11 = arith.constant 0 : index
      %c0_12 = arith.constant 0 : index
      %14 = vector.load %arg7[%c0_11, %c0_12] : memref<16x64xf32, #tpu.memory_space<vmem>>, vector<16x64xf32>
      tpu.vector_store %arg7[%c0_11, %c0_12], %13 {strides = array<i32>} : memref<16x64xf32, #tpu.memory_space<vmem>>, vector<16x64xf32>,
    } else {
    }
    %c0 = arith.constant 0 : index
    %c0_1 = arith.constant 0 : index
    %3 = vector.load %arg7[%c0, %c0_1] : memref<16x64xf32, #tpu.memory_space<vmem>>, vector<16x64xf32>
    %c0_2 = arith.constant 0 : index
    %c0_3 = arith.constant 0 : index
    %4 = vector.load %arg3[%c0_2, %c0_3] : memref<16x32xf32, #tpu.memory_space<vmem>>, vector<16x32xf32>
    %5 = arith.truncf %4 : vector<16x32xf32> to vector<16x32xbf16>
    %c0_4 = arith.constant 0 : index
    %c0_5 = arith.constant 0 : index
    %6 = vector.load %arg4[%c0_4, %c0_5] : memref<32x64xbf16, #tpu.memory_space<vmem>>, vector<32x64xbf16>
    %cst = arith.constant dense<0.000000e+00> : vector<16x64xf32>
    %7 = tpu.matmul %5, %6, %cst {dimension_numbers = #tpu.dot_dimension_numbers<[1], [0], [0], [1], [0, 0, 1, 1], [], []>} : vector<16x32xbf16>, vector<32x64xbf16>, vector<16x64xf32> -> vector<16x64xf32>
    %8 = arith.addf %3, %7 : vector<16x64xf32>
    %c0_6 = arith.constant 0 : index
    %c0_7 = arith.constant 0 : index
    %9 = vector.load %arg7[%c0_6, %c0_7] : memref<16x64xf32, #tpu.memory_space<vmem>>, vector<16x64xf32>
    tpu.vector_store %arg7[%c0_6, %c0_7], %8 {strides = array<i32>} : memref<16x64xf32, #tpu.memory_space<vmem>>, vector<16x64xf32>,
    %c0_i32_8 = arith.constant 0 : i32
    %10 = arith.cmpi eq, %arg2, %c0_i32_8 : i32
    %11 = arith.extui %10 : i1 to i32
    %c0_i32_9 = arith.constant 0 : i32
    %12 = arith.cmpi ne, %11, %c0_i32_9 : i32
    scf.if %12 {
      %c0_10 = arith.constant 0 : index
      %c0_11 = arith.constant 0 : index
      %13 = vector.load %arg7[%c0_10, %c0_11] : memref<16x64xf32, #tpu.memory_space<vmem>>, vector<16x64xf32>
      %c0_12 = arith.constant 0 : index
      %c0_13 = arith.constant 0 : index
      %14 = vector.load %arg5[%c0_12, %c0_13] : memref<1x64xf32, #tpu.memory_space<vmem>>, vector<1x64xf32>
      %15 = vector.broadcast %14 : vector<1x64xf32> to vector<16x64xf32>
      %16 = arith.addf %13, %15 : vector<16x64xf32>
      %c0_14 = arith.constant 0 : index
      %c0_15 = arith.constant 0 : index
      %17 = vector.load %arg6[%c0_14, %c0_15] : memref<16x64xf32, #tpu.memory_space<vmem>>, vector<16x64xf32>
      tpu.vector_store %arg6[%c0_14, %c0_15], %16 {strides = array<i32>} : memref<16x64xf32, #tpu.memory_space<vmem>>, vector<16x64xf32>,
    } else {
    }
    return
  }
  func.func @transform_0(%arg0: i32, %arg1: i32, %arg2: i32) -> (i32, i32) {
    %c0_i32 = arith.constant 0 : i32
    return %arg0, %arg2 : i32, i32
  }
  func.func @transform_1(%arg0: i32, %arg1: i32, %arg2: i32) -> (i32, i32) {
    %c0_i32 = arith.constant 0 : i32
    return %arg2, %arg1 : i32, i32
  }
  func.func @transform_2(%arg0: i32, %arg1: i32, %arg2: i32) -> (i32, i32) {
    %c0_i32 = arith.constant 0 : i32
    %c0_i32_0 = arith.constant 0 : i32
    return %c0_i32, %arg1 : i32, i32
  }
  func.func @transform_3(%arg0: i32, %arg1: i32, %arg2: i32) -> (i32, i32) {
    %c0_i32 = arith.constant 0 : i32
    return %arg0, %arg1 : i32, i32
  }
}

module attributes {stable_mosaic.version = 11 : i64} {
  func.func @_mha_ln_kernel(%arg0: i32, %arg1: memref<1x4x16x8xf32, #tpu.memory_space<vmem>>, %arg2: memref<1x4x8x8xf32, #tpu.memory_space<vmem>>, %arg3: memref<1x4x8x8xf32, #tpu.memory_space<vmem>>, %arg4: memref<1x1x8xf32, #tpu.memory_space<vmem>>, %arg5: memref<1x16x32xf32, #tpu.memory_space<vmem>>, %arg6: memref<4x8x32xbf16, #tpu.memory_space<vmem>>, %arg7: memref<1x32xf32, #tpu.memory_space<vmem>>, %arg8: memref<1x32xf32, #tpu.memory_space<vmem>>, %arg9: memref<1x32xf32, #tpu.memory_space<vmem>>, %arg10: memref<1x16x32xf32, #tpu.memory_space<vmem>>) attributes {dimension_semantics = [#tpu.dimension_semantics<parallel>], iteration_bounds = array<i64: 2>, scalar_prefetch = 0 : i64, scratch_operands = 0 : i64, tpu.core_type = #tpu.core_type<tc>, window_params = [{transform_indices = @transform_0, window_bounds = array<i64: 1, 4, 16, 8>}, {transform_indices = @transform_1, window_bounds = array<i64: 1, 4, 8, 8>}, {transform_indices = @transform_2, window_bounds = array<i64: 1, 4, 8, 8>}, {transform_indices = @transform_3, window_bounds = array<i64: 1, 1, 8>}, {transform_indices = @transform_4, window_bounds = array<i64: 1, 16, 32>}, {pipeline_mode = #tpu.pipeline_mode<synchronous>, transform_indices = @transform_5, window_bounds = array<i64: 4, 8, 32>}, {pipeline_mode = #tpu.pipeline_mode<synchronous>, transform_indices = @transform_6, window_bounds = array<i64: 1, 32>}, {pipeline_mode = #tpu.pipeline_mode<synchronous>, transform_indices = @transform_7, window_bounds = array<i64: 1, 32>}, {pipeline_mode = #tpu.pipeline_mode<synchronous>, transform_indices = @transform_8, window_bounds = array<i64: 1, 32>}, {transform_indices = @transform_9, window_bounds = array<i64: 1, 16, 32>}]} {
    %c0 = arith.constant 0 : index
    %c0_0 = arith.constant 0 : index
    %c0_1 = arith.constant 0 : index
    %c0_2 = arith.constant 0 : index
    %0 = vector.load %arg1[%c0, %c0_0, %c0_1, %c0_2] : memref<1x4x16x8xf32, #tpu.memory_space<vmem>>, vector<1x4x16x8xf32>
    %1 = vector.shape_cast %0 : vector<1x4x16x8xf32> to vector<4x16x8xf32>
    %cst = arith.constant 0.353553385 : f32
    %2 = vector.broadcast %cst : f32 to vector<4x16x8xf32>
    %3 = arith.mulf %1, %2 : vector<4x16x8xf32>
    %4 = arith.truncf %3 : vector<4x16x8xf32> to vector<4x16x8xbf16>
    %c0_3 = arith.constant 0 : index
    %c0_4 = arith.constant 0 : index
    %c0_5 = arith.constant 0 : index
    %c0_6 = arith.constant 0 : index
    %5 = vector.load %arg2[%c0_3, %c0_4, %c0_5, %c0_6] : memref<1x4x8x8xf32, #tpu.memory_space<vmem>>, vector<1x4x8x8xf32>
    %6 = vector.shape_cast %5 : vector<1x4x8x8xf32> to vector<4x8x8xf32>
    %7 = arith.truncf %6 : vector<4x8x8xf32> to vector<4x8x8xbf16>
    %c0_7 = arith.constant 0 : index
    %c0_8 = arith.constant 0 : index
    %c0_9 = arith.constant 0 : index
    %c0_10 = arith.constant 0 : index
    %8 = vector.load %arg3[%c0_7, %c0_8, %c0_9, %c0_10] : memref<1x4x8x8xf32, #tpu.memory_space<vmem>>, vector<1x4x8x8xf32>
    %9 = vector.shape_cast %8 : vector<1x4x8x8xf32> to vector<4x8x8xf32>
    %10 = arith.truncf %9 : vector<4x8x8xf32> to vector<4x8x8xbf16>
    "tpu.trace_start"() <{level = 10 : i32, message = "hqd,hkd->hqk"}> : () -> ()
    %cst_11 = arith.constant dense<0.000000e+00> : vector<4x16x8xf32>
    %11 = tpu.matmul %4, %7, %cst_11 {dimension_numbers = #tpu.dot_dimension_numbers<[2], [2], [1], [1], [0, 0, 0, 1, 1, 1], [0], [0]>} : vector<4x16x8xbf16>, vector<4x8x8xbf16>, vector<4x16x8xf32> -> vector<4x16x8xf32>
    "tpu.trace_stop"() : () -> ()
    %c0_12 = arith.constant 0 : index
    %c0_13 = arith.constant 0 : index
    %c0_14 = arith.constant 0 : index
    %12 = vector.load %arg4[%c0_12, %c0_13, %c0_14] : memref<1x1x8xf32, #tpu.memory_space<vmem>>, vector<1x1x8xf32>
    %13 = vector.shape_cast %12 : vector<1x1x8xf32> to vector<1x8xf32>
    %14 = vector.shape_cast %13 : vector<1x8xf32> to vector<1x1x8xf32>
    %cst_15 = arith.constant 5.000000e-01 : f32
    %15 = vector.broadcast %cst_15 : f32 to vector<1x1x8xf32>
    %16 = arith.cmpf ogt, %14, %15 : vector<1x1x8xf32>
    %cst_16 = arith.constant -1.000000e+09 : f32
    %17 = vector.shape_cast %16 : vector<1x1x8xi1> to vector<1x1x8xi1>
    %18 = vector.broadcast %17 : vector<1x1x8xi1> to vector<4x16x8xi1>
    %19 = vector.broadcast %cst_16 : f32 to vector<4x16x8xf32>
    %20 = arith.select %18, %19, %11 : vector<4x16x8xi1>, vector<4x16x8xf32>
    %cst_17 = arith.constant dense<0xFF800000> : vector<4x16xf32>
    %21 = vector.multi_reduction <maximumf>, %20, %cst_17 [2] : vector<4x16x8xf32> to vector<4x16xf32>
    %22 = vector.shape_cast %21 : vector<4x16xf32> to vector<4x16x1xf32>
    %23 = vector.broadcast %22 : vector<4x16x1xf32> to vector<4x16x8xf32>
    %24 = arith.subf %20, %23 : vector<4x16x8xf32>
    %25 = math.exp %24 : vector<4x16x8xf32>
    %cst_18 = arith.constant dense<0.000000e+00> : vector<4x16xf32>
    %26 = vector.multi_reduction <add>, %25, %cst_18 [2] : vector<4x16x8xf32> to vector<4x16xf32>
    %27 = vector.shape_cast %26 : vector<4x16xf32> to vector<4x16x1xf32>
    %28 = tpu.reciprocal %27 {approx = true} : vector<4x16x1xf32> -> vector<4x16x1xf32>
    %29 = vector.broadcast %28 : vector<4x16x1xf32> to vector<4x16x8xf32>
    %30 = arith.mulf %25, %29 : vector<4x16x8xf32>
    %31 = arith.truncf %30 : vector<4x16x8xf32> to vector<4x16x8xbf16>
    "tpu.trace_start"() <{level = 10 : i32, message = "hqk,hkd->hqd"}> : () -> ()
    %cst_19 = arith.constant dense<0.000000e+00> : vector<4x16x8xf32>
    %32 = tpu.matmul %31, %10, %cst_19 {dimension_numbers = #tpu.dot_dimension_numbers<[2], [1], [1], [2], [0, 0, 0, 1, 1, 2], [0], [0]>} : vector<4x16x8xbf16>, vector<4x8x8xbf16>, vector<4x16x8xf32> -> vector<4x16x8xf32>
    "tpu.trace_stop"() : () -> ()
    %33 = arith.truncf %32 : vector<4x16x8xf32> to vector<4x16x8xbf16>
    %c0_20 = arith.constant 0 : index
    %c0_21 = arith.constant 0 : index
    %c0_22 = arith.constant 0 : index
    %34 = vector.load %arg6[%c0_20, %c0_21, %c0_22] : memref<4x8x32xbf16, #tpu.memory_space<vmem>>, vector<4x8x32xbf16>
    "tpu.trace_start"() <{level = 10 : i32, message = "hqd,hdo->hqo"}> : () -> ()
    %cst_23 = arith.constant dense<0.000000e+00> : vector<4x16x32xf32>
    %35 = tpu.matmul %33, %34, %cst_23 {dimension_numbers = #tpu.dot_dimension_numbers<[2], [1], [1], [2], [0, 0, 0, 1, 1, 2], [0], [0]>} : vector<4x16x8xbf16>, vector<4x8x32xbf16>, vector<4x16x32xf32> -> vector<4x16x32xf32>
    "tpu.trace_stop"() : () -> ()
    %cst_24 = arith.constant dense<0.000000e+00> : vector<16x32xf32>
    %36 = vector.multi_reduction <add>, %35, %cst_24 [0] : vector<4x16x32xf32> to vector<16x32xf32>
    %c0_25 = arith.constant 0 : index
    %c0_26 = arith.constant 0 : index
    %37 = vector.load %arg7[%c0_25, %c0_26] : memref<1x32xf32, #tpu.memory_space<vmem>>, vector<1x32xf32>
    %38 = vector.broadcast %37 : vector<1x32xf32> to vector<16x32xf32>
    %39 = arith.addf %36, %38 : vector<16x32xf32>
    %c0_27 = arith.constant 0 : index
    %c0_28 = arith.constant 0 : index
    %c0_29 = arith.constant 0 : index
    %40 = vector.load %arg5[%c0_27, %c0_28, %c0_29] : memref<1x16x32xf32, #tpu.memory_space<vmem>>, vector<1x16x32xf32>
    %41 = vector.shape_cast %40 : vector<1x16x32xf32> to vector<16x32xf32>
    %42 = arith.addf %39, %41 : vector<16x32xf32>
    %c0_30 = arith.constant 0 : index
    %c0_31 = arith.constant 0 : index
    %43 = vector.load %arg8[%c0_30, %c0_31] : memref<1x32xf32, #tpu.memory_space<vmem>>, vector<1x32xf32>
    %c0_32 = arith.constant 0 : index
    %c0_33 = arith.constant 0 : index
    %44 = vector.load %arg9[%c0_32, %c0_33] : memref<1x32xf32, #tpu.memory_space<vmem>>, vector<1x32xf32>
    %cst_34 = arith.constant dense<0.000000e+00> : vector<16xf32>
    %45 = vector.multi_reduction <add>, %42, %cst_34 [1] : vector<16x32xf32> to vector<16xf32>
    %46 = vector.shape_cast %45 : vector<16xf32> to vector<16x1xf32>
    %cst_35 = arith.constant 3.200000e+01 : f32
    %47 = vector.broadcast %cst_35 : f32 to vector<16x1xf32>
    %48 = arith.divf %46, %47 : vector<16x1xf32>
    %49 = vector.broadcast %48 : vector<16x1xf32> to vector<16x32xf32>
    %50 = arith.subf %42, %49 : vector<16x32xf32>
    %51 = arith.mulf %50, %50 : vector<16x32xf32>
    %cst_36 = arith.constant dense<0.000000e+00> : vector<16xf32>
    %52 = vector.multi_reduction <add>, %51, %cst_36 [1] : vector<16x32xf32> to vector<16xf32>
    %53 = vector.shape_cast %52 : vector<16xf32> to vector<16x1xf32>
    %cst_37 = arith.constant 3.200000e+01 : f32
    %54 = vector.broadcast %cst_37 : f32 to vector<16x1xf32>
    %55 = arith.divf %53, %54 : vector<16x1xf32>
    %56 = vector.broadcast %48 : vector<16x1xf32> to vector<16x32xf32>
    %57 = arith.subf %42, %56 : vector<16x32xf32>
    %cst_38 = arith.constant 9.99999997E-7 : f32
    %58 = vector.broadcast %cst_38 : f32 to vector<16x1xf32>
    %59 = arith.addf %55, %58 : vector<16x1xf32>
    %60 = math.rsqrt %59 : vector<16x1xf32>
    %61 = vector.broadcast %60 : vector<16x1xf32> to vector<16x32xf32>
    %62 = arith.mulf %57, %61 : vector<16x32xf32>
    %63 = vector.broadcast %43 : vector<1x32xf32> to vector<16x32xf32>
    %64 = arith.mulf %62, %63 : vector<16x32xf32>
    %65 = vector.broadcast %44 : vector<1x32xf32> to vector<16x32xf32>
    %66 = arith.addf %64, %65 : vector<16x32xf32>
    %c0_39 = arith.constant 0 : index
    %c0_40 = arith.constant 0 : index
    %c0_41 = arith.constant 0 : index
    %67 = vector.load %arg10[%c0_39, %c0_40, %c0_41] : memref<1x16x32xf32, #tpu.memory_space<vmem>>, vector<1x16x32xf32>
    %68 = vector.shape_cast %67 : vector<1x16x32xf32> to vector<16x32xf32>
    %69 = vector.shape_cast %66 : vector<16x32xf32> to vector<1x16x32xf32>
    tpu.vector_store %arg10[%c0_39, %c0_40, %c0_41], %69 {strides = array<i32>} : memref<1x16x32xf32, #tpu.memory_space<vmem>>, vector<1x16x32xf32>,
    return
  }
  func.func @transform_0(%arg0: i32) -> (i32, i32, i32, i32) {
    %c0_i32 = arith.constant 0 : i32
    %c0_i32_0 = arith.constant 0 : i32
    %c0_i32_1 = arith.constant 0 : i32
    %c0_i32_2 = arith.constant 0 : i32
    return %arg0, %c0_i32, %c0_i32_0, %c0_i32_1 : i32, i32, i32, i32
  }
  func.func @transform_1(%arg0: i32) -> (i32, i32, i32, i32) {
    %c0_i32 = arith.constant 0 : i32
    %c0_i32_0 = arith.constant 0 : i32
    %c0_i32_1 = arith.constant 0 : i32
    %c0_i32_2 = arith.constant 0 : i32
    return %arg0, %c0_i32, %c0_i32_0, %c0_i32_1 : i32, i32, i32, i32
  }
  func.func @transform_2(%arg0: i32) -> (i32, i32, i32, i32) {
    %c0_i32 = arith.constant 0 : i32
    %c0_i32_0 = arith.constant 0 : i32
    %c0_i32_1 = arith.constant 0 : i32
    %c0_i32_2 = arith.constant 0 : i32
    return %arg0, %c0_i32, %c0_i32_0, %c0_i32_1 : i32, i32, i32, i32
  }
  func.func @transform_3(%arg0: i32) -> (i32, i32, i32) {
    %c0_i32 = arith.constant 0 : i32
    %c0_i32_0 = arith.constant 0 : i32
    %c0_i32_1 = arith.constant 0 : i32
    return %arg0, %c0_i32, %c0_i32_0 : i32, i32, i32
  }
  func.func @transform_4(%arg0: i32) -> (i32, i32, i32) {
    %c0_i32 = arith.constant 0 : i32
    %c0_i32_0 = arith.constant 0 : i32
    %c0_i32_1 = arith.constant 0 : i32
    return %arg0, %c0_i32, %c0_i32_0 : i32, i32, i32
  }
  func.func @transform_5(%arg0: i32) -> (i32, i32, i32) {
    %c0_i32 = arith.constant 0 : i32
    %c0_i32_0 = arith.constant 0 : i32
    %c0_i32_1 = arith.constant 0 : i32
    %c0_i32_2 = arith.constant 0 : i32
    return %c0_i32, %c0_i32_0, %c0_i32_1 : i32, i32, i32
  }
  func.func @transform_6(%arg0: i32) -> (i32, i32) {
    %c0_i32 = arith.constant 0 : i32
    %c0_i32_0 = arith.constant 0 : i32
    %c0_i32_1 = arith.constant 0 : i32
    return %c0_i32, %c0_i32_0 : i32, i32
  }
  func.func @transform_7(%arg0: i32) -> (i32, i32) {
    %c0_i32 = arith.constant 0 : i32
    %c0_i32_0 = arith.constant 0 : i32
    %c0_i32_1 = arith.constant 0 : i32
    return %c0_i32, %c0_i32_0 : i32, i32
  }
  func.func @transform_8(%arg0: i32) -> (i32, i32) {
    %c0_i32 = arith.constant 0 : i32
    %c0_i32_0 = arith.constant 0 : i32
    %c0_i32_1 = arith.constant 0 : i32
    return %c0_i32, %c0_i32_0 : i32, i32
  }
  func.func @transform_9(%arg0: i32) -> (i32, i32, i32) {
    %c0_i32 = arith.constant 0 : i32
    %c0_i32_0 = arith.constant 0 : i32
    %c0_i32_1 = arith.constant 0 : i32
    return %arg0, %c0_i32, %c0_i32_0 : i32, i32, i32
  }
}

module attributes {stable_mosaic.version = 11 : i64} {
  func.func @_ffn_ln_kernel(%arg0: i32, %arg1: memref<32x32xf32, #tpu.memory_space<vmem>>, %arg2: memref<32x64xbf16, #tpu.memory_space<vmem>>, %arg3: memref<1x64xf32, #tpu.memory_space<vmem>>, %arg4: memref<64x32xbf16, #tpu.memory_space<vmem>>, %arg5: memref<1x32xf32, #tpu.memory_space<vmem>>, %arg6: memref<1x32xf32, #tpu.memory_space<vmem>>, %arg7: memref<1x32xf32, #tpu.memory_space<vmem>>, %arg8: memref<32x32xf32, #tpu.memory_space<vmem>>) attributes {dimension_semantics = [#tpu.dimension_semantics<parallel>], iteration_bounds = array<i64: 1>, scalar_prefetch = 0 : i64, scratch_operands = 0 : i64, tpu.core_type = #tpu.core_type<tc>, window_params = [{transform_indices = @transform_0, window_bounds = array<i64: 32, 32>}, {pipeline_mode = #tpu.pipeline_mode<synchronous>, transform_indices = @transform_1, window_bounds = array<i64: 32, 64>}, {pipeline_mode = #tpu.pipeline_mode<synchronous>, transform_indices = @transform_2, window_bounds = array<i64: 1, 64>}, {pipeline_mode = #tpu.pipeline_mode<synchronous>, transform_indices = @transform_3, window_bounds = array<i64: 64, 32>}, {pipeline_mode = #tpu.pipeline_mode<synchronous>, transform_indices = @transform_4, window_bounds = array<i64: 1, 32>}, {pipeline_mode = #tpu.pipeline_mode<synchronous>, transform_indices = @transform_5, window_bounds = array<i64: 1, 32>}, {pipeline_mode = #tpu.pipeline_mode<synchronous>, transform_indices = @transform_6, window_bounds = array<i64: 1, 32>}, {transform_indices = @transform_7, window_bounds = array<i64: 32, 32>}]} {
    %c0 = arith.constant 0 : index
    %c0_0 = arith.constant 0 : index
    %0 = vector.load %arg1[%c0, %c0_0] : memref<32x32xf32, #tpu.memory_space<vmem>>, vector<32x32xf32>
    %1 = arith.truncf %0 : vector<32x32xf32> to vector<32x32xbf16>
    %c0_1 = arith.constant 0 : index
    %c0_2 = arith.constant 0 : index
    %2 = vector.load %arg2[%c0_1, %c0_2] : memref<32x64xbf16, #tpu.memory_space<vmem>>, vector<32x64xbf16>
    %cst = arith.constant dense<0.000000e+00> : vector<32x64xf32>
    %3 = tpu.matmul %1, %2, %cst {dimension_numbers = #tpu.dot_dimension_numbers<[1], [0], [0], [1], [0, 0, 1, 1], [], []>} : vector<32x32xbf16>, vector<32x64xbf16>, vector<32x64xf32> -> vector<32x64xf32>
    %c0_3 = arith.constant 0 : index
    %c0_4 = arith.constant 0 : index
    %4 = vector.load %arg3[%c0_3, %c0_4] : memref<1x64xf32, #tpu.memory_space<vmem>>, vector<1x64xf32>
    %5 = vector.broadcast %4 : vector<1x64xf32> to vector<32x64xf32>
    %6 = arith.addf %3, %5 : vector<32x64xf32>
    %cst_5 = arith.constant 0.000000e+00 : f32
    %7 = vector.broadcast %cst_5 : f32 to vector<32x64xf32>
    %8 = arith.maximumf %6, %7 : vector<32x64xf32>
    %9 = arith.truncf %8 : vector<32x64xf32> to vector<32x64xbf16>
    %c0_6 = arith.constant 0 : index
    %c0_7 = arith.constant 0 : index
    %10 = vector.load %arg4[%c0_6, %c0_7] : memref<64x32xbf16, #tpu.memory_space<vmem>>, vector<64x32xbf16>
    %cst_8 = arith.constant dense<0.000000e+00> : vector<32x32xf32>
    %11 = tpu.matmul %9, %10, %cst_8 {dimension_numbers = #tpu.dot_dimension_numbers<[1], [0], [0], [1], [0, 0, 1, 1], [], []>} : vector<32x64xbf16>, vector<64x32xbf16>, vector<32x32xf32> -> vector<32x32xf32>
    %c0_9 = arith.constant 0 : index
    %c0_10 = arith.constant 0 : index
    %12 = vector.load %arg5[%c0_9, %c0_10] : memref<1x32xf32, #tpu.memory_space<vmem>>, vector<1x32xf32>
    %13 = vector.broadcast %12 : vector<1x32xf32> to vector<32x32xf32>
    %14 = arith.addf %11, %13 : vector<32x32xf32>
    %15 = arith.addf %0, %14 : vector<32x32xf32>
    %c0_11 = arith.constant 0 : index
    %c0_12 = arith.constant 0 : index
    %16 = vector.load %arg6[%c0_11, %c0_12] : memref<1x32xf32, #tpu.memory_space<vmem>>, vector<1x32xf32>
    %c0_13 = arith.constant 0 : index
    %c0_14 = arith.constant 0 : index
    %17 = vector.load %arg7[%c0_13, %c0_14] : memref<1x32xf32, #tpu.memory_space<vmem>>, vector<1x32xf32>
    %cst_15 = arith.constant dense<0.000000e+00> : vector<32xf32>
    %18 = vector.multi_reduction <add>, %15, %cst_15 [1] : vector<32x32xf32> to vector<32xf32>
    %19 = vector.shape_cast %18 : vector<32xf32> to vector<32x1xf32>
    %cst_16 = arith.constant 3.200000e+01 : f32
    %20 = vector.broadcast %cst_16 : f32 to vector<32x1xf32>
    %21 = arith.divf %19, %20 : vector<32x1xf32>
    %22 = vector.broadcast %21 : vector<32x1xf32> to vector<32x32xf32>
    %23 = arith.subf %15, %22 : vector<32x32xf32>
    %24 = arith.mulf %23, %23 : vector<32x32xf32>
    %cst_17 = arith.constant dense<0.000000e+00> : vector<32xf32>
    %25 = vector.multi_reduction <add>, %24, %cst_17 [1] : vector<32x32xf32> to vector<32xf32>
    %26 = vector.shape_cast %25 : vector<32xf32> to vector<32x1xf32>
    %cst_18 = arith.constant 3.200000e+01 : f32
    %27 = vector.broadcast %cst_18 : f32 to vector<32x1xf32>
    %28 = arith.divf %26, %27 : vector<32x1xf32>
    %29 = vector.broadcast %21 : vector<32x1xf32> to vector<32x32xf32>
    %30 = arith.subf %15, %29 : vector<32x32xf32>
    %cst_19 = arith.constant 9.99999997E-7 : f32
    %31 = vector.broadcast %cst_19 : f32 to vector<32x1xf32>
    %32 = arith.addf %28, %31 : vector<32x1xf32>
    %33 = math.rsqrt %32 : vector<32x1xf32>
    %34 = vector.broadcast %33 : vector<32x1xf32> to vector<32x32xf32>
    %35 = arith.mulf %30, %34 : vector<32x32xf32>
    %36 = vector.broadcast %16 : vector<1x32xf32> to vector<32x32xf32>
    %37 = arith.mulf %35, %36 : vector<32x32xf32>
    %38 = vector.broadcast %17 : vector<1x32xf32> to vector<32x32xf32>
    %39 = arith.addf %37, %38 : vector<32x32xf32>
    %c0_20 = arith.constant 0 : index
    %c0_21 = arith.constant 0 : index
    %40 = vector.load %arg8[%c0_20, %c0_21] : memref<32x32xf32, #tpu.memory_space<vmem>>, vector<32x32xf32>
    tpu.vector_store %arg8[%c0_20, %c0_21], %39 {strides = array<i32>} : memref<32x32xf32, #tpu.memory_space<vmem>>, vector<32x32xf32>,
    return
  }
  func.func @transform_0(%arg0: i32) -> (i32, i32) {
    %c0_i32 = arith.constant 0 : i32
    %c0_i32_0 = arith.constant 0 : i32
    return %arg0, %c0_i32 : i32, i32
  }
  func.func @transform_1(%arg0: i32) -> (i32, i32) {
    %c0_i32 = arith.constant 0 : i32
    %c0_i32_0 = arith.constant 0 : i32
    %c0_i32_1 = arith.constant 0 : i32
    return %c0_i32, %c0_i32_0 : i32, i32
  }
  func.func @transform_2(%arg0: i32) -> (i32, i32) {
    %c0_i32 = arith.constant 0 : i32
    %c0_i32_0 = arith.constant 0 : i32
    %c0_i32_1 = arith.constant 0 : i32
    return %c0_i32, %c0_i32_0 : i32, i32
  }
  func.func @transform_3(%arg0: i32) -> (i32, i32) {
    %c0_i32 = arith.constant 0 : i32
    %c0_i32_0 = arith.constant 0 : i32
    %c0_i32_1 = arith.constant 0 : i32
    return %c0_i32, %c0_i32_0 : i32, i32
  }
  func.func @transform_4(%arg0: i32) -> (i32, i32) {
    %c0_i32 = arith.constant 0 : i32
    %c0_i32_0 = arith.constant 0 : i32
    %c0_i32_1 = arith.constant 0 : i32
    return %c0_i32, %c0_i32_0 : i32, i32
  }
  func.func @transform_5(%arg0: i32) -> (i32, i32) {
    %c0_i32 = arith.constant 0 : i32
    %c0_i32_0 = arith.constant 0 : i32
    %c0_i32_1 = arith.constant 0 : i32
    return %c0_i32, %c0_i32_0 : i32, i32
  }
  func.func @transform_6(%arg0: i32) -> (i32, i32) {
    %c0_i32 = arith.constant 0 : i32
    %c0_i32_0 = arith.constant 0 : i32
    %c0_i32_1 = arith.constant 0 : i32
    return %c0_i32, %c0_i32_0 : i32, i32
  }
  func.func @transform_7(%arg0: i32) -> (i32, i32) {
    %c0_i32 = arith.constant 0 : i32
    %c0_i32_0 = arith.constant 0 : i32
    return %arg0, %c0_i32 : i32, i32
  }
}

module attributes {stable_mosaic.version = 11 : i64} {
  func.func @_attflat_kernel(%arg0: i32, %arg1: memref<1x16x32xf32, #tpu.memory_space<vmem>>, %arg2: memref<32x32xbf16, #tpu.memory_space<vmem>>, %arg3: memref<1x32xf32, #tpu.memory_space<vmem>>, %arg4: memref<32x1xbf16, #tpu.memory_space<vmem>>, %arg5: memref<1x1xf32, #tpu.memory_space<vmem>>, %arg6: memref<1x1x32xf32, #tpu.memory_space<vmem>>) attributes {dimension_semantics = [#tpu.dimension_semantics<parallel>], iteration_bounds = array<i64: 2>, scalar_prefetch = 0 : i64, scratch_operands = 0 : i64, tpu.core_type = #tpu.core_type<tc>, window_params = [{transform_indices = @transform_0, window_bounds = array<i64: 1, 16, 32>}, {pipeline_mode = #tpu.pipeline_mode<synchronous>, transform_indices = @transform_1, window_bounds = array<i64: 32, 32>}, {pipeline_mode = #tpu.pipeline_mode<synchronous>, transform_indices = @transform_2, window_bounds = array<i64: 1, 32>}, {pipeline_mode = #tpu.pipeline_mode<synchronous>, transform_indices = @transform_3, window_bounds = array<i64: 32, 1>}, {pipeline_mode = #tpu.pipeline_mode<synchronous>, transform_indices = @transform_4, window_bounds = array<i64: 1, 1>}, {transform_indices = @transform_5, window_bounds = array<i64: 1, 1, 32>}]} {
    %c0 = arith.constant 0 : index
    %c0_0 = arith.constant 0 : index
    %c0_1 = arith.constant 0 : index
    %0 = vector.load %arg1[%c0, %c0_0, %c0_1] : memref<1x16x32xf32, #tpu.memory_space<vmem>>, vector<1x16x32xf32>
    %1 = vector.shape_cast %0 : vector<1x16x32xf32> to vector<16x32xf32>
    %2 = arith.truncf %1 : vector<16x32xf32> to vector<16x32xbf16>
    %c0_2 = arith.constant 0 : index
    %c0_3 = arith.constant 0 : index
    %3 = vector.load %arg2[%c0_2, %c0_3] : memref<32x32xbf16, #tpu.memory_space<vmem>>, vector<32x32xbf16>
    %cst = arith.constant dense<0.000000e+00> : vector<16x32xf32>
    %4 = tpu.matmul %2, %3, %cst {dimension_numbers = #tpu.dot_dimension_numbers<[1], [0], [0], [1], [0, 0, 1, 1], [], []>} : vector<16x32xbf16>, vector<32x32xbf16>, vector<16x32xf32> -> vector<16x32xf32>
    %c0_4 = arith.constant 0 : index
    %c0_5 = arith.constant 0 : index
    %5 = vector.load %arg3[%c0_4, %c0_5] : memref<1x32xf32, #tpu.memory_space<vmem>>, vector<1x32xf32>
    %6 = vector.broadcast %5 : vector<1x32xf32> to vector<16x32xf32>
    %7 = arith.addf %4, %6 : vector<16x32xf32>
    %cst_6 = arith.constant 0.000000e+00 : f32
    %8 = vector.broadcast %cst_6 : f32 to vector<16x32xf32>
    %9 = arith.maximumf %7, %8 : vector<16x32xf32>
    %10 = arith.truncf %9 : vector<16x32xf32> to vector<16x32xbf16>
    %c0_7 = arith.constant 0 : index
    %c0_8 = arith.constant 0 : index
    %11 = vector.load %arg4[%c0_7, %c0_8] : memref<32x1xbf16, #tpu.memory_space<vmem>>, vector<32x1xbf16>
    %cst_9 = arith.constant dense<0.000000e+00> : vector<16x1xf32>
    %12 = tpu.matmul %10, %11, %cst_9 {dimension_numbers = #tpu.dot_dimension_numbers<[1], [0], [0], [1], [0, 0, 1, 1], [], []>} : vector<16x32xbf16>, vector<32x1xbf16>, vector<16x1xf32> -> vector<16x1xf32>
    %c0_10 = arith.constant 0 : index
    %c0_11 = arith.constant 0 : index
    %13 = vector.load %arg5[%c0_10, %c0_11] : memref<1x1xf32, #tpu.memory_space<vmem>>, vector<1x1xf32>
    %14 = vector.broadcast %13 : vector<1x1xf32> to vector<16x1xf32>
    %15 = arith.addf %12, %14 : vector<16x1xf32>
    %cst_12 = arith.constant dense<0xFF800000> : vector<1xf32>
    %16 = vector.multi_reduction <maximumf>, %15, %cst_12 [0] : vector<16x1xf32> to vector<1xf32>
    %17 = vector.shape_cast %16 : vector<1xf32> to vector<1x1xf32>
    %18 = vector.broadcast %17 : vector<1x1xf32> to vector<16x1xf32>
    %19 = arith.subf %15, %18 : vector<16x1xf32>
    %20 = math.exp %19 : vector<16x1xf32>
    %cst_13 = arith.constant dense<0.000000e+00> : vector<1xf32>
    %21 = vector.multi_reduction <add>, %20, %cst_13 [0] : vector<16x1xf32> to vector<1xf32>
    %22 = vector.shape_cast %21 : vector<1xf32> to vector<1x1xf32>
    %23 = tpu.reciprocal %22 {approx = true} : vector<1x1xf32> -> vector<1x1xf32>
    %24 = vector.broadcast %23 : vector<1x1xf32> to vector<16x1xf32>
    %25 = arith.mulf %20, %24 : vector<16x1xf32>
    %cst_14 = arith.constant dense<0.000000e+00> : vector<1x32xf32>
    %26 = tpu.matmul %25, %1, %cst_14 {dimension_numbers = #tpu.dot_dimension_numbers<[0], [0], [1], [1], [0, 1, 1, 1], [], []>} : vector<16x1xf32>, vector<16x32xf32>, vector<1x32xf32> -> vector<1x32xf32>
    %c0_15 = arith.constant 0 : index
    %c0_16 = arith.constant 0 : index
    %c0_17 = arith.constant 0 : index
    %27 = vector.load %arg6[%c0_15, %c0_16, %c0_17] : memref<1x1x32xf32, #tpu.memory_space<vmem>>, vector<1x1x32xf32>
    %28 = vector.shape_cast %27 : vector<1x1x32xf32> to vector<1x32xf32>
    %29 = vector.shape_cast %26 : vector<1x32xf32> to vector<1x1x32xf32>
    tpu.vector_store %arg6[%c0_15, %c0_16, %c0_17], %29 {strides = array<i32>} : memref<1x1x32xf32, #tpu.memory_space<vmem>>, vector<1x1x32xf32>,
    return
  }
  func.func @transform_0(%arg0: i32) -> (i32, i32, i32) {
    %c0_i32 = arith.constant 0 : i32
    %c0_i32_0 = arith.constant 0 : i32
    %c0_i32_1 = arith.constant 0 : i32
    return %arg0, %c0_i32, %c0_i32_0 : i32, i32, i32
  }
  func.func @transform_1(%arg0: i32) -> (i32, i32) {
    %c0_i32 = arith.constant 0 : i32
    %c0_i32_0 = arith.constant 0 : i32
    %c0_i32_1 = arith.constant 0 : i32
    return %c0_i32, %c0_i32_0 : i32, i32
  }
  func.func @transform_2(%arg0: i32) -> (i32, i32) {
    %c0_i32 = arith.constant 0 : i32
    %c0_i32_0 = arith.constant 0 : i32
    %c0_i32_1 = arith.constant 0 : i32
    return %c0_i32, %c0_i32_0 : i32, i32
  }
  func.func @transform_3(%arg0: i32) -> (i32, i32) {
    %c0_i32 = arith.constant 0 : i32
    %c0_i32_0 = arith.constant 0 : i32
    %c0_i32_1 = arith.constant 0 : i32
    return %c0_i32, %c0_i32_0 : i32, i32
  }
  func.func @transform_4(%arg0: i32) -> (i32, i32) {
    %c0_i32 = arith.constant 0 : i32
    %c0_i32_0 = arith.constant 0 : i32
    %c0_i32_1 = arith.constant 0 : i32
    return %c0_i32, %c0_i32_0 : i32, i32
  }
  func.func @transform_5(%arg0: i32) -> (i32, i32, i32) {
    %c0_i32 = arith.constant 0 : i32
    %c0_i32_0 = arith.constant 0 : i32
    %c0_i32_1 = arith.constant 0 : i32
    return %arg0, %c0_i32, %c0_i32_0 : i32, i32, i32
  }
}

module attributes {stable_mosaic.version = 11 : i64} {
  func.func @_add_layernorm_kernel(%arg0: i32, %arg1: memref<2x64xf32, #tpu.memory_space<vmem>>, %arg2: memref<2x64xf32, #tpu.memory_space<vmem>>, %arg3: memref<1x64xf32, #tpu.memory_space<vmem>>, %arg4: memref<1x64xf32, #tpu.memory_space<vmem>>, %arg5: memref<2x64xf32, #tpu.memory_space<vmem>>) attributes {dimension_semantics = [#tpu.dimension_semantics<parallel>], iteration_bounds = array<i64: 1>, scalar_prefetch = 0 : i64, scratch_operands = 0 : i64, tpu.core_type = #tpu.core_type<tc>, window_params = [{transform_indices = @transform_0, window_bounds = array<i64: 2, 64>}, {transform_indices = @transform_1, window_bounds = array<i64: 2, 64>}, {pipeline_mode = #tpu.pipeline_mode<synchronous>, transform_indices = @transform_2, window_bounds = array<i64: 1, 64>}, {pipeline_mode = #tpu.pipeline_mode<synchronous>, transform_indices = @transform_3, window_bounds = array<i64: 1, 64>}, {transform_indices = @transform_4, window_bounds = array<i64: 2, 64>}]} {
    %c0 = arith.constant 0 : index
    %c0_0 = arith.constant 0 : index
    %0 = vector.load %arg1[%c0, %c0_0] : memref<2x64xf32, #tpu.memory_space<vmem>>, vector<2x64xf32>
    %c0_1 = arith.constant 0 : index
    %c0_2 = arith.constant 0 : index
    %1 = vector.load %arg2[%c0_1, %c0_2] : memref<2x64xf32, #tpu.memory_space<vmem>>, vector<2x64xf32>
    %2 = arith.addf %0, %1 : vector<2x64xf32>
    %c0_3 = arith.constant 0 : index
    %c0_4 = arith.constant 0 : index
    %3 = vector.load %arg3[%c0_3, %c0_4] : memref<1x64xf32, #tpu.memory_space<vmem>>, vector<1x64xf32>
    %c0_5 = arith.constant 0 : index
    %c0_6 = arith.constant 0 : index
    %4 = vector.load %arg4[%c0_5, %c0_6] : memref<1x64xf32, #tpu.memory_space<vmem>>, vector<1x64xf32>
    %cst = arith.constant dense<0.000000e+00> : vector<2xf32>
    %5 = vector.multi_reduction <add>, %2, %cst [1] : vector<2x64xf32> to vector<2xf32>
    %6 = vector.shape_cast %5 : vector<2xf32> to vector<2x1xf32>
    %cst_7 = arith.constant 6.400000e+01 : f32
    %7 = vector.broadcast %cst_7 : f32 to vector<2x1xf32>
    %8 = arith.divf %6, %7 : vector<2x1xf32>
    %9 = vector.broadcast %8 : vector<2x1xf32> to vector<2x64xf32>
    %10 = arith.subf %2, %9 : vector<2x64xf32>
    %11 = arith.mulf %10, %10 : vector<2x64xf32>
    %cst_8 = arith.constant dense<0.000000e+00> : vector<2xf32>
    %12 = vector.multi_reduction <add>, %11, %cst_8 [1] : vector<2x64xf32> to vector<2xf32>
    %13 = vector.shape_cast %12 : vector<2xf32> to vector<2x1xf32>
    %cst_9 = arith.constant 6.400000e+01 : f32
    %14 = vector.broadcast %cst_9 : f32 to vector<2x1xf32>
    %15 = arith.divf %13, %14 : vector<2x1xf32>
    %16 = vector.broadcast %8 : vector<2x1xf32> to vector<2x64xf32>
    %17 = arith.subf %2, %16 : vector<2x64xf32>
    %cst_10 = arith.constant 9.99999997E-7 : f32
    %18 = vector.broadcast %cst_10 : f32 to vector<2x1xf32>
    %19 = arith.addf %15, %18 : vector<2x1xf32>
    %20 = math.rsqrt %19 : vector<2x1xf32>
    %21 = vector.broadcast %20 : vector<2x1xf32> to vector<2x64xf32>
    %22 = arith.mulf %17, %21 : vector<2x64xf32>
    %23 = vector.broadcast %3 : vector<1x64xf32> to vector<2x64xf32>
    %24 = arith.mulf %22, %23 : vector<2x64xf32>
    %25 = vector.broadcast %4 : vector<1x64xf32> to vector<2x64xf32>
    %26 = arith.addf %24, %25 : vector<2x64xf32>
    %c0_11 = arith.constant 0 : index
    %c0_12 = arith.constant 0 : index
    %27 = vector.load %arg5[%c0_11, %c0_12] : memref<2x64xf32, #tpu.memory_space<vmem>>, vector<2x64xf32>
    tpu.vector_store %arg5[%c0_11, %c0_12], %26 {strides = array<i32>} : memref<2x64xf32, #tpu.memory_space<vmem>>, vector<2x64xf32>,
    return
  }
  func.func @transform_0(%arg0: i32) -> (i32, i32) {
    %c0_i32 = arith.constant 0 : i32
    %c0_i32_0 = arith.constant 0 : i32
    return %arg0, %c0_i32 : i32, i32
  }
  func.func @transform_1(%arg0: i32) -> (i32, i32) {
    %c0_i32 = arith.constant 0 : i32
    %c0_i32_0 = arith.constant 0 : i32
    return %arg0, %c0_i32 : i32, i32
  }
  func.func @transform_2(%arg0: i32) -> (i32, i32) {
    %c0_i32 = arith.constant 0 : i32
    %c0_i32_0 = arith.constant 0 : i32
    %c0_i32_1 = arith.constant 0 : i32
    return %c0_i32, %c0_i32_0 : i32, i32
  }
  func.func @transform_3(%arg0: i32) -> (i32, i32) {
    %c0_i32 = arith.constant 0 : i32
    %c0_i32_0 = arith.constant 0 : i32
    %c0_i32_1 = arith.constant 0 : i32
    return %c0_i32, %c0_i32_0 : i32, i32
  }
  func.func @transform_4(%arg0: i32) -> (i32, i32) {
    %c0_i32 = arith.constant 0 : i32
    %c0_i32_0 = arith.constant 0 : i32
    return %arg0, %c0_i32 : i32, i32
  }
}

module attributes {stable_mosaic.version = 11 : i64} {
  func.func @_matmul_bias_kernel(%arg0: i32, %arg1: i32, %arg2: i32, %arg3: memref<2x64xf32, #tpu.memory_space<vmem>>, %arg4: memref<64x10xbf16, #tpu.memory_space<vmem>>, %arg5: memref<1x10xf32, #tpu.memory_space<vmem>>, %arg6: memref<2x10xf32, #tpu.memory_space<vmem>>, %arg7: memref<2x10xf32, #tpu.memory_space<vmem>>) attributes {dimension_semantics = [#tpu.dimension_semantics<parallel>, #tpu.dimension_semantics<parallel>, #tpu.dimension_semantics<arbitrary>], iteration_bounds = array<i64: 1, 1, 1>, scalar_prefetch = 0 : i64, scratch_operands = 1 : i64, tpu.core_type = #tpu.core_type<tc>, window_params = [{transform_indices = @transform_0, window_bounds = array<i64: 2, 64>}, {transform_indices = @transform_1, window_bounds = array<i64: 64, 10>}, {transform_indices = @transform_2, window_bounds = array<i64: 1, 10>}, {transform_indices = @transform_3, window_bounds = array<i64: 2, 10>}]} {
    %c0_i32 = arith.constant 0 : i32
    %0 = arith.cmpi eq, %arg2, %c0_i32 : i32
    %1 = arith.extui %0 : i1 to i32
    %c0_i32_0 = arith.constant 0 : i32
    %2 = arith.cmpi ne, %1, %c0_i32_0 : i32
    scf.if %2 {
      %cst_10 = arith.constant 0.000000e+00 : f32
      %13 = vector.broadcast %cst_10 : f32 to vector<2x10xf32>
      %c0_11 = arith.constant 0 : index
      %c0_12 = arith.constant 0 : index
      %14 = vector.load %arg7[%c0_11, %c0_12] : memref<2x10xf32, #tpu.memory_space<vmem>>, vector<2x10xf32>
      tpu.vector_store %arg7[%c0_11, %c0_12], %13 {strides = array<i32>} : memref<2x10xf32, #tpu.memory_space<vmem>>, vector<2x10xf32>,
    } else {
    }
    %c0 = arith.constant 0 : index
    %c0_1 = arith.constant 0 : index
    %3 = vector.load %arg7[%c0, %c0_1] : memref<2x10xf32, #tpu.memory_space<vmem>>, vector<2x10xf32>
    %c0_2 = arith.constant 0 : index
    %c0_3 = arith.constant 0 : index
    %4 = vector.load %arg3[%c0_2, %c0_3] : memref<2x64xf32, #tpu.memory_space<vmem>>, vector<2x64xf32>
    %5 = arith.truncf %4 : vector<2x64xf32> to vector<2x64xbf16>
    %c0_4 = arith.constant 0 : index
    %c0_5 = arith.constant 0 : index
    %6 = vector.load %arg4[%c0_4, %c0_5] : memref<64x10xbf16, #tpu.memory_space<vmem>>, vector<64x10xbf16>
    %cst = arith.constant dense<0.000000e+00> : vector<2x10xf32>
    %7 = tpu.matmul %5, %6, %cst {dimension_numbers = #tpu.dot_dimension_numbers<[1], [0], [0], [1], [0, 0, 1, 1], [], []>} : vector<2x64xbf16>, vector<64x10xbf16>, vector<2x10xf32> -> vector<2x10xf32>
    %8 = arith.addf %3, %7 : vector<2x10xf32>
    %c0_6 = arith.constant 0 : index
    %c0_7 = arith.constant 0 : index
    %9 = vector.load %arg7[%c0_6, %c0_7] : memref<2x10xf32, #tpu.memory_space<vmem>>, vector<2x10xf32>
    tpu.vector_store %arg7[%c0_6, %c0_7], %8 {strides = array<i32>} : memref<2x10xf32, #tpu.memory_space<vmem>>, vector<2x10xf32>,
    %c0_i32_8 = arith.constant 0 : i32
    %10 = arith.cmpi eq, %arg2, %c0_i32_8 : i32
    %11 = arith.extui %10 : i1 to i32
    %c0_i32_9 = arith.constant 0 : i32
    %12 = arith.cmpi ne, %11, %c0_i32_9 : i32
    scf.if %12 {
      %c0_10 = arith.constant 0 : index
      %c0_11 = arith.constant 0 : index
      %13 = vector.load %arg7[%c0_10, %c0_11] : memref<2x10xf32, #tpu.memory_space<vmem>>, vector<2x10xf32>
      %c0_12 = arith.constant 0 : index
      %c0_13 = arith.constant 0 : index
      %14 = vector.load %arg5[%c0_12, %c0_13] : memref<1x10xf32, #tpu.memory_space<vmem>>, vector<1x10xf32>
      %15 = vector.broadcast %14 : vector<1x10xf32> to vector<2x10xf32>
      %16 = arith.addf %13, %15 : vector<2x10xf32>
      %c0_14 = arith.constant 0 : index
      %c0_15 = arith.constant 0 : index
      %17 = vector.load %arg6[%c0_14, %c0_15] : memref<2x10xf32, #tpu.memory_space<vmem>>, vector<2x10xf32>
      tpu.vector_store %arg6[%c0_14, %c0_15], %16 {strides = array<i32>} : memref<2x10xf32, #tpu.memory_space<vmem>>, vector<2x10xf32>,
    } else {
    }
    return
  }
  func.func @transform_0(%arg0: i32, %arg1: i32, %arg2: i32) -> (i32, i32) {
    %c0_i32 = arith.constant 0 : i32
    return %arg0, %arg2 : i32, i32
  }
  func.func @transform_1(%arg0: i32, %arg1: i32, %arg2: i32) -> (i32, i32) {
    %c0_i32 = arith.constant 0 : i32
    return %arg2, %arg1 : i32, i32
  }
  func.func @transform_2(%arg0: i32, %arg1: i32, %arg2: i32) -> (i32, i32) {
    %c0_i32 = arith.constant 0 : i32
    %c0_i32_0 = arith.constant 0 : i32
    return %c0_i32, %arg1 : i32, i32
  }
  func.func @transform_3(%arg0: i32, %arg1: i32, %arg2: i32) -> (i32, i32) {
    %c0_i32 = arith.constant 0 : i32
    return %arg0, %arg1 : i32, i32
  }
}

</mosaic_0001>

<bundles_post_ra>
// kernel: custom-call
= control target key start
LH: loop header
LB: loop body
LE: loop exit
PB: predicated region body
PF: predicated region fallthrough
CT: control target
= control target key end

     0   :  { %s6_s0 = inlined_call_operand.vmem [shape: f32[2,32], index: 0, kind: output, shape index: {}]  }

// kernel: custom-call.4
= control target key start
LH: loop header
LB: loop body
LE: loop exit
PB: predicated region body
PF: predicated region fallthrough
CT: control target
= control target key end

     0   :  { %s6_s0 = inlined_call_operand.vmem [shape: f32[8,2,32], index: 0, kind: output, shape index: {}]  }

// kernel: forward.26
= control target key start
LH: loop header
LB: loop body
LE: loop exit
PB: predicated region body
PF: predicated region fallthrough
CT: control target
= control target key end

     0   :  { %v116_v0 = vmov 0.0   ;;  %vm117_vm0 = vmmov 0   ;;  %vm32_vm1 = vcmask 261120   ;;  %s165_s1 = inlined_call_operand.vmem [shape: f32[32,128], index: 1, kind: input, shape index: {}]   ;;  %s166_s0 = inlined_call_operand.vmem [shape: f32[16,32], index: 0, kind: input, shape index: {}]   ;;  %s167_s2 = inlined_call_operand.vmem [shape: f32[1,128], index: 2, kind: input, shape index: {}]   ;;  %s168_s3 = inlined_call_operand.vmem [shape: f32[16,128], index: 3, kind: output, shape index: {}]  }
   0x1   :  { %106 = vmatprep.subr.bf16.mxu0 %v116_v0  ;;  %v28_v1 = vld [vmem:[%s165_s1 + $0x10] sm:$0xff]  ;;  %v29_v2 = vld [vmem:[%s165_s1 + $0x18] sm:$0xff]  ;;  %v26_v3 = vld [vmem:[%s165_s1] sm:$0xff]  ;;  %110 = vmatprep.mubr.msk.bf16.mxu0 %vm117_vm0, %v116_v0 }
   0x2   :  { %v31_v4 = vpack.c.bf16 %v29_v2, %v28_v1  ;;  %v27_v5 = vld [vmem:[%s165_s1 + $0x8] sm:$0xff]  ;;  %v23_v7 = vld [vmem:[%s166_s0] sm:$0xff] }
   0x3   :  { %v30_v6 = vpack.c.bf16 %v27_v5, %v26_v3  ;;  %v24_v8 = vld [vmem:[%s166_s0 + $0x8] sm:$0xff]  ;;  %v102_v10 = vld [vmem:[%s167_s2] ss:$0 sm:$0xff] }
   0x4   :  { %107 = vmatpush3.bf16.msra.mxu0 %v31_v4  ;;  %v25_v9 = vpack.c.bf16 %v24_v8, %v23_v7 }
   0x5   :  { %108 = vmatprep.subr.bf16.mxu0 %v116_v0 }
   0x8   :  { %109 = vmatpush3.bf16.msra.mxu0 %v30_v6 }
   0xb   :  { %111 = vmatmul.mubr.msk.bf16.vlgmr.msra.gmra.mxu0 %vm32_vm1, %v25_v9 }
  0xcb   :  { %v70_v11 = vpop.f32.mrf.mxu0 }
  0xcc   :  { %v93_v12 = vadd.f32 %v102_v10, %v70_v11 }
  0xcd   :  { %v112_v13 = vpop.f32.mrf.mxu0 }
  0xce   :  { %95 = vst [vmem:[%s168_s3] sm:$0xff] %v93_v12 }
  0xcf   :  { %v73_v14 = vpop.f32.mrf.mxu0 }
  0xd0   :  { %v94_v15 = vadd.f32 %v102_v10, %v73_v14 }
  0xd1   :  { %v113_v16 = vpop.f32.mrf.mxu0 }
  0xd2   :  { %96 = vst [vmem:[%s168_s3 + $0x8] sm:$0xff] %v94_v15 }

// kernel: forward.28
= control target key start
LH: loop header
LB: loop body
LE: loop exit
PB: predicated region body
PF: predicated region fallthrough
CT: control target
= control target key end

     0   :  { %vm19_vm0 = vcmask 785408   ;;  %v132_v0 = vmov 0.0   ;;  %vm133_vm1 = vmmov 0   ;;  %vm43_vm2 = vcmask 261120   ;;  %s181_s1 = inlined_call_operand.vmem [shape: bf16[32,96], index: 1, kind: input, shape index: {}]   ;;  %s182_s0 = inlined_call_operand.vmem [shape: f32[16,32], index: 0, kind: input, shape index: {}]   ;;  %s183_s2 = inlined_call_operand.vmem [shape: f32[1,96], index: 2, kind: input, shape index: {}]   ;;  %s184_s3 = inlined_call_operand.vmem [shape: f32[16,96], index: 3, kind: output, shape index: {}]  }
   0x1   :  { %120 = vmatprep.subr.bf16.mxu0 %v132_v0  ;;  %v130_v1 = vld [vmem:[%s181_s1 + $0x8] sm:$0xff]   ;;  %124 = vmatprep.mubr.msk.bf16.mxu0 %vm133_vm1, %v132_v0  ;;  %20 = vst.msk [vmem:[#allocation2] sm:$0xff] %vm19_vm0, %v132_v0  ;;  %21 = vst.msk [vmem:[#allocation2 + $0x8] sm:$0xff] %vm19_vm0, %v132_v0  ;;  %v131_v2 = vld [vmem:[%s181_s1] sm:$0xff]  }
   0x2   :  { %121 = vmatpush3.bf16.msra.mxu0 %v130_v1  ;;  %v24_v3 = vld [vmem:[%s182_s0] sm:$0xff]  ;;  %v25_v4 = vld [vmem:[%s182_s0 + $0x8] sm:$0xff] }
   0x3   :  { %122 = vmatprep.subr.bf16.mxu0 %v132_v0  ;;  %v26_v5 = vpack.c.bf16 %v25_v4, %v24_v3  ;;  %v116_v14 = vld [vmem:[%s183_s2] ss:$0 sm:$0xff] }
   0x6   :  { %123 = vmatpush3.bf16.msra.mxu0 %v131_v2 }
   0x8   :  { %v22_v6 = vld [vmem:[#allocation2] sm:$0xff]  ;;  %v23_v10 = vld [vmem:[#allocation2 + $0x8] sm:$0xff] }
   0x9   :  { %125 = vmatmul.mubr.msk.bf16.vlgmr.msra.gmra.mxu0 %vm43_vm2, %v26_v5 }
  0xc9   :  { %v81_v7 = vpop.f32.mrf.mxu0 }
  0xca   :  { %v88_v8 = vadd.f32 %v81_v7, %v22_v6 }
  0xcb   :  { %v126_v9 = vpop.f32.mrf.mxu0 }
  0xcc   :  { %91 = vst.msk [vmem:[#allocation2] sm:$0xff] %vm19_vm0, %v88_v8 }
  0xcd   :  { %v84_v11 = vpop.f32.mrf.mxu0 }
  0xce   :  { %v89_v12 = vadd.f32 %v84_v11, %v23_v10 }
  0xcf   :  { %v127_v13 = vpop.f32.mrf.mxu0 }
  0xd0   :  { %92 = vst.msk [vmem:[#allocation2 + $0x8] sm:$0xff] %vm19_vm0, %v89_v12 }
  0xd3   :  { %v96_v15 = vld [vmem:[#allocation2] sm:$0xff] }
  0xd4   :  { %v105_v16 = vadd.f32 %v116_v14, %v96_v15 }
  0xd6   :  { %107 = vst.msk [vmem:[%s184_s3] sm:$0xff] %vm19_vm0, %v105_v16 }
  0xd7   :  { %v97_v17 = vld [vmem:[#allocation2 + $0x8] sm:$0xff] }
  0xd8   :  { %v106_v18 = vadd.f32 %v116_v14, %v97_v17 }
  0xda   :  { %108 = vst.msk [vmem:[%s184_s3 + $0x8] sm:$0xff] %vm19_vm0, %v106_v18 }

// kernel: forward.30
= control target key start
LH: loop header
LB: loop body
LE: loop exit
PB: predicated region body
PF: predicated region fallthrough
CT: control target
= control target key end

     0   :  { %v290_v0 = vmov 0.0   ;;  %vm291_vm0 = vmmov 0   ;;  %vm53_vm1 = vcmask 261120   ;;  %vm140_vm2 = vcmask 523264   ;;  %s381_s1 = inlined_call_operand.vmem [shape: bf16[32,64], index: 1, kind: input, shape index: {}]   ;;  %s382_s0 = inlined_call_operand.vmem [shape: f32[16,32], index: 0, kind: input, shape index: {}]   ;;  %s383_s3 = inlined_call_operand.vmem [shape: bf16[64,32], index: 3, kind: input, shape index: {}]   ;;  %s384_s2 = inlined_call_operand.vmem [shape: f32[1,64], index: 2, kind: input, shape index: {}]   ;;  %s385_s4 = inlined_call_operand.vmem [shape: f32[1,32], index: 4, kind: input, shape index: {}]   ;;  %s386_s5 = inlined_call_operand.vmem [shape: f32[1,32], index: 5, kind: input, shape index: {}]   ;;  %s387_s6 = inlined_call_operand.vmem [shape: f32[1,32], index: 6, kind: input, shape index: {}]   ;;  %s388_s7 = inlined_call_operand.vmem [shape: f32[16,32], index: 7, kind: output, shape index: {}]  }
   0x1   :  { %258 = vmatprep.subr.bf16.mxu0 %v290_v0  ;;  %v280_v1 = vld [vmem:[%s381_s1 + $0x8] sm:$0xff]   ;;  %262 = vmatprep.mubr.msk.bf16.mxu0 %vm291_vm0, %v290_v0  ;;  %v281_v2 = vld [vmem:[%s381_s1] sm:$0xff]   ;;  %v282_v5 = vld [vmem:[%s383_s3 + $0x18] sm:$0xff]  }
   0x2   :  { %266 = vmatprep.subr.bf16.mxu1 %v290_v0  ;;  %274 = vmatprep.mubr.msk.bf16.mxu1 %vm291_vm0, %v290_v0  ;;  %v27_v3 = vld [vmem:[%s382_s0] sm:$0xff]  ;;  %v28_v4 = vld [vmem:[%s382_s0 + $0x8] sm:$0xff]  ;;  %v283_v7 = vld [vmem:[%s383_s3 + $0x10] sm:$0xff]  }
   0x3   :  { %259 = vmatpush3.bf16.msra.mxu0 %v280_v1  ;;  %v29_v6 = vpack.c.bf16 %v28_v4, %v27_v3  ;;  %267 = vmatpush3.bf16.msra.mxu1 %v282_v5  ;;  %v284_v8 = vld [vmem:[%s383_s3 + $0x8] sm:$0xff]   ;;  %v285_v9 = vld [vmem:[%s383_s3] sm:$0xff]  }
   0x4   :  { %260 = vmatprep.subr.bf16.mxu0 %v290_v0  ;;  %268 = vmatprep.subr.bf16.mxu1 %v290_v0  ;;  %v238_v10 = vld [vmem:[%s384_s2] ss:$0 sm:$0xff] }
   0x5   :  { %v242_v20 = vld [vmem:[%s385_s4] ss:$0 sm:$0xff] }
   0x6   :  { %v248_v48 = vld [vmem:[%s386_s5] ss:$0 sm:$0xff] }
   0x7   :  { %261 = vmatpush3.bf16.msra.mxu0 %v281_v2  ;;  %269 = vmatpush3.bf16.msra.mxu1 %v283_v7  ;;  %v249_v50 = vld [vmem:[%s387_s6] ss:$0 sm:$0xff] }
   0x8   :  { %270 = vmatprep.subr.bf16.mxu1 %v290_v0 }
   0xa   :  { %263 = vmatmul.mubr.msk.bf16.vlgmr.msra.gmra.mxu0 %vm53_vm1, %v29_v6 }
   0xb   :  { %271 = vmatpush3.bf16.msra.mxu1 %v284_v8 }
   0xc   :  { %272 = vmatprep.subr.bf16.mxu1 %v290_v0 }
   0xf   :  { %273 = vmatpush3.bf16.msra.mxu1 %v285_v9 }
  0xca   :  { %v91_v11 = vpop.f32.mrf.mxu0 }
  0xcb   :  { %v92_v13 = vadd.f32 %v238_v10, %v91_v11 }
  0xcc   :  { %v264_v12 = vpop.f32.mrf.mxu0 }
  0xcd   :  { %v98_v17 = vmax.f32 %v92_v13, 0.0 }
  0xce   :  { %v94_v14 = vpop.f32.mrf.mxu0 }
  0xcf   :  { %v95_v15 = vadd.f32 %v238_v10, %v94_v14 }
  0xd0   :  { %v265_v16 = vpop.f32.mrf.mxu0 }
  0xd1   :  { %v99_v18 = vmax.f32 %v95_v15, 0.0 }
  0xd3   :  { %v100_v19 = vpack.c.bf16 %v99_v18, %v98_v17 }
  0xd5   :  { %275 = vmatmul.mubr.msk.bf16.vlgmr.msra.gmra.mxu1 %vm140_vm2, %v100_v19 }
 0x195   :  { %v178_v21 = vpop.f32.mrf.mxu1 }
 0x196   :  { %v179_v22 = vadd.f32 %v242_v20, %v178_v21 }
 0x197   :  { %v276_v23 = vpop.f32.mrf.mxu1 }
 0x198   :  { %v185_v24 = vadd.f32 %v179_v22, %v27_v3 }
 0x199   :  { %v181_v25 = vpop.f32.mrf.mxu1 }
 0x19a   :  { %v182_v26 = vadd.f32 %v242_v20, %v181_v25  ;;  %v189_v27 = vsel %vm53_vm1, %v185_v24, 0.0 }
 0x19b   :  { %190 = vadd.xlane.f32.xlu0 %v189_v27  ;;  %v277_v28 = vpop.f32.mrf.mxu1 }
 0x19c   :  { %v186_v29 = vadd.f32 %v182_v26, %v28_v4 }
 0x19e   :  { %v192_v30 = vsel %vm53_vm1, %v186_v29, 0.0 }
 0x19f   :  { %193 = vadd.xlane.f32.xlu0 %v192_v30 }
 0x224   :  { %v191_v31 = vpop.xlane.xlu0 %190 }
 0x225   :  { %v196_v32 = vmul.f32 0.03125, %v191_v31 }
 0x227   :  { %v198_v33 = vsub.f32 %v185_v24, %v196_v32 }
 0x228   :  { %v194_v34 = vpop.xlane.xlu0 %193 }
 0x229   :  { %v197_v35 = vmul.f32 0.03125, %v194_v34  ;;  %v200_v36 = vmul.f32 %v198_v33, %v198_v33 }
 0x22b   :  { %v199_v37 = vsub.f32 %v186_v29, %v197_v35  ;;  %v202_v38 = vsel %vm53_vm1, %v200_v36, 0.0 }
 0x22c   :  { %203 = vadd.xlane.f32.xlu1 %v202_v38 }
 0x22d   :  { %v201_v39 = vmul.f32 %v199_v37, %v199_v37 }
 0x22f   :  { %v205_v40 = vsel %vm53_vm1, %v201_v39, 0.0 }
 0x230   :  { %206 = vadd.xlane.f32.xlu1 %v205_v40 }
 0x2b5   :  { %v204_v41 = vpop.xlane.xlu1 %203 }
 0x2b6   :  { %v208_v42 = vmul.f32 0.03125, %v204_v41 }
 0x2b8   :  { %v210_v43 = vadd.f32 1e-06, %v208_v42 }
 0x2b9   :  { %v207_v44 = vpop.xlane.xlu1 %206 }
 0x2ba   :  { %286 = vrsqrt.f32 %v210_v43  ;;  %v209_v45 = vmul.f32 0.03125, %v207_v44 }
 0x2bc   :  { %v211_v46 = vadd.f32 1e-06, %v209_v45 }
 0x2be   :  { %288 = vrsqrt.f32 %v211_v46 }
 0x2c7   :  { %v287_v47 = vpop.eup %286 }
 0x2c8   :  { %v214_v49 = vmul.f32 %v287_v47, %v198_v33 }
 0x2ca   :  { %v222_v51 = vmul.f32 %v248_v48, %v214_v49 }
 0x2cb   :  { %v289_v52 = vpop.eup %288 }
 0x2cc   :  { %v230_v53 = vadd.f32 %v249_v50, %v222_v51  ;;  %v215_v54 = vmul.f32 %v289_v52, %v199_v37 }
 0x2ce   :  { %232 = vst.msk [vmem:[%s388_s7] sm:$0xff] %vm53_vm1, %v230_v53  ;;  %v223_v55 = vmul.f32 %v248_v48, %v215_v54 }
 0x2d0   :  { %v231_v56 = vadd.f32 %v249_v50, %v223_v55 }
 0x2d2   :  { %233 = vst.msk [vmem:[%s388_s7 + $0x8] sm:$0xff] %vm53_vm1, %v231_v56 }

// kernel: forward.29
= control target key start
LH: loop header
LB: loop body
LE: loop exit
PB: predicated region body
PF: predicated region fallthrough
CT: control target
= control target key end

     0   :  { %s1419_s30 = smov 0   ;;  %s1562_s0 = inlined_call_operand.vmem [shape: f32[2,4,8,8], index: 0, kind: input, shape index: {}]   ;;  %s1563_s1 = inlined_call_operand.vmem [shape: f32[2,4,8,8], index: 1, kind: input, shape index: {}]   ;;  %s1564_s2 = inlined_call_operand.vmem [shape: f32[2,4,8,8], index: 2, kind: input, shape index: {}]   ;;  %s1565_s3 = inlined_call_operand.vmem [shape: f32[2,1,8], index: 3, kind: input, shape index: {}]   ;;  %s1566_s4 = inlined_call_operand.vmem [shape: f32[2,8,32], index: 4, kind: input, shape index: {}]   ;;  %s1567_s5 = inlined_call_operand.vmem [shape: bf16[4,8,32], index: 5, kind: input, shape index: {}]   ;;  %s1568_s6 = inlined_call_operand.vmem [shape: f32[1,32], index: 6, kind: input, shape index: {}]   ;;  %s1569_s7 = inlined_call_operand.vmem [shape: f32[1,32], index: 7, kind: input, shape index: {}]   ;;  %s1570_s8 = inlined_call_operand.vmem [shape: f32[1,32], index: 8, kind: input, shape index: {}]   ;;  %s1571_s9 = inlined_call_operand.vmem [shape: f32[2,8,32], index: 9, kind: output, shape index: {}]  }
   0x1 LB: > { %s1200_s10 = sadd.s32 4294967295, %s1364_s30   ;;  %p1204_p0 = scmp.ge.s32.totalorder %s1364_s30, 1  ;;  %s1364_s30 = sphi %s1419_s30, %s19_s30  }
   0x2   : > { %p324_p1 = scmp.lt.s32.totalorder %s1364_s30, 3 }
   0x4   : > { %p325_p2 = pnand %p1204_p0, %p324_p1 }
   0x5   : > { %p376_p3 = scmp.lt.s32.totalorder (!%p325_p2), %s1200_s10, 1 }
   0x6   : > { %328 = sbr.rel (%p325_p2) target bundleno = 1249 (0x4e1), region = 56 }
   0xb   : > { %v1366_v0 = vmov 0.0   ;;  %s1573_s10 = smov (!%p376_p3, %s1200_s10), 1  ;;  %vm1367_vm0 = vmmov 0   ;;  %vm431_vm1 = vcmask 64512   ;;  %v619_v25 = vlaneseq }
   0xc   : > { %1257 = vmatprep.subr.bf16.mxu0 %v1366_v0  ;;  %1263 = vmatprep.subr.bf16.mxu1 %v1366_v0  ;;  %s1436_s11 = sshll.u32 %s1573_s10, 5  ;;  %s393_s20 = scalar_lea.vmem %s1565_s3, %s1573_s10  ;;  %v1368_v29 = vmov 0   ;;  %vm679_vm4 = vcmask 1043456   ;;  %vm1053_vm5 = vcmask 261120  }
   0xd   : > { %1259 = vmatprep.mubr.msk.bf16.mxu0 %vm1367_vm0, %v1366_v0  ;;  %1265 = vmatprep.mubr.msk.bf16.mxu1 %vm1367_vm0, %v1366_v0  ;;  %s380_s14 = scalar_lea.vmem %s1562_s0, %s1436_s11  ;;  %s385_s17 = scalar_lea.vmem %s1563_s1, %s1436_s11  ;;  %v616_v26 = vld [vmem:[%s393_s20] sm:$0x1]  ;;  %v620_v27 = vshrl.u32 %v619_v25, 7 }
   0xe   : > { %v415_v1 = vld [vmem:[%s385_s17] sm:$0xff]  ;;  %v416_v2 = vld [vmem:[%s385_s17 + $0x8] sm:$0xff]  ;;  %v417_v7 = vld [vmem:[%s385_s17 + $0x10] sm:$0xff]  ;;  %vm617_vm2 = vcmp.gt.f32.partialorder %v616_v26, 0.5  ;;  %s390_s23 = scalar_lea.vmem %s1564_s2, %s1436_s11  ;;  %s1211_s13 = sshll.u32 %s1573_s10, 3 }
   0xf   : > { %v403_v3 = vld [vmem:[%s380_s14] sm:$0xff]  ;;  %v419_v4 = vpack.c.bf16 %v415_v1, %v415_v1  ;;  %v420_v5 = vpack.c.bf16 %v416_v2, %v416_v2  ;;  %v404_v6 = vld [vmem:[%s380_s14 + $0x8] sm:$0xff]  ;;  %v418_v8 = vld [vmem:[%s385_s17 + $0x18] sm:$0xff]  ;;  %v421_v13 = vpack.c.bf16 %v417_v7, %v417_v7  ;;  %v621_v28 = vsub.s32 0, %v620_v27  ;;  %s397_s16 = scalar_lea.vmem %s1566_s4, %s1211_s13  ;;  %s401_s25 = scalar_lea.vmem %s1571_s9, %s1211_s13 }
  0x10   : > { %v407_v11 = vmul.f32 0.35355338, %v403_v3  ;;  %v408_v12 = vmul.f32 0.35355338, %v404_v6  ;;  %v422_v14 = vpack.c.bf16 %v418_v8, %v418_v8  ;;  %v405_v17 = vld [vmem:[%s380_s14 + $0x10] sm:$0xff]  ;;  %v406_v18 = vld [vmem:[%s380_s14 + $0x18] sm:$0xff] }
  0x11   : > { %v436_v9 = vsel %vm431_vm1, %v419_v4, 0  ;;  %v482_v10 = vsel %vm431_vm1, %v420_v5, 0  ;;  %v528_v19 = vsel %vm431_vm1, %v421_v13, 0  ;;  %v409_v21 = vmul.f32 0.35355338, %v405_v17  ;;  %v423_v13 = vld [vmem:[%s390_s23] sm:$0xff] }
  0x12   : > { %1258 = vmatpush3.bf16.xpose.msra.mxu0 %v436_v9  ;;  %1264 = vmatpush3.bf16.xpose.msra.mxu1 %v482_v10  ;;  %v411_v15 = vpack.c.bf16 %v407_v11, %v407_v11  ;;  %v412_v16 = vpack.c.bf16 %v408_v12, %v408_v12  ;;  %v574_v20 = vsel %vm431_vm1, %v422_v14, 0  ;;  %v410_v22 = vmul.f32 0.35355338, %v406_v18  ;;  %v426_v26 = vld [vmem:[%s390_s23 + $0x18] sm:$0xff] }
  0x13   : > { %1269 = vmatprep.subr.bf16.mxu0 %v1366_v0  ;;  %1275 = vmatprep.subr.bf16.mxu1 %v1366_v0  ;;  %v413_v23 = vpack.c.bf16 %v409_v21, %v409_v21  ;;  %v618_v30 = vsel %vm617_vm2, 1, %v1368_v29  ;;  %v427_v14 = vpack.c.bf16 %v423_v13, %v423_v13 }
  0x14   : > { %v414_v24 = vpack.c.bf16 %v410_v22, %v410_v22  ;;  %v622_v31 = vrot.slane %v618_v30, %v621_v28  ;;  %v425_v22 = vld [vmem:[%s390_s23 + $0x10] sm:$0xff]  ;;  %v430_v30 = vpack.c.bf16 %v426_v26, %v426_v26 }
  0x15   : > { %v681_v17 = vsel %vm679_vm4, %v427_v14, 0 }
  0x16   : > { %vm623_vm3 = vcmp.eq.s32.totalorder %v622_v31, 1 }
  0x19   : > { %1260 = vmatmul.mubr.msk.bf16.vlgmr.msra.gmra.mxu0 %vm431_vm1, %v411_v15  ;;  %1266 = vmatmul.mubr.msk.bf16.vlgmr.msra.gmra.mxu1 %vm431_vm1, %v412_v16  ;;  %v424_v15 = vld [vmem:[%s390_s23 + $0x8] sm:$0xff] }
  0x1a   : > { %1270 = vmatpush3.bf16.xpose.msra.mxu0 %v528_v19  ;;  %1276 = vmatpush3.bf16.xpose.msra.mxu1 %v574_v20  ;;  %v428_v16 = vpack.c.bf16 %v424_v15, %v424_v15 }
  0x1b   : > { %1271 = vmatprep.mubr.msk.bf16.mxu0 %vm1367_vm0, %v1366_v0  ;;  %1277 = vmatprep.mubr.msk.bf16.mxu1 %vm1367_vm0, %v1366_v0 }
  0x1c   : > { %1281 = vmatprep.subr.bf16.mxu0 %v1366_v0  ;;  %1287 = vmatprep.subr.bf16.mxu1 %v1366_v0  ;;  %v727_v18 = vsel %vm679_vm4, %v428_v16, 0 }
  0x21   : > { %1272 = vmatmul.mubr.msk.bf16.vlgmr.msra.gmra.mxu0 %vm431_vm1, %v413_v23  ;;  %1278 = vmatmul.mubr.msk.bf16.vlgmr.msra.gmra.mxu1 %vm431_vm1, %v414_v24  ;;  %v429_v24 = vpack.c.bf16 %v425_v22, %v425_v22 }
  0x22   : > { %1283 = vmatprep.mubr.msk.bf16.mxu0 %vm1367_vm0, %v1366_v0  ;;  %1289 = vmatprep.mubr.msk.bf16.mxu1 %vm1367_vm0, %v1366_v0 }
  0x23   : > { %1282 = vmatpush3.bf16.msra.mxu0 %v681_v17  ;;  %1288 = vmatpush3.bf16.msra.mxu1 %v727_v18  ;;  %v773_v29 = vsel %vm679_vm4, %v429_v24, 0 }
  0x24   : > { %1293 = vmatprep.subr.bf16.mxu0 %v1366_v0  ;;  %1299 = vmatprep.subr.bf16.mxu1 %v1366_v0 }
  0xd9   : > { %v472_v32 = vpop.f32.mrf.mxu0  ;;  %v518_v33 = vpop.f32.mrf.mxu1 }
  0xda   : > { %v624_v34 = vsel %vm623_vm3, -1e+09, %v472_v32  ;;  %v625_v35 = vsel %vm623_vm3, -1e+09, %v518_v33 }
  0xdb   : > { %v1261_v36 = vpop.f32.mrf.mxu0  ;;  %v1267_v37 = vpop.f32.mrf.mxu1  ;;  %v628_v38 = vsel %vm431_vm1, %v624_v34, -inf  ;;  %v631_v41 = vsel %vm431_vm1, %v625_v35, -inf }
  0xdc   : > { %629 = vmax.xlane.f32.xlu0 %v628_v38  ;;  %v865_v36 = vld [vmem:[%s1567_s5] sm:$0xf] }
  0xdd   : > { %v475_v39 = vpop.f32.mrf.mxu0  ;;  %v521_v40 = vpop.f32.mrf.mxu1 }
  0xde   : > { %v873_v39 = vsel %vm679_vm4, %v865_v36, 0 }
  0xdf   : > { %v1262_v42 = vpop.f32.mrf.mxu0  ;;  %v1268_v43 = vpop.f32.mrf.mxu1 }
  0xe0   : > { %632 = vmax.xlane.f32.xlu0 %v631_v41  ;;  %v866_v43 = vld [vmem:[%s1567_s5 + $0x4] sm:$0xf] }
  0xe1   : > { %v564_v44 = vpop.f32.mrf.mxu0  ;;  %v610_v45 = vpop.f32.mrf.mxu1 }
  0xe2   : > { %v626_v46 = vsel %vm623_vm3, -1e+09, %v564_v44  ;;  %v627_v47 = vsel %vm623_vm3, -1e+09, %v610_v45  ;;  %v919_v44 = vsel %vm679_vm4, %v866_v43, 0 }
  0xe3   : > { %v1273_v48 = vpop.f32.mrf.mxu0  ;;  %v1279_v49 = vpop.f32.mrf.mxu1  ;;  %v634_v50 = vsel %vm431_vm1, %v626_v46, -inf  ;;  %v637_v53 = vsel %vm431_vm1, %v627_v47, -inf  ;;  %v867_v45 = vld [vmem:[%s1567_s5 + $0x8] sm:$0xf] }
  0xe4   : > { %635 = vmax.xlane.f32.xlu1 %v634_v50  ;;  %v965_v48 = vsel %vm679_vm4, %v867_v45, 0  ;;  %v868_v50 = vld [vmem:[%s1567_s5 + $0xc] sm:$0xf] }
  0xe5   : > { %v567_v51 = vpop.f32.mrf.mxu0  ;;  %v613_v52 = vpop.f32.mrf.mxu1 }
  0xe7   : > { %v1274_v54 = vpop.f32.mrf.mxu0  ;;  %v1280_v55 = vpop.f32.mrf.mxu1 }
  0xe8   : > { %638 = vmax.xlane.f32.xlu1 %v637_v53  ;;  %v1011_v54 = vsel %vm679_vm4, %v868_v50, 0 }
 0x165   : > { %v630_v56 = vpop.xlane.xlu0 %629 }
 0x166   : > { %v640_v57 = vsub.f32 %v624_v34, %v630_v56  ;;  %v819_v34 = vsel %vm679_vm4, %v430_v30, 0 }
 0x168   : > { %v644_v58 = vmul.f32 1.442695, %v640_v57 }
 0x169   : > { %v633_v59 = vpop.xlane.xlu0 %632 }
 0x16a   : > { %1340 = vpow2.f32 %v644_v58  ;;  %v641_v60 = vsub.f32 %v625_v35, %v633_v59 }
 0x16c   : > { %v646_v61 = vmul.f32 1.442695, %v641_v60 }
 0x16d   : > { %v636_v62 = vpop.xlane.xlu1 %635 }
 0x16e   : > { %1342 = vpow2.f32 %v646_v61  ;;  %v642_v63 = vsub.f32 %v626_v46, %v636_v62 }
 0x170   : > { %v648_v1 = vmul.f32 1.442695, %v642_v63 }
 0x171   : > { %v639_v2 = vpop.xlane.xlu1 %638 }
 0x172   : > { %1344 = vpow2.f32 %v648_v1  ;;  %v643_v3 = vsub.f32 %v627_v47, %v639_v2 }
 0x174   : > { %v650_v4 = vmul.f32 1.442695, %v643_v3 }
 0x176   : > { %1346 = vpow2.f32 %v650_v4 }
 0x177   : > { %v1341_v5 = vpop.eup %1340 }
 0x178   : > { %v652_v6 = vsel %vm431_vm1, %v1341_v5, 0.0 }
 0x179   : > { %653 = vadd.xlane.f32.xlu0 %v652_v6 }
 0x17b   : > { %v1343_v7 = vpop.eup %1342 }
 0x17c   : > { %v655_v8 = vsel %vm431_vm1, %v1343_v7, 0.0 }
 0x17d   : > { %656 = vadd.xlane.f32.xlu1 %v655_v8 }
 0x17f   : > { %v1345_v9 = vpop.eup %1344 }
 0x180   : > { %v658_v10 = vsel %vm431_vm1, %v1345_v9, 0.0 }
 0x181   : > { %659 = vadd.xlane.f32.xlu0 %v658_v10 }
 0x183   : > { %v1347_v11 = vpop.eup %1346 }
 0x184   : > { %v661_v12 = vsel %vm431_vm1, %v1347_v11, 0.0 }
 0x185   : > { %662 = vadd.xlane.f32.xlu1 %v661_v12 }
 0x202   : > { %v654_v19 = vpop.xlane.xlu0 %653 }
 0x203   : > { %1348 = vrcp.f32 %v654_v19 }
 0x206   : > { %v657_v20 = vpop.xlane.xlu1 %656 }
 0x207   : > { %1350 = vrcp.f32 %v657_v20 }
 0x20a   : > { %v660_v21 = vpop.xlane.xlu0 %659 }
 0x20b   : > { %1352 = vrcp.f32 %v660_v21 }
 0x20e   : > { %v663_v23 = vpop.xlane.xlu1 %662 }
 0x20f   : > { %1354 = vrcp.f32 %v663_v23  ;;  %v1225_v23 = vld [vmem:[%s1568_s6] ss:$0 sm:$0xff] }
 0x210   : > { %v1349_v25 = vpop.eup %1348 }
 0x211   : > { %v668_v27 = vmul.f32 %v1349_v25, %v1341_v5 }
 0x213   : > { %v672_v28 = vpack.c.bf16 %v668_v27, %v668_v27  ;;  %v1069_v27 = vld [vmem:[%s397_s16] sm:$0xff] }
 0x214   : > { %v1351_v31 = vpop.eup %1350 }
 0x215   : > { %1284 = vmatmul.mubr.msk.bf16.vlgmr.msra.gmra.mxu0 %vm431_vm1, %v672_v28  ;;  %v669_v32 = vmul.f32 %v1351_v31, %v1343_v7 }
 0x216   : > { %1294 = vmatpush3.bf16.msra.mxu0 %v773_v29  ;;  %1295 = vmatprep.mubr.msk.bf16.mxu0 %vm1367_vm0, %v1366_v0 }
 0x217   : > { %v673_v33 = vpack.c.bf16 %v669_v32, %v669_v32  ;;  %1305 = vmatprep.subr.bf16.mxu0 %v1366_v0 }
 0x218   : > { %v1353_v35 = vpop.eup %1352 }
 0x219   : > { %1290 = vmatmul.mubr.msk.bf16.vlgmr.msra.gmra.mxu1 %vm431_vm1, %v673_v33  ;;  %v670_v37 = vmul.f32 %v1353_v35, %v1345_v9 }
 0x21a   : > { %1300 = vmatpush3.bf16.msra.mxu1 %v819_v34  ;;  %1301 = vmatprep.mubr.msk.bf16.mxu1 %vm1367_vm0, %v1366_v0 }
 0x21b   : > { %v674_v38 = vpack.c.bf16 %v670_v37, %v670_v37  ;;  %1311 = vmatprep.subr.bf16.mxu1 %v1366_v0 }
 0x21c   : > { %v1355_v40 = vpop.eup %1354 }
 0x21d   : > { %1296 = vmatmul.mubr.msk.bf16.vlgmr.msra.gmra.mxu0 %vm431_vm1, %v674_v38  ;;  %v671_v41 = vmul.f32 %v1355_v40, %v1347_v11 }
 0x21e   : > { %1306 = vmatpush3.bf16.msra.mxu0 %v873_v39  ;;  %1307 = vmatprep.mubr.msk.bf16.mxu0 %vm1367_vm0, %v1366_v0 }
 0x21f   : > { %v675_v42 = vpack.c.bf16 %v671_v41, %v671_v41  ;;  %1317 = vmatprep.subr.bf16.mxu0 %v1366_v0 }
 0x221   : > { %1302 = vmatmul.mubr.msk.bf16.vlgmr.msra.gmra.mxu1 %vm431_vm1, %v675_v42  ;;  %v1226_v42 = vld [vmem:[%s1569_s7] ss:$0 sm:$0xff] }
 0x222   : > { %1313 = vmatprep.mubr.msk.bf16.mxu1 %vm1367_vm0, %v1366_v0  ;;  %1312 = vmatpush3.bf16.msra.mxu1 %v919_v44  ;;  %v1227_v44 = vld [vmem:[%s1570_s8] ss:$0 sm:$0xff] }
 0x223   : > { %1323 = vmatprep.subr.bf16.mxu1 %v1366_v0 }
 0x2d5   : > { %v717_v46 = vpop.f32.mrf.mxu0 }
 0x2d6   : > { %v861_v47 = vpack.c.bf16 %v717_v46, %v717_v46 }
 0x2d7   : > { %v1285_v49 = vpop.f32.mrf.mxu0 }
 0x2d8   : > { %1308 = vmatmul.mubr.msk.bf16.vlgmr.msra.gmra.mxu0 %vm431_vm1, %v861_v47 }
 0x2d9   : > { %v720_v51 = vpop.f32.mrf.mxu0  ;;  %v763_v52 = vpop.f32.mrf.mxu1  ;;  %1318 = vmatpush3.bf16.msra.mxu0 %v965_v48  ;;  %1319 = vmatprep.mubr.msk.bf16.mxu0 %vm1367_vm0, %v1366_v0 }
 0x2da   : > { %v862_v53 = vpack.c.bf16 %v763_v52, %v763_v52 }
 0x2db   : > { %v1286_v55 = vpop.f32.mrf.mxu0  ;;  %v1291_v56 = vpop.f32.mrf.mxu1 }
 0x2dc   : > { %1314 = vmatmul.mubr.msk.bf16.vlgmr.msra.gmra.mxu1 %vm431_vm1, %v862_v53 }
 0x2dd   : > { %v766_v57 = vpop.f32.mrf.mxu1  ;;  %v809_v58 = vpop.f32.mrf.mxu0  ;;  %1324 = vmatpush3.bf16.msra.mxu1 %v1011_v54  ;;  %1325 = vmatprep.mubr.msk.bf16.mxu1 %vm1367_vm0, %v1366_v0 }
 0x2de   : > { %v863_v59 = vpack.c.bf16 %v809_v58, %v809_v58 }
 0x2df   : > { %v1292_v60 = vpop.f32.mrf.mxu1  ;;  %v1297_v61 = vpop.f32.mrf.mxu0 }
 0x2e0   : > { %1320 = vmatmul.mubr.msk.bf16.vlgmr.msra.gmra.mxu0 %vm431_vm1, %v863_v59 }
 0x2e1   : > { %v812_v62 = vpop.f32.mrf.mxu0  ;;  %v855_v63 = vpop.f32.mrf.mxu1 }
 0x2e2   : > { %v864_v1 = vpack.c.bf16 %v855_v63, %v855_v63 }
 0x2e3   : > { %v1298_v2 = vpop.f32.mrf.mxu0  ;;  %v1303_v3 = vpop.f32.mrf.mxu1 }
 0x2e4   : > { %1326 = vmatmul.mubr.msk.bf16.vlgmr.msra.gmra.mxu1 %vm431_vm1, %v864_v1 }
 0x2e5   : > { %v858_v4 = vpop.f32.mrf.mxu1 }
 0x2e7   : > { %v1304_v5 = vpop.f32.mrf.mxu1 }
 0x398   : > { %v909_v6 = vpop.f32.mrf.mxu0 }
 0x399   : > { %v1054_v14 = vsel %vm1053_vm5, %v909_v6, 0.0 }
 0x39a   : > { %v1309_v7 = vpop.f32.mrf.mxu0 }
 0x39c   : > { %v912_v8 = vpop.f32.mrf.mxu0  ;;  %v955_v9 = vpop.f32.mrf.mxu1 }
 0x39d   : > { %v1055_v11 = vsel %vm1053_vm5, %v955_v9, 0.0 }
 0x39e   : > { %v1310_v0 = vpop.f32.mrf.mxu0  ;;  %v1315_v10 = vpop.f32.mrf.mxu1  ;;  %v1056_v16 = vadd.f32 %v1055_v11, %v1054_v14 }
 0x3a0   : > { %v958_v12 = vpop.f32.mrf.mxu1  ;;  %v1001_v13 = vpop.f32.mrf.mxu0 }
 0x3a1   : > { %v1057_v15 = vsel %vm1053_vm5, %v1001_v13, 0.0 }
 0x3a2   : > { %v1316_v17 = vpop.f32.mrf.mxu1  ;;  %v1321_v18 = vpop.f32.mrf.mxu0  ;;  %v1058_v19 = vadd.f32 %v1057_v15, %v1056_v16 }
 0x3a4   : > { %v1004_v20 = vpop.f32.mrf.mxu0  ;;  %v1047_v21 = vpop.f32.mrf.mxu1 }
 0x3a5   : > { %v1059_v22 = vsel %vm1053_vm5, %v1047_v21, 0.0 }
 0x3a6   : > { %v1060_v24 = vadd.f32 %v1059_v22, %v1058_v19  ;;  %v1322_v25 = vpop.f32.mrf.mxu0  ;;  %v1327_v26 = vpop.f32.mrf.mxu1 }
 0x3a8   : > { %v1068_v28 = vadd.f32 %v1225_v23, %v1060_v24  ;;  %v1050_v29 = vpop.f32.mrf.mxu1 }
 0x3aa   : > { %v1328_v30 = vpop.f32.mrf.mxu1  ;;  %v1070_v31 = vadd.f32 %v1069_v27, %v1068_v28 }
 0x3ac   : > { %v1073_v32 = vsel %vm1053_vm5, %v1070_v31, 0.0 }
 0x3ad   : > { %1074 = vadd.xlane.f32.xlu0 %v1073_v32 }
 0x436   : > { %v1075_v33 = vpop.xlane.xlu0 %1074 }
 0x437   : > { %v1077_v34 = vmul.f32 0.03125, %v1075_v33 }
 0x439   : > { %v1078_v35 = vsub.f32 %v1070_v31, %v1077_v34 }
 0x43b   : > { %v1079_v36 = vmul.f32 %v1078_v35, %v1078_v35 }
 0x43d   : > { %v1080_v37 = vsel %vm1053_vm5, %v1079_v36, 0.0 }
 0x43e   : > { %1081 = vadd.xlane.f32.xlu1 %v1080_v37 }
 0x4c7   : > { %v1082_v38 = vpop.xlane.xlu1 %1081 }
 0x4c8   : > { %v1083_v39 = vmul.f32 0.03125, %v1082_v38 }
 0x4ca   : > { %v1084_v40 = vadd.f32 1e-06, %v1083_v39 }
 0x4cc   : > { %1356 = vrsqrt.f32 %v1084_v40 }
 0x4d9   : > { %v1357_v41 = vpop.eup %1356 }
 0x4da   : > { %v1086_v43 = vmul.f32 %v1357_v41, %v1078_v35 }
 0x4dc   : > { %v1093_v45 = vmul.f32 %v1226_v42, %v1086_v43 }
 0x4de   : > { %v1100_v46 = vadd.f32 %v1227_v44, %v1093_v45 }
 0x4e0   : > { %1101 = vst.msk [vmem:[%s401_s25] sm:$0xff] %vm1053_vm5, %v1100_v46 }
 0x4e1 PF: > { %s19_s30 = sadd.s32 1, %s1364_s30  }
 0x4e2   : > { %p16_p4 = scmp.ge.s32.totalorder %s19_s30, 4  }
 0x4e4   :  { %18 = sbr.rel (!%p16_p4) target bundleno = 1 (0x1), region = 98 }

// kernel: forward.47
= control target key start
LH: loop header
LB: loop body
LE: loop exit
PB: predicated region body
PF: predicated region fallthrough
CT: control target
= control target key end

     0   :  { %vm19_vm0 = vcmask 517120   ;;  %v123_v0 = vmov 0.0   ;;  %vm124_vm1 = vmmov 0   ;;  %vm40_vm2 = vcmask 261120   ;;  %s163_s1 = inlined_call_operand.vmem [shape: bf16[32,64], index: 1, kind: input, shape index: {}]   ;;  %s164_s0 = inlined_call_operand.vmem [shape: f32[2,32], index: 0, kind: input, shape index: {}]   ;;  %s165_s2 = inlined_call_operand.vmem [shape: f32[1,64], index: 2, kind: input, shape index: {}]   ;;  %s166_s3 = inlined_call_operand.vmem [shape: f32[2,64], index: 3, kind: output, shape index: {}]  }
   0x1   :  { %20 = vst.msk [vmem:[#allocation2] sm:$0x3] %vm19_vm0, %v123_v0  ;;  %111 = vmatprep.subr.bf16.mxu0 %v123_v0  ;;  %v121_v1 = vld [vmem:[%s163_s1 + $0x8] sm:$0xff]   ;;  %115 = vmatprep.mubr.msk.bf16.mxu0 %vm124_vm1, %v123_v0  ;;  %v122_v2 = vld [vmem:[%s163_s1] sm:$0xff]  }
   0x2   :  { %112 = vmatpush3.bf16.msra.mxu0 %v121_v1  ;;  %v22_v3 = vld [vmem:[%s164_s0] sm:$0x3] }
   0x3   :  { %113 = vmatprep.subr.bf16.mxu0 %v123_v0  ;;  %v23_v4 = vpack.c.bf16 %v22_v3, %v22_v3  ;;  %v107_v11 = vld [vmem:[%s165_s2] ss:$0 sm:$0xff] }
   0x6   :  { %114 = vmatpush3.bf16.msra.mxu0 %v122_v2 }
   0x8   :  { %v21_v5 = vld [vmem:[#allocation2] sm:$0x3] }
   0x9   :  { %116 = vmatmul.mubr.msk.bf16.vlgmr.msra.gmra.mxu0 %vm40_vm2, %v23_v4 }
  0xc9   :  { %v78_v6 = vpop.f32.mrf.mxu0 }
  0xca   :  { %v84_v7 = vadd.f32 %v78_v6, %v21_v5 }
  0xcb   :  { %v117_v8 = vpop.f32.mrf.mxu0 }
  0xcc   :  { %86 = vst.msk [vmem:[#allocation2] sm:$0x3] %vm19_vm0, %v84_v7 }
  0xcd   :  { %v81_v9 = vpop.f32.mrf.mxu0 }
  0xcf   :  { %v118_v10 = vpop.f32.mrf.mxu0 }
  0xd3   :  { %v90_v12 = vld [vmem:[#allocation2] sm:$0x3] }
  0xd4   :  { %v98_v13 = vadd.f32 %v107_v11, %v90_v12 }
  0xd6   :  { %99 = vst.msk [vmem:[%s166_s3] sm:$0x3] %vm19_vm0, %v98_v13 }

// kernel: forward.46
= control target key start
LH: loop header
LB: loop body
LE: loop exit
PB: predicated region body
PF: predicated region fallthrough
CT: control target
= control target key end

     0   :  { %s705_s23 = smov 0   ;;  %s748_s0 = inlined_call_operand.vmem [shape: f32[2,8,32], index: 0, kind: input, shape index: {}]   ;;  %s749_s1 = inlined_call_operand.vmem [shape: f32[2,8,1], index: 1, kind: input, shape index: {}]   ;;  %s750_s2 = inlined_call_operand.vmem [shape: bf16[32,32], index: 2, kind: input, shape index: {}]   ;;  %s751_s3 = inlined_call_operand.vmem [shape: f32[1,32], index: 3, kind: input, shape index: {}]   ;;  %s752_s4 = inlined_call_operand.vmem [shape: bf16[32,1], index: 4, kind: input, shape index: {}]   ;;  %s753_s5 = inlined_call_operand.<no memory space> [shape: f32[1,1], index: 5, kind: input, shape index: {}]   ;;  %s754_s6 = inlined_call_operand.vmem [shape: f32[2,1,32], index: 6, kind: output, shape index: {}]  }
   0x1   :  { %v11_v0 = vstv %s753_s5 }
   0x2   :  { %12 = vst [vmem:[#allocation2] sm:$0x1] %v11_v0 }
   0x3 LB: > { %s592_s24 = sadd.s32 4294967295, %s663_s23   ;;  %p596_p0 = scmp.ge.s32.totalorder %s663_s23, 1  ;;  %s663_s23 = sphi %s705_s23, %s18_s23  }
   0x4   : > { %p222_p1 = scmp.lt.s32.totalorder %s663_s23, 3 }
   0x6   : > { %p223_p2 = pnand %p596_p0, %p222_p1 }
   0x7   : > { %p253_p3 = scmp.lt.s32.totalorder (!%p223_p2), %s592_s24, 1 }
   0x8   : > { %226 = sbr.rel (%p223_p2) target bundleno = 797 (0x31d), region = 44 }
   0xd   : > { %v649_v1 = vld [vmem:[%s750_s2 + $0x8] sm:$0xff]   ;;  %v665_v2 = vmov 0.0   ;;  %v650_v3 = vld [vmem:[%s750_s2] sm:$0xff]   ;;  %vm666_vm0 = vmmov 0   ;;  %s756_s24 = smov (!%p253_p3, %s592_s24), 1  ;;  %vm290_vm1 = vcmask 261120  }
   0xe   : > { %618 = vmatprep.subr.bf16.mxu0 %v665_v2  ;;  %626 = vmatprep.subr.bf16.mxu1 %v665_v2  ;;  %s597_s28 = sshll.u32 %s756_s24, 3  ;;  %v651_v6 = vld [vmem:[%s752_s4 + $0x8] sm:$0xff]   ;;  %v652_v7 = vld [vmem:[%s752_s4] sm:$0xff]   ;;  %vm405_vm3 = vcmask 7168   ;;  %vm457_vm4 = vcmask 64512   ;;  %s263_s19 = scalar_lea.vmem %s754_s6, %s756_s24  ;;  %vm531_vm5 = vcmask 253952  }
   0xf   : > { %619 = vmatpush3.bf16.msra.mxu0 %v649_v1  ;;  %622 = vmatprep.mubr.msk.bf16.mxu0 %vm666_vm0, %v665_v2  ;;  %s256_s7 = scalar_lea.vmem %s748_s0, %s597_s28  ;;  %v599_v8 = vld [vmem:[%s751_s3] ss:$0 sm:$0xff]  ;;  %s260_s16 = scalar_lea.vmem %s749_s1, %s597_s28 }
  0x10   : > { %620 = vmatprep.subr.bf16.mxu0 %v665_v2  ;;  %630 = vmatprep.mubr.msk.bf16.mxu1 %vm666_vm0, %v665_v2  ;;  %v265_v4 = vld [vmem:[%s256_s7] sm:$0xff] }
  0x11   : > { %v266_v5 = vpack.c.bf16 %v265_v4, %v265_v4  ;;  %627 = vmatpush3.bf16.msra.mxu1 %v651_v6  ;;  %v402_v16 = vld [vmem:[%s260_s16] sm:$0xff] }
  0x12   : > { %628 = vmatprep.subr.bf16.mxu1 %v665_v2  ;;  %v603_v17 = vld [vmem:[#allocation2] ss:$0 sm:$0xff]  ;;  %vm403_vm2 = vcmp.gt.f32.partialorder %v402_v16, 0.5 }
  0x13   : > { %621 = vmatpush3.bf16.msra.mxu0 %v650_v3 }
  0x14   : > { %634 = vmatprep.subr.mxu0 %v665_v2 }
  0x15   : > { %629 = vmatpush3.bf16.msra.mxu1 %v652_v7 }
  0x16   : > { %623 = vmatmul.mubr.msk.bf16.vlgmr.msra.gmra.mxu0 %vm290_vm1, %v266_v5 }
  0x17   : > { %635 = vmatpush3.msra.mxu0 %v265_v4  ;;  %636 = vmatprep.mubr.msk.f32.mxu0 %vm666_vm0, %v665_v2 }
  0xd6   : > { %v328_v9 = vpop.f32.mrf.mxu0 }
  0xd7   : > { %v329_v10 = vadd.f32 %v599_v8, %v328_v9 }
  0xd8   : > { %v624_v11 = vpop.f32.mrf.mxu0 }
  0xd9   : > { %v334_v12 = vmax.f32 %v329_v10, 0.0 }
  0xda   : > { %v331_v13 = vpop.f32.mrf.mxu0 }
  0xdb   : > { %v335_v14 = vpack.c.bf16 %v334_v12, %v334_v12 }
  0xdc   : > { %v625_v15 = vpop.f32.mrf.mxu0 }
  0xdd   : > { %631 = vmatmul.mubr.msk.bf16.vlgmr.msra.gmra.mxu1 %vm290_vm1, %v335_v14 }
 0x19d   : > { %v396_v18 = vpop.f32.mrf.mxu1 }
 0x19e   : > { %v397_v19 = vadd.f32 %v603_v17, %v396_v18 }
 0x19f   : > { %v632_v20 = vpop.f32.mrf.mxu1 }
 0x1a0   : > { %v404_v21 = vsel %vm403_vm2, -1e+09, %v397_v19 }
 0x1a1   : > { %v406_v22 = vsel %vm405_vm3, %v404_v21, -inf  ;;  %v399_v23 = vpop.f32.mrf.mxu1 }
 0x1a2   : > { %v407_v24 = vrot.slane %v406_v22, 4 }
 0x1a3   : > { %v633_v25 = vpop.f32.mrf.mxu1 }
 0x1a4   : > { %v408_v26 = vmax.f32 %v406_v22, %v407_v24 }
 0x1a6   : > { %v409_v27 = vrot.slane %v408_v26, 2 }
 0x1a8   : > { %v410_v28 = vmax.f32 %v408_v26, %v409_v27 }
 0x1aa   : > { %v411_v29 = vrot.slane %v410_v28, 1 }
 0x1ac   : > { %v412_v30 = vmax.f32 %v410_v28, %v411_v29 }
 0x1ae   : > { %v413_v31 = vsub.f32 %v404_v21, %v412_v30 }
 0x1b0   : > { %v414_v32 = vmul.f32 1.442695, %v413_v31 }
 0x1b2   : > { %653 = vpow2.f32 %v414_v32 }
 0x1bf   : > { %v654_v33 = vpop.eup %653 }
 0x1c0   : > { %v416_v34 = vsel %vm405_vm3, %v654_v33, 0.0 }
 0x1c1   : > { %v417_v35 = vrot.slane %v416_v34, 4 }
 0x1c3   : > { %v418_v36 = vadd.f32 %v417_v35, %v416_v34 }
 0x1c5   : > { %v419_v37 = vrot.slane %v418_v36, 2 }
 0x1c7   : > { %v420_v38 = vadd.f32 %v419_v37, %v418_v36 }
 0x1c9   : > { %v421_v39 = vrot.slane %v420_v38, 1 }
 0x1cb   : > { %v422_v40 = vadd.f32 %v421_v39, %v420_v38 }
 0x1cd   : > { %655 = vrcp.f32 %v422_v40 }
 0x1da   : > { %v656_v41 = vpop.eup %655 }
 0x1db   : > { %v424_v42 = vmul.f32 %v656_v41, %v654_v33 }
 0x1dd   : > { %425 = vxpose.xlu0.b32.start.end [1/1] (short) (narrow) %v424_v42, 8 }
 0x259   : > { %v441_v43 = vpop.trf.xlu0 }
 0x25a   : > { %637 = vmatmul.mubr.msk.f32.vlgmr.msra.gmra.mxu0 %vm457_vm4, %v441_v43 }
 0x31a   : > { %v527_v44 = vpop.f32.mrf.mxu0 }
 0x31b   : > { %532 = vst.msk [vmem:[%s263_s19] sm:$0x1] %vm531_vm5, %v527_v44 }
 0x31c   : > { %v638_v45 = vpop.f32.mrf.mxu0 }
 0x31d PF: > { %s18_s23 = sadd.s32 1, %s663_s23  }
 0x31e   : > { %p15_p4 = scmp.ge.s32.totalorder %s18_s23, 4  }
 0x320   :  { %17 = sbr.rel (!%p15_p4) target bundleno = 3 (0x3), region = 77 }

// kernel: forward.27
= control target key start
LH: loop header
LB: loop body
LE: loop exit
PB: predicated region body
PF: predicated region fallthrough
CT: control target
= control target key end

     0   :  { %vm77_vm0 = vcmask 1043456   ;;  %vm19_vm1 = vcmask 261120   ;;  %v201_v1 = vmov 0.0   ;;  %vm70_vm2 = vcmask 588800   ;;  %s276_s1 = inlined_call_operand.vmem [shape: bf16[72,32], index: 1, kind: input, shape index: {}]   ;;  %s277_s0 = inlined_call_operand.vmem [shape: f32[32,72], index: 0, kind: input, shape index: {}]   ;;  %s278_s2 = inlined_call_operand.vmem [shape: f32[1,32], index: 2, kind: input, shape index: {}]   ;;  %s279_s3 = inlined_call_operand.vmem [shape: f32[32,32], index: 3, kind: output, shape index: {}]  }
   0x1   :  { %v196_v0 = vld [vmem:[%s276_s1 + $0x20] ss:$0 sps:$4 sm:$0xff]   ;;  %22 = vst.msk [vmem:[#allocation2 + $0x10] sm:$0xff] %vm19_vm1, %v201_v1  ;;  %20 = vst.msk [vmem:[#allocation2] sm:$0xff] %vm19_vm1, %v201_v1  ;;  %v197_v2 = vld [vmem:[%s276_s1 + $0x18] sm:$0xff]  }
   0x2   :  { %21 = vst.msk [vmem:[#allocation2 + $0x8] sm:$0xff] %vm19_vm1, %v201_v1  ;;  %23 = vst.msk [vmem:[#allocation2 + $0x18] sm:$0xff] %vm19_vm1, %v201_v1  ;;  %194 = vmatprep.subr.msk.bf16.mxu0 %vm77_vm0, %v196_v0  ;;  %v79_v3 = vsel %vm77_vm0, %v196_v0, 0  ;;  %v198_v4 = vld [vmem:[%s276_s1 + $0x10] sm:$0xff]   ;;  %v28_v5 = vld [vmem:[%s277_s0] sm:$0xff] }
   0x3   :  { %181 = vmatpush3.bf16.msra.mxu0 %v79_v3  ;;  %v29_v6 = vld [vmem:[%s277_s0 + $0x8] sm:$0xff]  ;;  %v200_v9 = vld [vmem:[%s276_s1] sm:$0xff]   ;;  %v30_v10 = vld [vmem:[%s277_s0 + $0x10] sm:$0xff] }
   0x4   :  { %182 = vmatprep.subr.bf16.mxu0 %v197_v2  ;;  %v32_v7 = vpack.c.bf16 %v29_v6, %v28_v5  ;;  %v199_v8 = vld [vmem:[%s276_s1 + $0x8] sm:$0xff]   ;;  %v31_v11 = vld [vmem:[%s277_s0 + $0x18] sm:$0xff]  ;;  %v172_v25 = vld [vmem:[%s278_s2] ss:$0 sm:$0xff] }
   0x5   :  { %v33_v12 = vpack.c.bf16 %v31_v11, %v30_v10 }
   0x6   :  { %190 = vmatprep.mubr.msk.bf16.mxu0 %vm70_vm2, %v32_v7 }
   0x7   :  { %183 = vmatpush3.bf16.msra.mxu0 %v197_v2 }
   0x8   :  { %184 = vmatprep.subr.bf16.mxu0 %v198_v4  ;;  %v26_v13 = vld [vmem:[#allocation2 + $0x10] sm:$0xff]  ;;  %v24_v15 = vld [vmem:[#allocation2] sm:$0xff] }
   0x9   :  { %v27_v18 = vld [vmem:[#allocation2 + $0x18] sm:$0xff]  ;;  %v25_v21 = vld [vmem:[#allocation2 + $0x8] sm:$0xff] }
   0xb   :  { %185 = vmatpush3.bf16.msra.mxu0 %v198_v4 }
   0xc   :  { %186 = vmatprep.subr.bf16.mxu0 %v199_v8 }
   0xf   :  { %187 = vmatpush3.bf16.msra.mxu0 %v199_v8 }
  0x10   :  { %188 = vmatprep.subr.bf16.mxu0 %v200_v9 }
  0x13   :  { %189 = vmatpush3.bf16.msra.mxu0 %v200_v9 }
  0x16   :  { %191 = vmatmul.mubr.msk.bf16.vlgmr.msra.gmra.mxu0 %vm70_vm2, %v33_v12 }
  0xd6   :  { %v192_v14 = vpop.f32.mrf.mxu0 }
  0xd7   :  { %v132_v16 = vadd.f32 %v192_v14, %v26_v13 }
  0xd8   :  { %v115_v17 = vpop.f32.mrf.mxu0 }
  0xd9   :  { %137 = vst.msk [vmem:[#allocation2 + $0x10] sm:$0xff] %vm19_vm1, %v132_v16  ;;  %v130_v19 = vadd.f32 %v115_v17, %v24_v15 }
  0xda   :  { %v193_v20 = vpop.f32.mrf.mxu0 }
  0xdb   :  { %135 = vst.msk [vmem:[#allocation2] sm:$0xff] %vm19_vm1, %v130_v19  ;;  %v133_v22 = vadd.f32 %v193_v20, %v27_v18 }
  0xdc   :  { %v118_v23 = vpop.f32.mrf.mxu0 }
  0xdd   :  { %138 = vst.msk [vmem:[#allocation2 + $0x18] sm:$0xff] %vm19_vm1, %v133_v22  ;;  %v131_v24 = vadd.f32 %v118_v23, %v25_v21 }
  0xdf   :  { %136 = vst.msk [vmem:[#allocation2 + $0x8] sm:$0xff] %vm19_vm1, %v131_v24 }
  0xe0   :  { %v144_v26 = vld [vmem:[#allocation2 + $0x10] sm:$0xff] }
  0xe1   :  { %v155_v27 = vadd.f32 %v172_v25, %v144_v26 }
  0xe2   :  { %v142_v28 = vld [vmem:[#allocation2] sm:$0xff] }
  0xe3   :  { %159 = vst.msk [vmem:[%s279_s3 + $0x10] sm:$0xff] %vm19_vm1, %v155_v27  ;;  %v153_v29 = vadd.f32 %v172_v25, %v142_v28 }
  0xe4   :  { %v145_v30 = vld [vmem:[#allocation2 + $0x18] sm:$0xff] }
  0xe5   :  { %157 = vst.msk [vmem:[%s279_s3] sm:$0xff] %vm19_vm1, %v153_v29  ;;  %v156_v31 = vadd.f32 %v172_v25, %v145_v30 }
  0xe6   :  { %v143_v32 = vld [vmem:[#allocation2 + $0x8] sm:$0xff] }
  0xe7   :  { %160 = vst.msk [vmem:[%s279_s3 + $0x18] sm:$0xff] %vm19_vm1, %v156_v31  ;;  %v154_v33 = vadd.f32 %v172_v25, %v143_v32 }
  0xe9   :  { %158 = vst.msk [vmem:[%s279_s3 + $0x8] sm:$0xff] %vm19_vm1, %v154_v33 }

// kernel: forward.34
= control target key start
LH: loop header
LB: loop body
LE: loop exit
PB: predicated region body
PF: predicated region fallthrough
CT: control target
= control target key end

     0   :  { %vm19_vm0 = vcmask 785408   ;;  %v161_v1 = vmov 0.0   ;;  %vm50_vm1 = vcmask 261120   ;;  %s227_s1 = inlined_call_operand.vmem [shape: bf16[32,96], index: 1, kind: input, shape index: {}]   ;;  %s228_s0 = inlined_call_operand.vmem [shape: f32[32,32], index: 0, kind: input, shape index: {}]   ;;  %s229_s2 = inlined_call_operand.vmem [shape: f32[1,96], index: 2, kind: input, shape index: {}]   ;;  %s230_s3 = inlined_call_operand.vmem [shape: f32[32,96], index: 3, kind: output, shape index: {}]  }
   0x1   :  { %v159_v0 = vld [vmem:[%s227_s1 + $0x8] sm:$0xff]   ;;  %22 = vst.msk [vmem:[#allocation2 + $0x10] sm:$0xff] %vm19_vm0, %v161_v1  ;;  %20 = vst.msk [vmem:[#allocation2] sm:$0xff] %vm19_vm0, %v161_v1  ;;  %v160_v2 = vld [vmem:[%s227_s1] sm:$0xff]  }
   0x2   :  { %21 = vst.msk [vmem:[#allocation2 + $0x8] sm:$0xff] %vm19_vm0, %v161_v1  ;;  %23 = vst.msk [vmem:[#allocation2 + $0x18] sm:$0xff] %vm19_vm0, %v161_v1  ;;  %150 = vmatprep.subr.bf16.mxu0 %v159_v0  ;;  %v28_v3 = vld [vmem:[%s228_s0] sm:$0xff]  ;;  %v29_v4 = vld [vmem:[%s228_s0 + $0x8] sm:$0xff] }
   0x3   :  { %151 = vmatpush3.bf16.msra.mxu0 %v159_v0  ;;  %v32_v5 = vpack.c.bf16 %v29_v4, %v28_v3  ;;  %v30_v6 = vld [vmem:[%s228_s0 + $0x10] sm:$0xff]  ;;  %v31_v7 = vld [vmem:[%s228_s0 + $0x18] sm:$0xff]  ;;  %v145_v21 = vld [vmem:[%s229_s2] ss:$0 sm:$0xff] }
   0x4   :  { %152 = vmatprep.subr.bf16.mxu0 %v160_v2  ;;  %v33_v8 = vpack.c.bf16 %v31_v7, %v30_v6 }
   0x5   :  { %154 = vmatprep.mubr.msk.bf16.mxu0 %vm50_vm1, %v32_v5 }
   0x7   :  { %153 = vmatpush3.bf16.msra.mxu0 %v160_v2 }
   0x8   :  { %v26_v9 = vld [vmem:[#allocation2 + $0x10] sm:$0xff]  ;;  %v24_v11 = vld [vmem:[#allocation2] sm:$0xff] }
   0x9   :  { %v27_v14 = vld [vmem:[#allocation2 + $0x18] sm:$0xff]  ;;  %v25_v17 = vld [vmem:[#allocation2 + $0x8] sm:$0xff] }
   0xa   :  { %155 = vmatmul.mubr.msk.bf16.vlgmr.msra.gmra.mxu0 %vm50_vm1, %v33_v8 }
  0xca   :  { %v156_v10 = vpop.f32.mrf.mxu0 }
  0xcb   :  { %v108_v12 = vadd.f32 %v156_v10, %v26_v9 }
  0xcc   :  { %v91_v13 = vpop.f32.mrf.mxu0 }
  0xcd   :  { %113 = vst.msk [vmem:[#allocation2 + $0x10] sm:$0xff] %vm19_vm0, %v108_v12  ;;  %v106_v15 = vadd.f32 %v91_v13, %v24_v11 }
  0xce   :  { %v157_v16 = vpop.f32.mrf.mxu0 }
  0xcf   :  { %111 = vst.msk [vmem:[#allocation2] sm:$0xff] %vm19_vm0, %v106_v15  ;;  %v109_v18 = vadd.f32 %v157_v16, %v27_v14 }
  0xd0   :  { %v94_v19 = vpop.f32.mrf.mxu0 }
  0xd1   :  { %114 = vst.msk [vmem:[#allocation2 + $0x18] sm:$0xff] %vm19_vm0, %v109_v18  ;;  %v107_v20 = vadd.f32 %v94_v19, %v25_v17 }
  0xd3   :  { %112 = vst.msk [vmem:[#allocation2 + $0x8] sm:$0xff] %vm19_vm0, %v107_v20 }
  0xd4   :  { %v120_v22 = vld [vmem:[#allocation2 + $0x10] sm:$0xff] }
  0xd5   :  { %v131_v23 = vadd.f32 %v145_v21, %v120_v22 }
  0xd6   :  { %v118_v24 = vld [vmem:[#allocation2] sm:$0xff] }
  0xd7   :  { %135 = vst.msk [vmem:[%s230_s3 + $0x10] sm:$0xff] %vm19_vm0, %v131_v23  ;;  %v129_v25 = vadd.f32 %v145_v21, %v118_v24 }
  0xd8   :  { %v121_v26 = vld [vmem:[#allocation2 + $0x18] sm:$0xff] }
  0xd9   :  { %133 = vst.msk [vmem:[%s230_s3] sm:$0xff] %vm19_vm0, %v129_v25  ;;  %v132_v27 = vadd.f32 %v145_v21, %v121_v26 }
  0xda   :  { %v119_v28 = vld [vmem:[#allocation2 + $0x8] sm:$0xff] }
  0xdb   :  { %136 = vst.msk [vmem:[%s230_s3 + $0x18] sm:$0xff] %vm19_vm0, %v132_v27  ;;  %v130_v29 = vadd.f32 %v145_v21, %v119_v28 }
  0xdd   :  { %134 = vst.msk [vmem:[%s230_s3 + $0x8] sm:$0xff] %vm19_vm0, %v130_v29 }

// kernel: forward.36
= control target key start
LH: loop header
LB: loop body
LE: loop exit
PB: predicated region body
PF: predicated region fallthrough
CT: control target
= control target key end

     0   :  { %vm19_vm0 = vcmask 261120   ;;  %v160_v1 = vmov 0.0   ;;  %s228_s1 = inlined_call_operand.vmem [shape: bf16[32,32], index: 1, kind: input, shape index: {}]   ;;  %s229_s0 = inlined_call_operand.vmem [shape: f32[32,32], index: 0, kind: input, shape index: {}]   ;;  %s230_s2 = inlined_call_operand.vmem [shape: f32[1,32], index: 2, kind: input, shape index: {}]   ;;  %s231_s3 = inlined_call_operand.vmem [shape: f32[32,32], index: 3, kind: output, shape index: {}]  }
   0x1   :  { %v158_v0 = vld [vmem:[%s228_s1 + $0x8] sm:$0xff]   ;;  %22 = vst.msk [vmem:[#allocation2 + $0x10] sm:$0xff] %vm19_vm0, %v160_v1  ;;  %20 = vst.msk [vmem:[#allocation2] sm:$0xff] %vm19_vm0, %v160_v1  ;;  %v159_v2 = vld [vmem:[%s228_s1] sm:$0xff]  }
   0x2   :  { %21 = vst.msk [vmem:[#allocation2 + $0x8] sm:$0xff] %vm19_vm0, %v160_v1  ;;  %23 = vst.msk [vmem:[#allocation2 + $0x18] sm:$0xff] %vm19_vm0, %v160_v1  ;;  %149 = vmatprep.subr.bf16.mxu0 %v158_v0  ;;  %v28_v3 = vld [vmem:[%s229_s0] sm:$0xff]  ;;  %v29_v4 = vld [vmem:[%s229_s0 + $0x8] sm:$0xff] }
   0x3   :  { %150 = vmatpush3.bf16.msra.mxu0 %v158_v0  ;;  %v32_v5 = vpack.c.bf16 %v29_v4, %v28_v3  ;;  %v30_v6 = vld [vmem:[%s229_s0 + $0x10] sm:$0xff]  ;;  %v31_v7 = vld [vmem:[%s229_s0 + $0x18] sm:$0xff]  ;;  %v144_v21 = vld [vmem:[%s230_s2] ss:$0 sm:$0xff] }
   0x4   :  { %151 = vmatprep.subr.bf16.mxu0 %v159_v2  ;;  %v33_v8 = vpack.c.bf16 %v31_v7, %v30_v6 }
   0x5   :  { %153 = vmatprep.mubr.msk.bf16.mxu0 %vm19_vm0, %v32_v5 }
   0x7   :  { %152 = vmatpush3.bf16.msra.mxu0 %v159_v2 }
   0x8   :  { %v26_v9 = vld [vmem:[#allocation2 + $0x10] sm:$0xff]  ;;  %v24_v11 = vld [vmem:[#allocation2] sm:$0xff] }
   0x9   :  { %v27_v14 = vld [vmem:[#allocation2 + $0x18] sm:$0xff]  ;;  %v25_v17 = vld [vmem:[#allocation2 + $0x8] sm:$0xff] }
   0xa   :  { %154 = vmatmul.mubr.msk.bf16.vlgmr.msra.gmra.mxu0 %vm19_vm0, %v33_v8 }
  0xca   :  { %v155_v10 = vpop.f32.mrf.mxu0 }
  0xcb   :  { %v108_v12 = vadd.f32 %v155_v10, %v26_v9 }
  0xcc   :  { %v91_v13 = vpop.f32.mrf.mxu0 }
  0xcd   :  { %112 = vst.msk [vmem:[#allocation2 + $0x10] sm:$0xff] %vm19_vm0, %v108_v12  ;;  %v106_v15 = vadd.f32 %v91_v13, %v24_v11 }
  0xce   :  { %v156_v16 = vpop.f32.mrf.mxu0 }
  0xcf   :  { %110 = vst.msk [vmem:[#allocation2] sm:$0xff] %vm19_vm0, %v106_v15  ;;  %v109_v18 = vadd.f32 %v156_v16, %v27_v14 }
  0xd0   :  { %v94_v19 = vpop.f32.mrf.mxu0 }
  0xd1   :  { %113 = vst.msk [vmem:[#allocation2 + $0x18] sm:$0xff] %vm19_vm0, %v109_v18  ;;  %v107_v20 = vadd.f32 %v94_v19, %v25_v17 }
  0xd3   :  { %111 = vst.msk [vmem:[#allocation2 + $0x8] sm:$0xff] %vm19_vm0, %v107_v20 }
  0xd4   :  { %v119_v22 = vld [vmem:[#allocation2 + $0x10] sm:$0xff] }
  0xd5   :  { %v130_v23 = vadd.f32 %v144_v21, %v119_v22 }
  0xd6   :  { %v117_v24 = vld [vmem:[#allocation2] sm:$0xff] }
  0xd7   :  { %134 = vst.msk [vmem:[%s231_s3 + $0x10] sm:$0xff] %vm19_vm0, %v130_v23  ;;  %v128_v25 = vadd.f32 %v144_v21, %v117_v24 }
  0xd8   :  { %v120_v26 = vld [vmem:[#allocation2 + $0x18] sm:$0xff] }
  0xd9   :  { %132 = vst.msk [vmem:[%s231_s3] sm:$0xff] %vm19_vm0, %v128_v25  ;;  %v131_v27 = vadd.f32 %v144_v21, %v120_v26 }
  0xda   :  { %v118_v28 = vld [vmem:[#allocation2 + $0x8] sm:$0xff] }
  0xdb   :  { %135 = vst.msk [vmem:[%s231_s3 + $0x18] sm:$0xff] %vm19_vm0, %v131_v27  ;;  %v129_v29 = vadd.f32 %v144_v21, %v118_v28 }
  0xdd   :  { %133 = vst.msk [vmem:[%s231_s3 + $0x8] sm:$0xff] %vm19_vm0, %v129_v29 }

// kernel: forward.35
= control target key start
LH: loop header
LB: loop body
LE: loop exit
PB: predicated region body
PF: predicated region fallthrough
CT: control target
= control target key end

     0   :  { %s1466_s27 = smov 0   ;;  %s1648_s0 = inlined_call_operand.vmem [shape: f32[2,4,16,8], index: 0, kind: input, shape index: {}]   ;;  %s1649_s1 = inlined_call_operand.vmem [shape: f32[2,4,16,8], index: 1, kind: input, shape index: {}]   ;;  %s1650_s2 = inlined_call_operand.vmem [shape: f32[2,4,16,8], index: 2, kind: input, shape index: {}]   ;;  %s1651_s3 = inlined_call_operand.vmem [shape: f32[2,16,32], index: 3, kind: input, shape index: {}]   ;;  %s1652_s4 = inlined_call_operand.vmem [shape: bf16[4,8,32], index: 4, kind: input, shape index: {}]   ;;  %s1653_s5 = inlined_call_operand.vmem [shape: f32[1,32], index: 5, kind: input, shape index: {}]   ;;  %s1654_s6 = inlined_call_operand.vmem [shape: f32[1,32], index: 6, kind: input, shape index: {}]   ;;  %s1655_s7 = inlined_call_operand.vmem [shape: f32[1,32], index: 7, kind: input, shape index: {}]   ;;  %s1656_s8 = inlined_call_operand.vmem [shape: f32[2,16,32], index: 8, kind: output, shape index: {}]  }
   0x1 LB: > { %s1232_s28 = sadd.s32 4294967295, %s1417_s27   ;;  %p1236_p0 = scmp.ge.s32.totalorder %s1417_s27, 1  ;;  %s1417_s27 = sphi %s1466_s27, %s18_s27  }
   0x2   : > { %p292_p1 = scmp.lt.s32.totalorder %s1417_s27, 3 }
   0x4   : > { %p293_p2 = pnand %p1236_p0, %p292_p1 }
   0x5   : > { %p341_p3 = scmp.lt.s32.totalorder (!%p293_p2), %s1232_s28, 1 }
   0x6   : > { %296 = sbr.rel (%p293_p2) target bundleno = 1261 (0x4ed), region = 52 }
   0xb   : > { %v1419_v0 = vmov 0.0   ;;  %s1658_s28 = smov (!%p341_p3, %s1232_s28), 1  ;;  %vm1420_vm0 = vmmov 0   ;;  %vm411_vm1 = vcmask 64512   ;;  %vm600_vm2 = vcmask 130048  }
   0xc   : > { %1293 = vmatprep.subr.bf16.mxu0 %v1419_v0  ;;  %1299 = vmatprep.subr.bf16.mxu1 %v1419_v0  ;;  %s1483_s29 = sshll.u32 %s1658_s28, 6  ;;  %vm880_vm3 = vcmask 1043456   ;;  %vm1066_vm4 = vcmask 261120   ;;  %s1267_s25 = sshll.u32 %s1658_s28, 4 }
   0xd   : > { %1295 = vmatprep.mubr.msk.bf16.mxu0 %vm1420_vm0, %v1419_v0  ;;  %1301 = vmatprep.mubr.msk.bf16.mxu1 %vm1420_vm0, %v1419_v0  ;;  %s1489_s10 = scalar_lea.vmem %s1648_s0, %s1483_s29  ;;  %s350_s13 = scalar_lea.vmem %s1649_s1, %s1483_s29 }
   0xe   : > { %v387_v1 = vld [vmem:[%s350_s13] sm:$0xff]  ;;  %v388_v2 = vld [vmem:[%s350_s13 + $0x8] sm:$0xff]  ;;  %v389_v3 = vld [vmem:[%s350_s13 + $0x10] sm:$0xff]  ;;  %s1555_s16 = scalar_lea.vmem %s1650_s2, %s1483_s29  ;;  %s360_s30 = scalar_lea.vmem %s1651_s3, %s1267_s25 }
   0xf   : > { %v395_v4 = vpack.c.bf16 %v388_v2, %v387_v1  ;;  %v390_v5 = vld [vmem:[%s350_s13 + $0x18] sm:$0xff]  ;;  %v367_v6 = vld [vmem:[%s1489_s10] sm:$0xff]  ;;  %v368_v7 = vld [vmem:[%s1489_s10 + $0x8] sm:$0xff]  ;;  %s365_s17 = scalar_lea.vmem %s1656_s8, %s1267_s25 }
  0x10   : > { %v396_v8 = vpack.c.bf16 %v390_v5, %v389_v3  ;;  %v375_v9 = vmul.f32 0.35355338, %v367_v6  ;;  %v369_v10 = vld [vmem:[%s1489_s10 + $0x10] sm:$0xff]  ;;  %v370_v11 = vld [vmem:[%s1489_s10 + $0x18] sm:$0xff]  ;;  %v376_v13 = vmul.f32 0.35355338, %v368_v7 }
  0x11   : > { %v416_v12 = vsel %vm411_vm1, %v395_v4, 0  ;;  %v377_v14 = vmul.f32 0.35355338, %v369_v10  ;;  %v391_v15 = vld [vmem:[%s350_s13 + $0x20] sm:$0xff]  ;;  %v378_v17 = vmul.f32 0.35355338, %v370_v11 }
  0x12   : > { %1294 = vmatpush3.bf16.xpose.msra.mxu0 %v416_v12  ;;  %v463_v16 = vsel %vm411_vm1, %v396_v8, 0  ;;  %v392_v18 = vld [vmem:[%s350_s13 + $0x28] sm:$0xff]  ;;  %v393_v19 = vld [vmem:[%s350_s13 + $0x30] sm:$0xff]  ;;  %v394_v20 = vld [vmem:[%s350_s13 + $0x38] sm:$0xff]  ;;  %v383_v23 = vpack.c.bf16 %v376_v13, %v375_v9 }
  0x13   : > { %1300 = vmatpush3.bf16.xpose.msra.mxu1 %v463_v16  ;;  %1305 = vmatprep.subr.bf16.mxu0 %v1419_v0  ;;  %v397_v21 = vpack.c.bf16 %v392_v18, %v391_v15  ;;  %v398_v22 = vpack.c.bf16 %v394_v20, %v393_v19  ;;  %v384_v24 = vpack.c.bf16 %v378_v17, %v377_v14  ;;  %v371_v25 = vld [vmem:[%s1489_s10 + $0x20] sm:$0xff]  ;;  %v372_v26 = vld [vmem:[%s1489_s10 + $0x28] sm:$0xff]  ;;  %v373_v28 = vld [vmem:[%s1489_s10 + $0x30] sm:$0xff] }
  0x14   : > { %1311 = vmatprep.subr.bf16.mxu1 %v1419_v0  ;;  %v374_v29 = vld [vmem:[%s1489_s10 + $0x38] sm:$0xff]  ;;  %v379_v31 = vmul.f32 0.35355338, %v371_v25  ;;  %v380_v32 = vmul.f32 0.35355338, %v372_v26 }
  0x15   : > { %v510_v27 = vsel %vm411_vm1, %v397_v21, 0  ;;  %v557_v30 = vsel %vm411_vm1, %v398_v22, 0  ;;  %v381_v33 = vmul.f32 0.35355338, %v373_v28  ;;  %v382_v34 = vmul.f32 0.35355338, %v374_v29 }
  0x16   : > { %v385_v35 = vpack.c.bf16 %v380_v32, %v379_v31 }
  0x17   : > { %v386_v36 = vpack.c.bf16 %v382_v34, %v381_v33 }
  0x19   : > { %1296 = vmatmul.mubr.msk.bf16.vlgmr.msra.gmra.mxu0 %vm411_vm1, %v383_v23 }
  0x1a   : > { %1302 = vmatmul.mubr.msk.bf16.vlgmr.msra.gmra.mxu1 %vm411_vm1, %v384_v24  ;;  %1306 = vmatpush3.bf16.xpose.msra.mxu0 %v510_v27 }
  0x1b   : > { %1312 = vmatpush3.bf16.xpose.msra.mxu1 %v557_v30  ;;  %1307 = vmatprep.mubr.msk.bf16.mxu0 %vm1420_vm0, %v1419_v0 }
  0x1c   : > { %1313 = vmatprep.mubr.msk.bf16.mxu1 %vm1420_vm0, %v1419_v0  ;;  %1317 = vmatprep.subr.bf16.mxu0 %v1419_v0 }
  0x1d   : > { %1323 = vmatprep.subr.bf16.mxu1 %v1419_v0 }
  0x21   : > { %1308 = vmatmul.mubr.msk.bf16.vlgmr.msra.gmra.mxu0 %vm411_vm1, %v385_v35 }
  0x22   : > { %1314 = vmatmul.mubr.msk.bf16.vlgmr.msra.gmra.mxu1 %vm411_vm1, %v386_v36  ;;  %1319 = vmatprep.mubr.msk.bf16.mxu0 %vm1420_vm0, %v1419_v0 }
  0x23   : > { %1325 = vmatprep.mubr.msk.bf16.mxu1 %vm1420_vm0, %v1419_v0 }
  0xd9   : > { %v452_v37 = vpop.f32.mrf.mxu0 }
  0xda   : > { %v499_v38 = vpop.f32.mrf.mxu1  ;;  %v601_v39 = vsel %vm600_vm2, %v452_v37, -inf }
  0xdb   : > { %v607_v40 = vsel %vm600_vm2, %v499_v38, -inf  ;;  %602 = vmax.xlane.f32.xlu0 %v601_v39  ;;  %v1297_v41 = vpop.f32.mrf.mxu0  ;;  %v400_v39 = vld [vmem:[%s1555_s16 + $0x8] sm:$0xff] }
  0xdc   : > { %608 = vmax.xlane.f32.xlu1 %v607_v40  ;;  %v1303_v42 = vpop.f32.mrf.mxu1  ;;  %v401_v40 = vld [vmem:[%s1555_s16 + $0x10] sm:$0xff] }
  0xdd   : > { %v455_v43 = vpop.f32.mrf.mxu0  ;;  %v402_v42 = vld [vmem:[%s1555_s16 + $0x18] sm:$0xff] }
  0xde   : > { %v502_v44 = vpop.f32.mrf.mxu1  ;;  %v604_v45 = vsel %vm600_vm2, %v455_v43, -inf }
  0xdf   : > { %v610_v46 = vsel %vm600_vm2, %v502_v44, -inf  ;;  %605 = vmax.xlane.f32.xlu0 %v604_v45  ;;  %v1298_v47 = vpop.f32.mrf.mxu0 }
  0xe0   : > { %611 = vmax.xlane.f32.xlu1 %v610_v46  ;;  %v1304_v48 = vpop.f32.mrf.mxu1 }
  0xe1   : > { %v546_v49 = vpop.f32.mrf.mxu0 }
  0xe2   : > { %v593_v50 = vpop.f32.mrf.mxu1  ;;  %v613_v51 = vsel %vm600_vm2, %v546_v49, -inf }
  0xe3   : > { %614 = vmax.xlane.f32.xlu0 %v613_v51  ;;  %v1309_v52 = vpop.f32.mrf.mxu0  ;;  %v619_v54 = vsel %vm600_vm2, %v593_v50, -inf }
  0xe4   : > { %v1315_v53 = vpop.f32.mrf.mxu1 }
  0xe5   : > { %v549_v55 = vpop.f32.mrf.mxu0  ;;  %v403_v53 = vld [vmem:[%s1555_s16 + $0x20] sm:$0xff] }
  0xe6   : > { %v596_v56 = vpop.f32.mrf.mxu1  ;;  %v616_v57 = vsel %vm600_vm2, %v549_v55, -inf }
  0xe7   : > { %620 = vmax.xlane.f32.xlu0 %v619_v54  ;;  %617 = vmax.xlane.f32.xlu1 %v616_v57  ;;  %v1310_v58 = vpop.f32.mrf.mxu0  ;;  %v622_v60 = vsel %vm600_vm2, %v596_v56, -inf  ;;  %v404_v54 = vld [vmem:[%s1555_s16 + $0x28] sm:$0xff] }
  0xe8   : > { %v1316_v59 = vpop.f32.mrf.mxu1 }
  0xe9   : > { %v409_v59 = vpack.c.bf16 %v404_v54, %v403_v53 }
  0xeb   : > { %623 = vmax.xlane.f32.xlu1 %v622_v60 }
 0x164   : > { %v603_v61 = vpop.xlane.xlu0 %602 }
 0x165   : > { %v609_v62 = vpop.xlane.xlu1 %608  ;;  %v625_v63 = vsub.f32 %v452_v37, %v603_v61  ;;  %v405_v61 = vld [vmem:[%s1555_s16 + $0x30] sm:$0xff] }
 0x166   : > { %v627_v1 = vsub.f32 %v499_v38, %v609_v62  ;;  %v399_v38 = vld [vmem:[%s1555_s16] sm:$0xff]  ;;  %v406_v62 = vld [vmem:[%s1555_s16 + $0x38] sm:$0xff] }
 0x167   : > { %v633_v2 = vmul.f32 1.442695, %v625_v63  ;;  %v407_v41 = vpack.c.bf16 %v400_v39, %v399_v38 }
 0x168   : > { %v637_v3 = vmul.f32 1.442695, %v627_v1  ;;  %v606_v4 = vpop.xlane.xlu0 %605 }
 0x169   : > { %1375 = vpow2.f32 %v633_v2  ;;  %v612_v5 = vpop.xlane.xlu1 %611  ;;  %v626_v6 = vsub.f32 %v455_v43, %v606_v4  ;;  %v408_v43 = vpack.c.bf16 %v402_v42, %v401_v40  ;;  %1318 = vmatpush3.bf16.msra.mxu0 %v407_v41  ;;  %v410_v4 = vpack.c.bf16 %v406_v62, %v405_v61 }
 0x16a   : > { %v628_v7 = vsub.f32 %v502_v44, %v612_v5  ;;  %1377 = vpow2.f32 %v637_v3  ;;  %1329 = vmatprep.subr.bf16.mxu0 %v1419_v0 }
 0x16b   : > { %v635_v8 = vmul.f32 1.442695, %v626_v6  ;;  %1324 = vmatpush3.bf16.msra.mxu1 %v408_v43 }
 0x16c   : > { %v639_v9 = vmul.f32 1.442695, %v628_v7  ;;  %v615_v10 = vpop.xlane.xlu0 %614  ;;  %1335 = vmatprep.subr.bf16.mxu1 %v1419_v0 }
 0x16d   : > { %1379 = vpow2.f32 %v635_v8  ;;  %v629_v11 = vsub.f32 %v546_v49, %v615_v10 }
 0x16e   : > { %1381 = vpow2.f32 %v639_v9 }
 0x16f   : > { %v641_v12 = vmul.f32 1.442695, %v629_v11 }
 0x170   : > { %v621_v13 = vpop.xlane.xlu0 %620  ;;  %v618_v14 = vpop.xlane.xlu1 %617 }
 0x171   : > { %1383 = vpow2.f32 %v641_v12  ;;  %v631_v15 = vsub.f32 %v593_v50, %v621_v13  ;;  %v630_v16 = vsub.f32 %v549_v55, %v618_v14 }
 0x173   : > { %v645_v17 = vmul.f32 1.442695, %v631_v15  ;;  %v643_v18 = vmul.f32 1.442695, %v630_v16  ;;  %v873_v15 = vld [vmem:[%s1652_s4] sm:$0xf] }
 0x174   : > { %v624_v19 = vpop.xlane.xlu1 %623  ;;  %v882_v16 = vsel %vm880_vm3, %v873_v15, 0 }
 0x175   : > { %1385 = vpow2.f32 %v645_v17  ;;  %v632_v20 = vsub.f32 %v596_v56, %v624_v19  ;;  %v874_v17 = vld [vmem:[%s1652_s4 + $0x4] sm:$0xf] }
 0x176   : > { %v1376_v21 = vpop.eup %1375  ;;  %1387 = vpow2.f32 %v643_v18  ;;  %v929_v18 = vsel %vm880_vm3, %v874_v17, 0 }
 0x177   : > { %v647_v22 = vmul.f32 1.442695, %v632_v20  ;;  %v649_v23 = vsel %vm600_vm2, %v1376_v21, 0.0  ;;  %v1532_v24 = vpop.eup %1377 }
 0x178   : > { %650 = vadd.xlane.f32.xlu0 %v649_v23  ;;  %v655_v26 = vsel %vm600_vm2, %v1532_v24, 0.0 }
 0x179   : > { %1389 = vpow2.f32 %v647_v22 }
 0x17a   : > { %v1380_v25 = vpop.eup %1379 }
 0x17b   : > { %v652_v27 = vsel %vm600_vm2, %v1380_v25, 0.0  ;;  %v1382_v28 = vpop.eup %1381 }
 0x17c   : > { %656 = vadd.xlane.f32.xlu0 %v655_v26  ;;  %653 = vadd.xlane.f32.xlu1 %v652_v27  ;;  %v658_v31 = vsel %vm600_vm2, %v1382_v28, 0.0 }
 0x17e   : > { %v1537_v29 = vpop.eup %1383 }
 0x17f   : > { %v661_v30 = vsel %vm600_vm2, %v1537_v29, 0.0 }
 0x180   : > { %662 = vadd.xlane.f32.xlu0 %v661_v30  ;;  %659 = vadd.xlane.f32.xlu1 %v658_v31 }
 0x182   : > { %v1542_v32 = vpop.eup %1385 }
 0x183   : > { %v1388_v33 = vpop.eup %1387  ;;  %v667_v34 = vsel %vm600_vm2, %v1542_v32, 0.0 }
 0x184   : > { %668 = vadd.xlane.f32.xlu0 %v667_v34  ;;  %v664_v35 = vsel %vm600_vm2, %v1388_v33, 0.0 }
 0x185   : > { %665 = vadd.xlane.f32.xlu1 %v664_v35 }
 0x186   : > { %v1547_v36 = vpop.eup %1389 }
 0x187   : > { %v670_v37 = vsel %vm600_vm2, %v1547_v36, 0.0 }
 0x189   : > { %671 = vadd.xlane.f32.xlu1 %v670_v37 }
 0x201   : > { %v651_v44 = vpop.xlane.xlu0 %650 }
 0x202   : > { %1391 = vrcp.f32 %v651_v44 }
 0x205   : > { %v657_v45 = vpop.xlane.xlu0 %656  ;;  %v654_v46 = vpop.xlane.xlu1 %653 }
 0x206   : > { %1393 = vrcp.f32 %v654_v46 }
 0x207   : > { %1395 = vrcp.f32 %v657_v45 }
 0x209   : > { %v663_v47 = vpop.xlane.xlu0 %662  ;;  %v660_v48 = vpop.xlane.xlu1 %659 }
 0x20a   : > { %1397 = vrcp.f32 %v660_v48 }
 0x20b   : > { %1399 = vrcp.f32 %v663_v47 }
 0x20d   : > { %v669_v49 = vpop.xlane.xlu0 %668 }
 0x20e   : > { %v666_v50 = vpop.xlane.xlu1 %665 }
 0x20f   : > { %1401 = vrcp.f32 %v666_v50  ;;  %v1392_v51 = vpop.eup %1391 }
 0x210   : > { %1403 = vrcp.f32 %v669_v49  ;;  %v681_v56 = vmul.f32 %v1392_v51, %v1376_v21  ;;  %v875_v21 = vld [vmem:[%s1652_s4 + $0x8] sm:$0xf] }
 0x212   : > { %v672_v52 = vpop.xlane.xlu1 %671 }
 0x213   : > { %1405 = vrcp.f32 %v672_v52  ;;  %v1394_v55 = vpop.eup %1393 }
 0x214   : > { %v682_v57 = vmul.f32 %v1394_v55, %v1380_v25  ;;  %v1396_v58 = vpop.eup %1395  ;;  %v976_v25 = vsel %vm880_vm3, %v875_v21, 0 }
 0x215   : > { %v683_v1 = vmul.f32 %v1396_v58, %v1532_v24 }
 0x216   : > { %v689_v60 = vpack.c.bf16 %v682_v57, %v681_v56 }
 0x217   : > { %v1398_v63 = vpop.eup %1397 }
 0x218   : > { %1320 = vmatmul.mubr.msk.bf16.vlgmr.msra.gmra.mxu0 %vm600_vm2, %v689_v60  ;;  %v684_v2 = vmul.f32 %v1398_v63, %v1382_v28  ;;  %v1400_v3 = vpop.eup %1399  ;;  %v876_v28 = vld [vmem:[%s1652_s4 + $0xc] sm:$0xf]  ;;  %v1259_v63 = vld [vmem:[%s1653_s5] ss:$0 sm:$0xff] }
 0x219   : > { %1330 = vmatpush3.bf16.msra.mxu0 %v409_v59  ;;  %1331 = vmatprep.mubr.msk.bf16.mxu0 %vm1420_vm0, %v1419_v0  ;;  %v685_v7 = vmul.f32 %v1400_v3, %v1537_v29 }
 0x21a   : > { %v690_v5 = vpack.c.bf16 %v684_v2, %v683_v1  ;;  %1341 = vmatprep.subr.bf16.mxu0 %v1419_v0 }
 0x21c   : > { %v1402_v6 = vpop.eup %1401  ;;  %1326 = vmatmul.mubr.msk.bf16.vlgmr.msra.gmra.mxu1 %vm600_vm2, %v690_v5  ;;  %v1090_v5 = vld [vmem:[%s360_s30] sm:$0xff] }
 0x21d   : > { %v686_v8 = vmul.f32 %v1402_v6, %v1388_v33  ;;  %v1404_v9 = vpop.eup %1403  ;;  %1336 = vmatpush3.bf16.msra.mxu1 %v410_v4  ;;  %1337 = vmatprep.mubr.msk.bf16.mxu1 %vm1420_vm0, %v1419_v0 }
 0x21e   : > { %1347 = vmatprep.subr.bf16.mxu1 %v1419_v0  ;;  %v687_v12 = vmul.f32 %v1404_v9, %v1542_v32  ;;  %v1023_v32 = vsel %vm880_vm3, %v876_v28, 0 }
 0x21f   : > { %v691_v10 = vpack.c.bf16 %v686_v8, %v685_v7 }
 0x220   : > { %v1406_v11 = vpop.eup %1405 }
 0x221   : > { %1332 = vmatmul.mubr.msk.bf16.vlgmr.msra.gmra.mxu0 %vm600_vm2, %v691_v10  ;;  %v688_v13 = vmul.f32 %v1406_v11, %v1547_v36 }
 0x222   : > { %1343 = vmatprep.mubr.msk.bf16.mxu0 %vm1420_vm0, %v1419_v0  ;;  %1342 = vmatpush3.bf16.msra.mxu0 %v882_v16 }
 0x223   : > { %v692_v14 = vpack.c.bf16 %v688_v13, %v687_v12  ;;  %1353 = vmatprep.subr.bf16.mxu0 %v1419_v0  ;;  %v1091_v13 = vld [vmem:[%s360_s30 + $0x8] sm:$0xff] }
 0x225   : > { %1338 = vmatmul.mubr.msk.bf16.vlgmr.msra.gmra.mxu1 %vm600_vm2, %v692_v14 }
 0x226   : > { %1349 = vmatprep.mubr.msk.bf16.mxu1 %vm1420_vm0, %v1419_v0  ;;  %1348 = vmatpush3.bf16.msra.mxu1 %v929_v18 }
 0x227   : > { %1359 = vmatprep.subr.bf16.mxu1 %v1419_v0 }
 0x2d8   : > { %v730_v19 = vpop.f32.mrf.mxu0 }
 0x2da   : > { %v1321_v20 = vpop.f32.mrf.mxu0 }
 0x2dc   : > { %v733_v22 = vpop.f32.mrf.mxu0  ;;  %v774_v23 = vpop.f32.mrf.mxu1 }
 0x2dd   : > { %v869_v24 = vpack.c.bf16 %v733_v22, %v730_v19 }
 0x2de   : > { %v1322_v26 = vpop.f32.mrf.mxu0  ;;  %v1327_v27 = vpop.f32.mrf.mxu1 }
 0x2df   : > { %1344 = vmatmul.mubr.msk.bf16.vlgmr.msra.gmra.mxu0 %vm411_vm1, %v869_v24 }
 0x2e0   : > { %v777_v29 = vpop.f32.mrf.mxu1  ;;  %1354 = vmatpush3.bf16.msra.mxu0 %v976_v25  ;;  %1355 = vmatprep.mubr.msk.bf16.mxu0 %vm1420_vm0, %v1419_v0 }
 0x2e1   : > { %v818_v30 = vpop.f32.mrf.mxu0  ;;  %v870_v31 = vpack.c.bf16 %v777_v29, %v774_v23 }
 0x2e2   : > { %v1328_v33 = vpop.f32.mrf.mxu1 }
 0x2e3   : > { %v1333_v34 = vpop.f32.mrf.mxu0  ;;  %1350 = vmatmul.mubr.msk.bf16.vlgmr.msra.gmra.mxu1 %vm411_vm1, %v870_v31 }
 0x2e4   : > { %1360 = vmatpush3.bf16.msra.mxu1 %v1023_v32  ;;  %1361 = vmatprep.mubr.msk.bf16.mxu1 %vm1420_vm0, %v1419_v0 }
 0x2e5   : > { %v821_v35 = vpop.f32.mrf.mxu0  ;;  %v862_v36 = vpop.f32.mrf.mxu1 }
 0x2e6   : > { %v871_v37 = vpack.c.bf16 %v821_v35, %v818_v30  ;;  %v1260_v35 = vld [vmem:[%s1654_s6] ss:$0 sm:$0xff] }
 0x2e7   : > { %v1334_v38 = vpop.f32.mrf.mxu0  ;;  %v1339_v39 = vpop.f32.mrf.mxu1 }
 0x2e8   : > { %1356 = vmatmul.mubr.msk.bf16.vlgmr.msra.gmra.mxu0 %vm411_vm1, %v871_v37  ;;  %v1261_v37 = vld [vmem:[%s1655_s7] ss:$0 sm:$0xff] }
 0x2e9   : > { %v865_v40 = vpop.f32.mrf.mxu1 }
 0x2ea   : > { %v872_v41 = vpack.c.bf16 %v865_v40, %v862_v36 }
 0x2eb   : > { %v1340_v42 = vpop.f32.mrf.mxu1 }
 0x2ec   : > { %1362 = vmatmul.mubr.msk.bf16.vlgmr.msra.gmra.mxu1 %vm411_vm1, %v872_v41 }
 0x39f   : > { %v918_v43 = vpop.f32.mrf.mxu0 }
 0x3a0   : > { %v1067_v51 = vsel %vm1066_vm4, %v918_v43, 0.0 }
 0x3a1   : > { %v1345_v44 = vpop.f32.mrf.mxu0 }
 0x3a3   : > { %v921_v45 = vpop.f32.mrf.mxu0  ;;  %v965_v46 = vpop.f32.mrf.mxu1 }
 0x3a4   : > { %v1068_v0 = vsel %vm1066_vm4, %v965_v46, 0.0  ;;  %v1074_v60 = vsel %vm1066_vm4, %v921_v45, 0.0 }
 0x3a5   : > { %v1346_v47 = vpop.f32.mrf.mxu0  ;;  %v1351_v48 = vpop.f32.mrf.mxu1  ;;  %v1069_v53 = vadd.f32 %v1068_v0, %v1067_v51 }
 0x3a7   : > { %v968_v49 = vpop.f32.mrf.mxu1 }
 0x3a8   : > { %v1012_v50 = vpop.f32.mrf.mxu0  ;;  %v1075_v56 = vsel %vm1066_vm4, %v968_v49, 0.0 }
 0x3a9   : > { %v1070_v52 = vsel %vm1066_vm4, %v1012_v50, 0.0  ;;  %v1352_v54 = vpop.f32.mrf.mxu1  ;;  %v1076_v1 = vadd.f32 %v1075_v56, %v1074_v60 }
 0x3aa   : > { %v1357_v55 = vpop.f32.mrf.mxu0  ;;  %v1071_v57 = vadd.f32 %v1070_v52, %v1069_v53 }
 0x3ac   : > { %v1015_v58 = vpop.f32.mrf.mxu0  ;;  %v1059_v59 = vpop.f32.mrf.mxu1 }
 0x3ad   : > { %v1077_v61 = vsel %vm1066_vm4, %v1015_v58, 0.0  ;;  %v1072_v62 = vsel %vm1066_vm4, %v1059_v59, 0.0 }
 0x3ae   : > { %v1073_v2 = vadd.f32 %v1072_v62, %v1071_v57  ;;  %v1358_v3 = vpop.f32.mrf.mxu0  ;;  %v1363_v4 = vpop.f32.mrf.mxu1  ;;  %v1078_v6 = vadd.f32 %v1077_v61, %v1076_v1 }
 0x3b0   : > { %v1088_v7 = vadd.f32 %v1259_v63, %v1073_v2  ;;  %v1062_v8 = vpop.f32.mrf.mxu1 }
 0x3b1   : > { %v1079_v9 = vsel %vm1066_vm4, %v1062_v8, 0.0 }
 0x3b2   : > { %v1080_v10 = vadd.f32 %v1079_v9, %v1078_v6  ;;  %v1364_v11 = vpop.f32.mrf.mxu1  ;;  %v1092_v12 = vadd.f32 %v1090_v5, %v1088_v7 }
 0x3b4   : > { %v1089_v14 = vadd.f32 %v1259_v63, %v1080_v10  ;;  %v1096_v15 = vsel %vm1066_vm4, %v1092_v12, 0.0 }
 0x3b5   : > { %1097 = vadd.xlane.f32.xlu0 %v1096_v15 }
 0x3b6   : > { %v1093_v16 = vadd.f32 %v1091_v13, %v1089_v14 }
 0x3b8   : > { %v1099_v17 = vsel %vm1066_vm4, %v1093_v16, 0.0 }
 0x3b9   : > { %1100 = vadd.xlane.f32.xlu1 %v1099_v17 }
 0x43e   : > { %v1098_v18 = vpop.xlane.xlu0 %1097 }
 0x43f   : > { %v1103_v19 = vmul.f32 0.03125, %v1098_v18 }
 0x441   : > { %v1105_v20 = vsub.f32 %v1092_v12, %v1103_v19 }
 0x442   : > { %v1101_v21 = vpop.xlane.xlu1 %1100 }
 0x443   : > { %v1104_v22 = vmul.f32 0.03125, %v1101_v21  ;;  %v1107_v23 = vmul.f32 %v1105_v20, %v1105_v20 }
 0x445   : > { %v1106_v24 = vsub.f32 %v1093_v16, %v1104_v22  ;;  %v1109_v25 = vsel %vm1066_vm4, %v1107_v23, 0.0 }
 0x446   : > { %1110 = vadd.xlane.f32.xlu0 %v1109_v25 }
 0x447   : > { %v1108_v26 = vmul.f32 %v1106_v24, %v1106_v24 }
 0x449   : > { %v1112_v27 = vsel %vm1066_vm4, %v1108_v26, 0.0 }
 0x44a   : > { %1113 = vadd.xlane.f32.xlu1 %v1112_v27 }
 0x4cf   : > { %v1111_v28 = vpop.xlane.xlu0 %1110 }
 0x4d0   : > { %v1115_v29 = vmul.f32 0.03125, %v1111_v28 }
 0x4d2   : > { %v1117_v30 = vadd.f32 1e-06, %v1115_v29 }
 0x4d3   : > { %v1114_v31 = vpop.xlane.xlu1 %1113 }
 0x4d4   : > { %1407 = vrsqrt.f32 %v1117_v30  ;;  %v1116_v32 = vmul.f32 0.03125, %v1114_v31 }
 0x4d6   : > { %v1118_v33 = vadd.f32 1e-06, %v1116_v32 }
 0x4d8   : > { %1409 = vrsqrt.f32 %v1118_v33 }
 0x4e1   : > { %v1408_v34 = vpop.eup %1407 }
 0x4e2   : > { %v1121_v36 = vmul.f32 %v1408_v34, %v1105_v20 }
 0x4e4   : > { %v1129_v38 = vmul.f32 %v1260_v35, %v1121_v36 }
 0x4e5   : > { %v1410_v39 = vpop.eup %1409 }
 0x4e6   : > { %v1137_v40 = vadd.f32 %v1261_v37, %v1129_v38  ;;  %v1122_v41 = vmul.f32 %v1410_v39, %v1106_v24 }
 0x4e8   : > { %1139 = vst.msk [vmem:[%s365_s17] sm:$0xff] %vm1066_vm4, %v1137_v40  ;;  %v1130_v42 = vmul.f32 %v1260_v35, %v1122_v41 }
 0x4ea   : > { %v1138_v43 = vadd.f32 %v1261_v37, %v1130_v42 }
 0x4ec   : > { %1140 = vst.msk [vmem:[%s365_s17 + $0x8] sm:$0xff] %vm1066_vm4, %v1138_v43 }
 0x4ed PF: > { %s18_s27 = sadd.s32 1, %s1417_s27  }
 0x4ee   : > { %p15_p4 = scmp.ge.s32.totalorder %s18_s27, 4  }
 0x4f0   :  { %17 = sbr.rel (!%p15_p4) target bundleno = 1 (0x1), region = 91 }

// kernel: forward.37
= control target key start
LH: loop header
LB: loop body
LE: loop exit
PB: predicated region body
PF: predicated region fallthrough
CT: control target
= control target key end

     0   :  { %vm19_vm0 = vcmask 523264   ;;  %v132_v0 = vmov 0.0   ;;  %vm133_vm1 = vmmov 0   ;;  %vm43_vm2 = vcmask 261120   ;;  %s181_s1 = inlined_call_operand.vmem [shape: bf16[32,64], index: 1, kind: input, shape index: {}]   ;;  %s182_s0 = inlined_call_operand.vmem [shape: f32[16,32], index: 0, kind: input, shape index: {}]   ;;  %s183_s2 = inlined_call_operand.vmem [shape: f32[1,64], index: 2, kind: input, shape index: {}]   ;;  %s184_s3 = inlined_call_operand.vmem [shape: f32[16,64], index: 3, kind: output, shape index: {}]  }
   0x1   :  { %120 = vmatprep.subr.bf16.mxu0 %v132_v0  ;;  %v130_v1 = vld [vmem:[%s181_s1 + $0x8] sm:$0xff]   ;;  %124 = vmatprep.mubr.msk.bf16.mxu0 %vm133_vm1, %v132_v0  ;;  %20 = vst.msk [vmem:[#allocation2] sm:$0xff] %vm19_vm0, %v132_v0  ;;  %21 = vst.msk [vmem:[#allocation2 + $0x8] sm:$0xff] %vm19_vm0, %v132_v0  ;;  %v131_v2 = vld [vmem:[%s181_s1] sm:$0xff]  }
   0x2   :  { %121 = vmatpush3.bf16.msra.mxu0 %v130_v1  ;;  %v24_v3 = vld [vmem:[%s182_s0] sm:$0xff]  ;;  %v25_v4 = vld [vmem:[%s182_s0 + $0x8] sm:$0xff] }
   0x3   :  { %122 = vmatprep.subr.bf16.mxu0 %v132_v0  ;;  %v26_v5 = vpack.c.bf16 %v25_v4, %v24_v3  ;;  %v116_v14 = vld [vmem:[%s183_s2] ss:$0 sm:$0xff] }
   0x6   :  { %123 = vmatpush3.bf16.msra.mxu0 %v131_v2 }
   0x8   :  { %v22_v6 = vld [vmem:[#allocation2] sm:$0xff]  ;;  %v23_v10 = vld [vmem:[#allocation2 + $0x8] sm:$0xff] }
   0x9   :  { %125 = vmatmul.mubr.msk.bf16.vlgmr.msra.gmra.mxu0 %vm43_vm2, %v26_v5 }
  0xc9   :  { %v81_v7 = vpop.f32.mrf.mxu0 }
  0xca   :  { %v88_v8 = vadd.f32 %v81_v7, %v22_v6 }
  0xcb   :  { %v126_v9 = vpop.f32.mrf.mxu0 }
  0xcc   :  { %91 = vst.msk [vmem:[#allocation2] sm:$0xff] %vm19_vm0, %v88_v8 }
  0xcd   :  { %v84_v11 = vpop.f32.mrf.mxu0 }
  0xce   :  { %v89_v12 = vadd.f32 %v84_v11, %v23_v10 }
  0xcf   :  { %v127_v13 = vpop.f32.mrf.mxu0 }
  0xd0   :  { %92 = vst.msk [vmem:[#allocation2 + $0x8] sm:$0xff] %vm19_vm0, %v89_v12 }
  0xd3   :  { %v96_v15 = vld [vmem:[#allocation2] sm:$0xff] }
  0xd4   :  { %v105_v16 = vadd.f32 %v116_v14, %v96_v15 }
  0xd6   :  { %107 = vst.msk [vmem:[%s184_s3] sm:$0xff] %vm19_vm0, %v105_v16 }
  0xd7   :  { %v97_v17 = vld [vmem:[#allocation2 + $0x8] sm:$0xff] }
  0xd8   :  { %v106_v18 = vadd.f32 %v116_v14, %v97_v17 }
  0xda   :  { %108 = vst.msk [vmem:[%s184_s3 + $0x8] sm:$0xff] %vm19_vm0, %v106_v18 }

// kernel: forward.50
= control target key start
LH: loop header
LB: loop body
LE: loop exit
PB: predicated region body
PF: predicated region fallthrough
CT: control target
= control target key end

     0   :  { %vm22_vm0 = vcmask 517120   ;;  %s103_s0 = inlined_call_operand.vmem [shape: f32[2,64], index: 0, kind: input, shape index: {}]   ;;  %s104_s1 = inlined_call_operand.vmem [shape: f32[2,64], index: 1, kind: input, shape index: {}]   ;;  %s105_s2 = inlined_call_operand.vmem [shape: f32[1,64], index: 2, kind: input, shape index: {}]   ;;  %s106_s3 = inlined_call_operand.vmem [shape: f32[1,64], index: 3, kind: input, shape index: {}]   ;;  %s107_s4 = inlined_call_operand.vmem [shape: f32[2,64], index: 4, kind: output, shape index: {}]  }
   0x1   :  { %v17_v0 = vld [vmem:[%s103_s0] sm:$0x3] }
   0x2   :  { %v18_v1 = vld [vmem:[%s104_s1] sm:$0x3] }
   0x3   :  { %v19_v2 = vadd.f32 %v18_v1, %v17_v0  ;;  %v56_v13 = vld [vmem:[%s105_s2] ss:$0 sm:$0xff] }
   0x4   :  { %v57_v15 = vld [vmem:[%s106_s3] ss:$0 sm:$0xff] }
   0x5   :  { %v23_v3 = vsel %vm22_vm0, %v19_v2, 0.0 }
   0x6   :  { %24 = vadd.xlane.f32.xlu0 %v23_v3 }
  0x8f   :  { %v25_v4 = vpop.xlane.xlu0 %24 }
  0x90   :  { %v27_v5 = vmul.f32 0.015625, %v25_v4 }
  0x92   :  { %v28_v6 = vsub.f32 %v19_v2, %v27_v5 }
  0x94   :  { %v29_v7 = vmul.f32 %v28_v6, %v28_v6 }
  0x96   :  { %v30_v8 = vsel %vm22_vm0, %v29_v7, 0.0 }
  0x97   :  { %31 = vadd.xlane.f32.xlu0 %v30_v8 }
 0x120   :  { %v32_v9 = vpop.xlane.xlu0 %31 }
 0x121   :  { %v33_v10 = vmul.f32 0.015625, %v32_v9 }
 0x123   :  { %v34_v11 = vadd.f32 1e-06, %v33_v10 }
 0x125   :  { %58 = vrsqrt.f32 %v34_v11 }
 0x132   :  { %v59_v12 = vpop.eup %58 }
 0x133   :  { %v36_v14 = vmul.f32 %v59_v12, %v28_v6 }
 0x135   :  { %v43_v16 = vmul.f32 %v56_v13, %v36_v14 }
 0x137   :  { %v50_v17 = vadd.f32 %v57_v15, %v43_v16 }
 0x139   :  { %51 = vst.msk [vmem:[%s107_s4] sm:$0x3] %vm22_vm0, %v50_v17 }

// kernel: forward.48
= control target key start
LH: loop header
LB: loop body
LE: loop exit
PB: predicated region body
PF: predicated region fallthrough
CT: control target
= control target key end

     0   :  { %s662_s20 = smov 0   ;;  %s707_s0 = inlined_call_operand.vmem [shape: f32[2,16,32], index: 0, kind: input, shape index: {}]   ;;  %s708_s1 = inlined_call_operand.vmem [shape: bf16[32,32], index: 1, kind: input, shape index: {}]   ;;  %s709_s2 = inlined_call_operand.vmem [shape: f32[1,32], index: 2, kind: input, shape index: {}]   ;;  %s710_s3 = inlined_call_operand.vmem [shape: bf16[32,1], index: 3, kind: input, shape index: {}]   ;;  %s711_s4 = inlined_call_operand.<no memory space> [shape: f32[1,1], index: 4, kind: input, shape index: {}]   ;;  %s712_s5 = inlined_call_operand.vmem [shape: f32[2,1,32], index: 5, kind: output, shape index: {}]  }
   0x1   :  { %v10_v0 = vstv %s711_s4 }
   0x2   :  { %11 = vst [vmem:[#allocation2] sm:$0x1] %v10_v0 }
   0x3 LB: > { %s548_s21 = sadd.s32 4294967295, %s625_s20   ;;  %p552_p0 = scmp.ge.s32.totalorder %s625_s20, 1  ;;  %s625_s20 = sphi %s662_s20, %s17_s20  }
   0x4   : > { %p189_p1 = scmp.lt.s32.totalorder %s625_s20, 3 }
   0x6   : > { %p190_p2 = pnand %p552_p0, %p189_p1 }
   0x7   : > { %p215_p3 = scmp.lt.s32.totalorder (!%p190_p2), %s548_s21, 1 }
   0x8   : > { %193 = sbr.rel (%p190_p2) target bundleno = 809 (0x329), region = 40 }
   0xd   : > { %v609_v1 = vld [vmem:[%s708_s1 + $0x8] sm:$0xff]   ;;  %v627_v2 = vmov 0.0   ;;  %v610_v3 = vld [vmem:[%s708_s1] sm:$0xff]   ;;  %vm628_vm0 = vmmov 0   ;;  %s714_s21 = smov (!%p215_p3, %s548_s21), 1  ;;  %vm250_vm1 = vcmask 261120  }
   0xe   : > { %576 = vmatprep.subr.bf16.mxu0 %v627_v2  ;;  %584 = vmatprep.subr.bf16.mxu1 %v627_v2  ;;  %s566_s25 = sshll.u32 %s714_s21, 4  ;;  %v611_v7 = vld [vmem:[%s710_s3 + $0x8] sm:$0xff]   ;;  %v612_v8 = vld [vmem:[%s710_s3] sm:$0xff]   ;;  %vm365_vm2 = vcmask 7168   ;;  %vm425_vm3 = vcmask 130048   ;;  %s222_s12 = scalar_lea.vmem %s712_s5, %s714_s21  ;;  %vm499_vm4 = vcmask 253952  }
   0xf   : > { %577 = vmatpush3.bf16.msra.mxu0 %v609_v1  ;;  %580 = vmatprep.mubr.msk.bf16.mxu0 %vm628_vm0, %v627_v2  ;;  %s219_s28 = scalar_lea.vmem %s707_s0, %s566_s25  ;;  %v555_v9 = vld [vmem:[%s709_s2] ss:$0 sm:$0xff] }
  0x10   : > { %578 = vmatprep.subr.bf16.mxu0 %v627_v2  ;;  %588 = vmatprep.mubr.msk.bf16.mxu1 %vm628_vm0, %v627_v2  ;;  %v224_v4 = vld [vmem:[%s219_s28] sm:$0xff]  ;;  %v225_v5 = vld [vmem:[%s219_s28 + $0x8] sm:$0xff] }
  0x11   : > { %v226_v6 = vpack.c.bf16 %v225_v5, %v224_v4  ;;  %585 = vmatpush3.bf16.msra.mxu1 %v611_v7  ;;  %v559_v19 = vld [vmem:[#allocation2] ss:$0 sm:$0xff] }
  0x12   : > { %586 = vmatprep.subr.bf16.mxu1 %v627_v2 }
  0x13   : > { %579 = vmatpush3.bf16.msra.mxu0 %v610_v3 }
  0x14   : > { %592 = vmatprep.subr.mxu0 %v627_v2 }
  0x15   : > { %587 = vmatpush3.bf16.msra.mxu1 %v612_v8 }
  0x16   : > { %581 = vmatmul.mubr.msk.bf16.vlgmr.msra.gmra.mxu0 %vm250_vm1, %v226_v6 }
  0x17   : > { %593 = vmatpush3.msra.mxu0 %v225_v5  ;;  %596 = vmatprep.mubr.msk.f32.mxu0 %vm628_vm0, %v627_v2 }
  0x18   : > { %594 = vmatprep.subr.mxu0 %v627_v2 }
  0x19   : > { %595 = vmatpush3.msra.mxu0 %v224_v4 }
  0xd6   : > { %v288_v10 = vpop.f32.mrf.mxu0 }
  0xd7   : > { %v289_v12 = vadd.f32 %v555_v9, %v288_v10 }
  0xd8   : > { %v582_v11 = vpop.f32.mrf.mxu0 }
  0xd9   : > { %v295_v16 = vmax.f32 %v289_v12, 0.0 }
  0xda   : > { %v291_v13 = vpop.f32.mrf.mxu0 }
  0xdb   : > { %v292_v14 = vadd.f32 %v555_v9, %v291_v13 }
  0xdc   : > { %v583_v15 = vpop.f32.mrf.mxu0 }
  0xdd   : > { %v296_v17 = vmax.f32 %v292_v14, 0.0 }
  0xdf   : > { %v297_v18 = vpack.c.bf16 %v296_v17, %v295_v16 }
  0xe1   : > { %589 = vmatmul.mubr.msk.bf16.vlgmr.msra.gmra.mxu1 %vm250_vm1, %v297_v18 }
 0x1a1   : > { %v358_v20 = vpop.f32.mrf.mxu1 }
 0x1a2   : > { %v359_v22 = vadd.f32 %v559_v19, %v358_v20 }
 0x1a3   : > { %v590_v21 = vpop.f32.mrf.mxu1 }
 0x1a4   : > { %v366_v26 = vsel %vm365_vm2, %v359_v22, -inf }
 0x1a5   : > { %v361_v23 = vpop.f32.mrf.mxu1 }
 0x1a6   : > { %v362_v24 = vadd.f32 %v559_v19, %v361_v23 }
 0x1a7   : > { %v591_v25 = vpop.f32.mrf.mxu1 }
 0x1a8   : > { %v367_v27 = vsel %vm365_vm2, %v362_v24, -inf }
 0x1a9   : > { %v368_v28 = vmax.f32 %v366_v26, %v367_v27 }
 0x1ab   : > { %v369_v29 = vrot.slane %v368_v28, 4 }
 0x1ad   : > { %v370_v30 = vmax.f32 %v368_v28, %v369_v29 }
 0x1af   : > { %v371_v31 = vrot.slane %v370_v30, 2 }
 0x1b1   : > { %v372_v32 = vmax.f32 %v370_v30, %v371_v31 }
 0x1b3   : > { %v373_v33 = vrot.slane %v372_v32, 1 }
 0x1b5   : > { %v374_v34 = vmax.f32 %v372_v32, %v373_v33 }
 0x1b7   : > { %v375_v35 = vsub.f32 %v359_v22, %v374_v34  ;;  %v376_v36 = vsub.f32 %v362_v24, %v374_v34 }
 0x1b9   : > { %v377_v37 = vmul.f32 1.442695, %v375_v35  ;;  %v379_v38 = vmul.f32 1.442695, %v376_v36 }
 0x1bb   : > { %613 = vpow2.f32 %v377_v37 }
 0x1bc   : > { %615 = vpow2.f32 %v379_v38 }
 0x1c8   : > { %v614_v39 = vpop.eup %613 }
 0x1c9   : > { %v616_v40 = vpop.eup %615  ;;  %v381_v41 = vsel %vm365_vm2, %v614_v39, 0.0 }
 0x1ca   : > { %v382_v42 = vsel %vm365_vm2, %v616_v40, 0.0 }
 0x1cb   : > { %v383_v43 = vadd.f32 %v382_v42, %v381_v41 }
 0x1cd   : > { %v384_v44 = vrot.slane %v383_v43, 4 }
 0x1cf   : > { %v385_v45 = vadd.f32 %v384_v44, %v383_v43 }
 0x1d1   : > { %v386_v46 = vrot.slane %v385_v45, 2 }
 0x1d3   : > { %v387_v47 = vadd.f32 %v386_v46, %v385_v45 }
 0x1d5   : > { %v388_v48 = vrot.slane %v387_v47, 1 }
 0x1d7   : > { %v389_v49 = vadd.f32 %v388_v48, %v387_v47 }
 0x1d9   : > { %617 = vrcp.f32 %v389_v49 }
 0x1e6   : > { %v618_v50 = vpop.eup %617 }
 0x1e7   : > { %v391_v51 = vmul.f32 %v618_v50, %v614_v39  ;;  %v392_v52 = vmul.f32 %v618_v50, %v616_v40 }
 0x1e9   : > { %393 = vxpose.xlu0.b32.start [1/2] (short) (narrow) %v391_v51, 8 }
 0x1ed   : > { %394 = vxpose.xlu0.b32.end [2/2] (short) (narrow) %v392_v52, 8 }
 0x265   : > { %v409_v53 = vpop.trf.xlu0 }
 0x266   : > { %597 = vmatmul.mubr.msk.f32.vlgmr.msra.gmra.mxu0 %vm425_vm3, %v409_v53 }
 0x326   : > { %v495_v54 = vpop.f32.mrf.mxu0 }
 0x327   : > { %500 = vst.msk [vmem:[%s222_s12] sm:$0x1] %vm499_vm4, %v495_v54 }
 0x328   : > { %v598_v55 = vpop.f32.mrf.mxu0 }
 0x329 PF: > { %s17_s20 = sadd.s32 1, %s625_s20  }
 0x32a   : > { %p14_p4 = scmp.ge.s32.totalorder %s17_s20, 4  }
 0x32c   :  { %16 = sbr.rel (!%p14_p4) target bundleno = 3 (0x3), region = 70 }

// kernel: forward.39
= control target key start
LH: loop header
LB: loop body
LE: loop exit
PB: predicated region body
PF: predicated region fallthrough
CT: control target
= control target key end

     0   :  { %vm56_vm0 = vcmask 261120   ;;  %vm157_vm1 = vcmask 523264   ;;  %s466_s1 = inlined_call_operand.vmem [shape: bf16[32,64], index: 1, kind: input, shape index: {}]   ;;  %s467_s0 = inlined_call_operand.vmem [shape: f32[32,32], index: 0, kind: input, shape index: {}]   ;;  %s468_s3 = inlined_call_operand.vmem [shape: bf16[64,32], index: 3, kind: input, shape index: {}]   ;;  %s469_s2 = inlined_call_operand.vmem [shape: f32[1,64], index: 2, kind: input, shape index: {}]   ;;  %s470_s4 = inlined_call_operand.vmem [shape: f32[1,32], index: 4, kind: input, shape index: {}]   ;;  %s471_s5 = inlined_call_operand.vmem [shape: f32[1,32], index: 5, kind: input, shape index: {}]   ;;  %s472_s6 = inlined_call_operand.vmem [shape: f32[1,32], index: 6, kind: input, shape index: {}]   ;;  %s473_s7 = inlined_call_operand.vmem [shape: f32[32,32], index: 7, kind: output, shape index: {}]  }
   0x1   :  { %v344_v0 = vld [vmem:[%s466_s1 + $0x8] sm:$0xff]   ;;  %v345_v1 = vld [vmem:[%s466_s1] sm:$0xff]   ;;  %v29_v4 = vld [vmem:[%s467_s0 + $0x10] sm:$0xff] }
   0x2   :  { %324 = vmatprep.subr.bf16.mxu0 %v344_v0  ;;  %v27_v2 = vld [vmem:[%s467_s0] sm:$0xff]  ;;  %v28_v3 = vld [vmem:[%s467_s0 + $0x8] sm:$0xff]  ;;  %v30_v6 = vld [vmem:[%s467_s0 + $0x18] sm:$0xff] }
   0x3   :  { %325 = vmatpush3.bf16.msra.mxu0 %v344_v0  ;;  %v31_v5 = vpack.c.bf16 %v28_v3, %v27_v2  ;;  %v346_v7 = vld [vmem:[%s468_s3 + $0x18] sm:$0xff]   ;;  %v32_v8 = vpack.c.bf16 %v30_v6, %v29_v4  ;;  %v347_v9 = vld [vmem:[%s468_s3 + $0x10] sm:$0xff]   ;;  %v348_v10 = vld [vmem:[%s468_s3 + $0x8] sm:$0xff]  }
   0x4   :  { %326 = vmatprep.subr.bf16.mxu0 %v345_v1  ;;  %332 = vmatprep.subr.bf16.mxu1 %v346_v7  ;;  %v349_v11 = vld [vmem:[%s468_s3] sm:$0xff]  }
   0x5   :  { %328 = vmatprep.mubr.msk.bf16.mxu0 %vm56_vm0, %v31_v5  ;;  %333 = vmatpush3.bf16.msra.mxu1 %v346_v7  ;;  %v300_v14 = vld [vmem:[%s469_s2] ss:$0 sm:$0xff] }
   0x6   :  { %334 = vmatprep.subr.bf16.mxu1 %v347_v9  ;;  %v305_v27 = vld [vmem:[%s470_s4] ss:$0 sm:$0xff] }
   0x7   :  { %327 = vmatpush3.bf16.msra.mxu0 %v345_v1 }
   0x9   :  { %335 = vmatpush3.bf16.msra.mxu1 %v347_v9 }
   0xa   :  { %329 = vmatmul.mubr.msk.bf16.vlgmr.msra.gmra.mxu0 %vm56_vm0, %v32_v8  ;;  %336 = vmatprep.subr.bf16.mxu1 %v348_v10 }
   0xd   :  { %337 = vmatpush3.bf16.msra.mxu1 %v348_v10 }
   0xe   :  { %338 = vmatprep.subr.bf16.mxu1 %v349_v11 }
  0x11   :  { %339 = vmatpush3.bf16.msra.mxu1 %v349_v11 }
  0xca   :  { %v330_v12 = vpop.f32.mrf.mxu0 }
  0xcb   :  { %v106_v18 = vadd.f32 %v330_v12, %v300_v14 }
  0xcc   :  { %v97_v13 = vpop.f32.mrf.mxu0 }
  0xcd   :  { %v98_v16 = vadd.f32 %v300_v14, %v97_v13  ;;  %v114_v24 = vmax.f32 %v106_v18, 0.0  ;;  %v312_v13 = vld [vmem:[%s471_s5] ss:$0 sm:$0xff] }
  0xce   :  { %v331_v15 = vpop.f32.mrf.mxu0 }
  0xcf   :  { %v109_v17 = vadd.f32 %v331_v15, %v300_v14  ;;  %v112_v22 = vmax.f32 %v98_v16, 0.0  ;;  %v313_v15 = vld [vmem:[%s472_s6] ss:$0 sm:$0xff] }
  0xd0   :  { %v100_v19 = vpop.f32.mrf.mxu0 }
  0xd1   :  { %v101_v20 = vadd.f32 %v300_v14, %v100_v19  ;;  %v115_v21 = vmax.f32 %v109_v17, 0.0 }
  0xd3   :  { %v113_v23 = vmax.f32 %v101_v20, 0.0  ;;  %v117_v26 = vpack.c.bf16 %v115_v21, %v114_v24 }
  0xd5   :  { %v116_v25 = vpack.c.bf16 %v113_v23, %v112_v22 }
  0xd7   :  { %340 = vmatprep.mubr.msk.bf16.mxu1 %vm157_vm1, %v116_v25 }
  0xd8   :  { %341 = vmatmul.mubr.msk.bf16.vlgmr.msra.gmra.mxu1 %vm157_vm1, %v117_v26 }
 0x198   :  { %v342_v28 = vpop.f32.mrf.mxu1 }
 0x199   :  { %v207_v29 = vadd.f32 %v342_v28, %v305_v27 }
 0x19a   :  { %v198_v30 = vpop.f32.mrf.mxu1 }
 0x19b   :  { %v199_v31 = vadd.f32 %v305_v27, %v198_v30  ;;  %v215_v32 = vadd.f32 %v207_v29, %v29_v4 }
 0x19c   :  { %v343_v33 = vpop.f32.mrf.mxu1 }
 0x19d   :  { %v210_v34 = vadd.f32 %v343_v33, %v305_v27  ;;  %v225_v35 = vsel %vm56_vm0, %v215_v32, 0.0  ;;  %v213_v36 = vadd.f32 %v199_v31, %v27_v2 }
 0x19e   :  { %226 = vadd.xlane.f32.xlu1 %v225_v35  ;;  %v201_v37 = vpop.f32.mrf.mxu1 }
 0x19f   :  { %v202_v38 = vadd.f32 %v305_v27, %v201_v37  ;;  %v219_v39 = vsel %vm56_vm0, %v213_v36, 0.0  ;;  %v216_v40 = vadd.f32 %v210_v34, %v30_v6 }
 0x1a0   :  { %220 = vadd.xlane.f32.xlu0 %v219_v39 }
 0x1a1   :  { %v228_v41 = vsel %vm56_vm0, %v216_v40, 0.0  ;;  %v214_v42 = vadd.f32 %v202_v38, %v28_v3 }
 0x1a2   :  { %229 = vadd.xlane.f32.xlu1 %v228_v41 }
 0x1a3   :  { %v222_v43 = vsel %vm56_vm0, %v214_v42, 0.0 }
 0x1a4   :  { %223 = vadd.xlane.f32.xlu0 %v222_v43 }
 0x227   :  { %v227_v44 = vpop.xlane.xlu1 %226 }
 0x228   :  { %v234_v45 = vmul.f32 0.03125, %v227_v44 }
 0x229   :  { %v221_v46 = vpop.xlane.xlu0 %220 }
 0x22a   :  { %v232_v47 = vmul.f32 0.03125, %v221_v46  ;;  %v238_v49 = vsub.f32 %v215_v32, %v234_v45 }
 0x22b   :  { %v230_v48 = vpop.xlane.xlu1 %229 }
 0x22c   :  { %v236_v50 = vsub.f32 %v213_v36, %v232_v47  ;;  %v235_v51 = vmul.f32 0.03125, %v230_v48  ;;  %v242_v58 = vmul.f32 %v238_v49, %v238_v49 }
 0x22d   :  { %v224_v52 = vpop.xlane.xlu0 %223 }
 0x22e   :  { %v233_v53 = vmul.f32 0.03125, %v224_v52  ;;  %v240_v54 = vmul.f32 %v236_v50, %v236_v50  ;;  %v239_v55 = vsub.f32 %v216_v40, %v235_v51  ;;  %v250_v60 = vsel %vm56_vm0, %v242_v58, 0.0 }
 0x230   :  { %v237_v56 = vsub.f32 %v214_v42, %v233_v53  ;;  %v244_v57 = vsel %vm56_vm0, %v240_v54, 0.0  ;;  %v243_v62 = vmul.f32 %v239_v55, %v239_v55 }
 0x231   :  { %245 = vadd.xlane.f32.xlu0 %v244_v57 }
 0x232   :  { %v241_v59 = vmul.f32 %v237_v56, %v237_v56  ;;  %v253_v63 = vsel %vm56_vm0, %v243_v62, 0.0 }
 0x234   :  { %v247_v61 = vsel %vm56_vm0, %v241_v59, 0.0 }
 0x235   :  { %251 = vadd.xlane.f32.xlu0 %v250_v60  ;;  %248 = vadd.xlane.f32.xlu1 %v247_v61 }
 0x239   :  { %254 = vadd.xlane.f32.xlu1 %v253_v63 }
 0x2ba   :  { %v246_v0 = vpop.xlane.xlu0 %245 }
 0x2bb   :  { %v256_v1 = vmul.f32 0.03125, %v246_v0 }
 0x2bd   :  { %v260_v2 = vadd.f32 1e-06, %v256_v1 }
 0x2be   :  { %v249_v3 = vpop.xlane.xlu1 %248  ;;  %v252_v4 = vpop.xlane.xlu0 %251 }
 0x2bf   :  { %350 = vrsqrt.f32 %v260_v2  ;;  %v257_v5 = vmul.f32 0.03125, %v249_v3  ;;  %v258_v6 = vmul.f32 0.03125, %v252_v4 }
 0x2c1   :  { %v261_v7 = vadd.f32 1e-06, %v257_v5  ;;  %v262_v8 = vadd.f32 1e-06, %v258_v6 }
 0x2c2   :  { %v255_v9 = vpop.xlane.xlu1 %254 }
 0x2c3   :  { %352 = vrsqrt.f32 %v261_v7  ;;  %v259_v10 = vmul.f32 0.03125, %v255_v9 }
 0x2c4   :  { %354 = vrsqrt.f32 %v262_v8 }
 0x2c5   :  { %v263_v11 = vadd.f32 1e-06, %v259_v10 }
 0x2c7   :  { %356 = vrsqrt.f32 %v263_v11 }
 0x2cc   :  { %v351_v12 = vpop.eup %350 }
 0x2cd   :  { %v268_v14 = vmul.f32 %v351_v12, %v236_v50 }
 0x2cf   :  { %v278_v16 = vmul.f32 %v312_v13, %v268_v14 }
 0x2d0   :  { %v353_v17 = vpop.eup %352 }
 0x2d1   :  { %v355_v18 = vpop.eup %354  ;;  %v288_v19 = vadd.f32 %v313_v15, %v278_v16  ;;  %v269_v20 = vmul.f32 %v353_v17, %v237_v56 }
 0x2d2   :  { %v270_v21 = vmul.f32 %v355_v18, %v238_v49 }
 0x2d3   :  { %292 = vst.msk [vmem:[%s473_s7] sm:$0xff] %vm56_vm0, %v288_v19  ;;  %v279_v22 = vmul.f32 %v312_v13, %v269_v20 }
 0x2d4   :  { %v357_v23 = vpop.eup %356  ;;  %v280_v24 = vmul.f32 %v312_v13, %v270_v21 }
 0x2d5   :  { %v289_v25 = vadd.f32 %v313_v15, %v279_v22  ;;  %v271_v26 = vmul.f32 %v357_v23, %v239_v55 }
 0x2d6   :  { %v290_v27 = vadd.f32 %v313_v15, %v280_v24 }
 0x2d7   :  { %293 = vst.msk [vmem:[%s473_s7 + $0x8] sm:$0xff] %vm56_vm0, %v289_v25  ;;  %v281_v28 = vmul.f32 %v312_v13, %v271_v26 }
 0x2d8   :  { %294 = vst.msk [vmem:[%s473_s7 + $0x10] sm:$0xff] %vm56_vm0, %v290_v27 }
 0x2d9   :  { %v291_v29 = vadd.f32 %v313_v15, %v281_v28 }
 0x2db   :  { %295 = vst.msk [vmem:[%s473_s7 + $0x18] sm:$0xff] %vm56_vm0, %v291_v29 }

// kernel: forward.38
= control target key start
LH: loop header
LB: loop body
LE: loop exit
PB: predicated region body
PF: predicated region fallthrough
CT: control target
= control target key end

     0   :  { %s1542_s30 = smov 0   ;;  %s1726_s0 = inlined_call_operand.vmem [shape: f32[2,4,16,8], index: 0, kind: input, shape index: {}]   ;;  %s1727_s1 = inlined_call_operand.vmem [shape: f32[2,4,8,8], index: 1, kind: input, shape index: {}]   ;;  %s1728_s2 = inlined_call_operand.vmem [shape: f32[2,4,8,8], index: 2, kind: input, shape index: {}]   ;;  %s1729_s3 = inlined_call_operand.vmem [shape: f32[2,1,8], index: 3, kind: input, shape index: {}]   ;;  %s1730_s4 = inlined_call_operand.vmem [shape: f32[2,16,32], index: 4, kind: input, shape index: {}]   ;;  %s1731_s5 = inlined_call_operand.vmem [shape: bf16[4,8,32], index: 5, kind: input, shape index: {}]   ;;  %s1732_s6 = inlined_call_operand.vmem [shape: f32[1,32], index: 6, kind: input, shape index: {}]   ;;  %s1733_s7 = inlined_call_operand.vmem [shape: f32[1,32], index: 7, kind: input, shape index: {}]   ;;  %s1734_s8 = inlined_call_operand.vmem [shape: f32[1,32], index: 8, kind: input, shape index: {}]   ;;  %s1735_s9 = inlined_call_operand.vmem [shape: f32[2,16,32], index: 9, kind: output, shape index: {}]  }
   0x1 LB: > { %s1301_s10 = sadd.s32 4294967295, %s1487_s30   ;;  %p1305_p0 = scmp.ge.s32.totalorder %s1487_s30, 1  ;;  %s1487_s30 = sphi %s1542_s30, %s19_s30  }
   0x2   : > { %p325_p1 = scmp.lt.s32.totalorder %s1487_s30, 3 }
   0x4   : > { %p326_p2 = pnand %p1305_p0, %p325_p1 }
   0x5   : > { %p379_p3 = scmp.lt.s32.totalorder (!%p326_p2), %s1301_s10, 1 }
   0x6   : > { %329 = sbr.rel (%p326_p2) target bundleno = 1262 (0x4ee), region = 56 }
   0xb   : > { %v1489_v0 = vmov 0.0   ;;  %s1737_s10 = smov (!%p379_p3, %s1301_s10), 1  ;;  %vm1490_vm0 = vmmov 0   ;;  %vm444_vm1 = vcmask 64512   ;;  %v636_v33 = vlaneseq }
   0xc   : > { %1362 = vmatprep.subr.bf16.mxu0 %v1489_v0  ;;  %1368 = vmatprep.subr.bf16.mxu1 %v1489_v0  ;;  %s1333_s11 = sshll.u32 %s1737_s10, 6  ;;  %s1334_s12 = sshll.u32 %s1737_s10, 5  ;;  %v1491_v37 = vmov 0   ;;  %vm744_vm4 = vcmask 1043456   ;;  %vm1126_vm5 = vcmask 261120  }
   0xd   : > { %1364 = vmatprep.mubr.msk.bf16.mxu0 %vm1490_vm0, %v1489_v0  ;;  %1370 = vmatprep.mubr.msk.bf16.mxu1 %vm1490_vm0, %v1489_v0  ;;  %s383_s15 = scalar_lea.vmem %s1726_s0, %s1333_s11  ;;  %s388_s18 = scalar_lea.vmem %s1727_s1, %s1334_s12  ;;  %v637_v35 = vshrl.u32 %v636_v33, 7 }
   0xe   : > { %v428_v1 = vld [vmem:[%s388_s18] sm:$0xff]  ;;  %v429_v2 = vld [vmem:[%s388_s18 + $0x8] sm:$0xff]  ;;  %v410_v7 = vld [vmem:[%s383_s15 + $0x10] sm:$0xff]  ;;  %s396_s21 = scalar_lea.vmem %s1729_s3, %s1737_s10  ;;  %s1633_s24 = scalar_lea.vmem %s1728_s2, %s1334_s12 }
   0xf   : > { %v408_v3 = vld [vmem:[%s383_s15] sm:$0xff]  ;;  %v432_v4 = vpack.c.bf16 %v428_v1, %v428_v1  ;;  %v433_v5 = vpack.c.bf16 %v429_v2, %v429_v2  ;;  %v409_v6 = vld [vmem:[%s383_s15 + $0x8] sm:$0xff]  ;;  %v411_v8 = vld [vmem:[%s383_s15 + $0x18] sm:$0xff]  ;;  %v418_v11 = vmul.f32 0.35355338, %v410_v7  ;;  %v638_v36 = vsub.s32 0, %v637_v35 }
  0x10   : > { %v416_v9 = vmul.f32 0.35355338, %v408_v3  ;;  %v417_v10 = vmul.f32 0.35355338, %v409_v6  ;;  %v419_v14 = vmul.f32 0.35355338, %v411_v8 }
  0x11   : > { %v449_v12 = vsel %vm444_vm1, %v432_v4, 0  ;;  %v496_v13 = vsel %vm444_vm1, %v433_v5, 0  ;;  %v430_v15 = vld [vmem:[%s388_s18 + $0x10] sm:$0xff]  ;;  %v431_v16 = vld [vmem:[%s388_s18 + $0x18] sm:$0xff]  ;;  %v412_v21 = vld [vmem:[%s383_s15 + $0x20] sm:$0xff]  ;;  %s1336_s14 = sshll.u32 %s1737_s10, 4 }
  0x12   : > { %1363 = vmatpush3.bf16.xpose.msra.mxu0 %v449_v12  ;;  %1369 = vmatpush3.bf16.xpose.msra.mxu1 %v496_v13  ;;  %v434_v17 = vpack.c.bf16 %v430_v15, %v430_v15  ;;  %v435_v18 = vpack.c.bf16 %v431_v16, %v431_v16  ;;  %v424_v19 = vpack.c.bf16 %v417_v10, %v416_v9  ;;  %v413_v22 = vld [vmem:[%s383_s15 + $0x28] sm:$0xff]  ;;  %v414_v23 = vld [vmem:[%s383_s15 + $0x30] sm:$0xff]  ;;  %v415_v24 = vld [vmem:[%s383_s15 + $0x38] sm:$0xff]  ;;  %v420_v27 = vmul.f32 0.35355338, %v412_v21  ;;  %s401_s17 = scalar_lea.vmem %s1730_s4, %s1336_s14  ;;  %s406_s26 = scalar_lea.vmem %s1735_s9, %s1336_s14 }
  0x13   : > { %1374 = vmatprep.subr.bf16.mxu0 %v1489_v0  ;;  %1380 = vmatprep.subr.bf16.mxu1 %v1489_v0  ;;  %v425_v20 = vpack.c.bf16 %v419_v14, %v418_v11  ;;  %v421_v28 = vmul.f32 0.35355338, %v413_v22  ;;  %v422_v29 = vmul.f32 0.35355338, %v414_v23  ;;  %v423_v30 = vmul.f32 0.35355338, %v415_v24 }
  0x14   : > { %v543_v25 = vsel %vm444_vm1, %v434_v17, 0  ;;  %v590_v26 = vsel %vm444_vm1, %v435_v18, 0  ;;  %v633_v34 = vld [vmem:[%s396_s21] sm:$0x1] }
  0x15   : > { %v426_v31 = vpack.c.bf16 %v421_v28, %v420_v27  ;;  %v427_v32 = vpack.c.bf16 %v423_v30, %v422_v29  ;;  %vm634_vm2 = vcmp.gt.f32.partialorder %v633_v34, 0.5 }
  0x16   : > { %v635_v38 = vsel %vm634_vm2, 1, %v1491_v37 }
  0x17   : > { %v639_v39 = vrot.slane %v635_v38, %v638_v36 }
  0x19   : > { %1365 = vmatmul.mubr.msk.bf16.vlgmr.msra.gmra.mxu0 %vm444_vm1, %v424_v19  ;;  %1371 = vmatmul.mubr.msk.bf16.vlgmr.msra.gmra.mxu1 %vm444_vm1, %v425_v20  ;;  %vm640_vm3 = vcmp.eq.s32.totalorder %v639_v39, 1 }
  0x1a   : > { %1375 = vmatpush3.bf16.xpose.msra.mxu0 %v543_v25  ;;  %1381 = vmatpush3.bf16.xpose.msra.mxu1 %v590_v26 }
  0x1b   : > { %1376 = vmatprep.mubr.msk.bf16.mxu0 %vm1490_vm0, %v1489_v0  ;;  %1382 = vmatprep.mubr.msk.bf16.mxu1 %vm1490_vm0, %v1489_v0 }
  0x1c   : > { %1386 = vmatprep.subr.bf16.mxu0 %v1489_v0  ;;  %1392 = vmatprep.subr.bf16.mxu1 %v1489_v0 }
  0x21   : > { %1377 = vmatmul.mubr.msk.bf16.vlgmr.msra.gmra.mxu0 %vm444_vm1, %v426_v31  ;;  %1383 = vmatmul.mubr.msk.bf16.vlgmr.msra.gmra.mxu1 %vm444_vm1, %v427_v32 }
  0x22   : > { %1388 = vmatprep.mubr.msk.bf16.mxu0 %vm1490_vm0, %v1489_v0  ;;  %1394 = vmatprep.mubr.msk.bf16.mxu1 %vm1490_vm0, %v1489_v0 }
  0xd9   : > { %v485_v40 = vpop.f32.mrf.mxu0  ;;  %v532_v41 = vpop.f32.mrf.mxu1 }
  0xda   : > { %v641_v42 = vsel %vm640_vm3, -1e+09, %v485_v40  ;;  %v643_v43 = vsel %vm640_vm3, -1e+09, %v532_v41 }
  0xdb   : > { %v1366_v44 = vpop.f32.mrf.mxu0  ;;  %v1372_v45 = vpop.f32.mrf.mxu1  ;;  %v655_v46 = vsel %vm444_vm1, %v643_v43, -inf  ;;  %v649_v47 = vsel %vm444_vm1, %v641_v42, -inf }
  0xdc   : > { %656 = vmax.xlane.f32.xlu1 %v655_v46  ;;  %650 = vmax.xlane.f32.xlu0 %v649_v47 }
  0xdd   : > { %v488_v48 = vpop.f32.mrf.mxu0  ;;  %v535_v49 = vpop.f32.mrf.mxu1 }
  0xde   : > { %v642_v50 = vsel %vm640_vm3, -1e+09, %v488_v48  ;;  %v644_v51 = vsel %vm640_vm3, -1e+09, %v535_v49  ;;  %v436_v49 = vld [vmem:[%s1633_s24] sm:$0xff] }
  0xdf   : > { %v1367_v52 = vpop.f32.mrf.mxu0  ;;  %v1373_v53 = vpop.f32.mrf.mxu1  ;;  %v658_v54 = vsel %vm444_vm1, %v644_v51, -inf  ;;  %v652_v55 = vsel %vm444_vm1, %v642_v50, -inf }
  0xe0   : > { %659 = vmax.xlane.f32.xlu1 %v658_v54  ;;  %653 = vmax.xlane.f32.xlu0 %v652_v55 }
  0xe1   : > { %v579_v56 = vpop.f32.mrf.mxu0  ;;  %v626_v57 = vpop.f32.mrf.mxu1 }
  0xe2   : > { %v645_v58 = vsel %vm640_vm3, -1e+09, %v579_v56  ;;  %v647_v59 = vsel %vm640_vm3, -1e+09, %v626_v57 }
  0xe3   : > { %v1378_v60 = vpop.f32.mrf.mxu0  ;;  %v1384_v61 = vpop.f32.mrf.mxu1  ;;  %v661_v62 = vsel %vm444_vm1, %v645_v58, -inf  ;;  %v667_v2 = vsel %vm444_vm1, %v647_v59, -inf }
  0xe4   : > { %662 = vmax.xlane.f32.xlu0 %v661_v62  ;;  %v438_v62 = vld [vmem:[%s1633_s24 + $0x10] sm:$0xff] }
  0xe5   : > { %v582_v63 = vpop.f32.mrf.mxu0  ;;  %v629_v1 = vpop.f32.mrf.mxu1 }
  0xe6   : > { %v646_v3 = vsel %vm640_vm3, -1e+09, %v582_v63  ;;  %v648_v7 = vsel %vm640_vm3, -1e+09, %v629_v1 }
  0xe7   : > { %v1379_v4 = vpop.f32.mrf.mxu0  ;;  %v1385_v5 = vpop.f32.mrf.mxu1  ;;  %v664_v6 = vsel %vm444_vm1, %v646_v3, -inf  ;;  %v670_v8 = vsel %vm444_vm1, %v648_v7, -inf }
  0xe8   : > { %668 = vmax.xlane.f32.xlu0 %v667_v2  ;;  %665 = vmax.xlane.f32.xlu1 %v664_v6  ;;  %v442_v2 = vpack.c.bf16 %v438_v62, %v438_v62  ;;  %v439_v4 = vld [vmem:[%s1633_s24 + $0x18] sm:$0xff] }
  0xec   : > { %671 = vmax.xlane.f32.xlu1 %v670_v8 }
 0x165   : > { %v657_v9 = vpop.xlane.xlu1 %656  ;;  %v651_v10 = vpop.xlane.xlu0 %650 }
 0x166   : > { %v675_v11 = vsub.f32 %v643_v43, %v657_v9  ;;  %v673_v12 = vsub.f32 %v641_v42, %v651_v10  ;;  %v840_v9 = vsel %vm744_vm4, %v442_v2, 0  ;;  %v443_v10 = vpack.c.bf16 %v439_v4, %v439_v4 }
 0x168   : > { %v681_v13 = vmul.f32 1.442695, %v673_v12  ;;  %v685_v14 = vmul.f32 1.442695, %v675_v11 }
 0x169   : > { %v660_v15 = vpop.xlane.xlu1 %659  ;;  %v654_v16 = vpop.xlane.xlu0 %653 }
 0x16a   : > { %v676_v17 = vsub.f32 %v644_v51, %v660_v15  ;;  %v674_v18 = vsub.f32 %v642_v50, %v654_v16  ;;  %1445 = vpow2.f32 %v681_v13  ;;  %v437_v50 = vld [vmem:[%s1633_s24 + $0x8] sm:$0xff]  ;;  %v440_v51 = vpack.c.bf16 %v436_v49, %v436_v49 }
 0x16b   : > { %1447 = vpow2.f32 %v685_v14  ;;  %v441_v52 = vpack.c.bf16 %v437_v50, %v437_v50  ;;  %v887_v16 = vsel %vm744_vm4, %v443_v10, 0 }
 0x16c   : > { %v683_v19 = vmul.f32 1.442695, %v674_v18  ;;  %v687_v20 = vmul.f32 1.442695, %v676_v17  ;;  %v746_v53 = vsel %vm744_vm4, %v440_v51, 0 }
 0x16d   : > { %v663_v21 = vpop.xlane.xlu0 %662  ;;  %v793_v54 = vsel %vm744_vm4, %v441_v52, 0  ;;  %1387 = vmatpush3.bf16.msra.mxu0 %v746_v53 }
 0x16e   : > { %v677_v22 = vsub.f32 %v645_v58, %v663_v21  ;;  %1449 = vpow2.f32 %v683_v19  ;;  %1393 = vmatpush3.bf16.msra.mxu1 %v793_v54  ;;  %1398 = vmatprep.subr.bf16.mxu0 %v1489_v0 }
 0x16f   : > { %1451 = vpow2.f32 %v687_v20  ;;  %1404 = vmatprep.subr.bf16.mxu1 %v1489_v0 }
 0x170   : > { %v689_v23 = vmul.f32 1.442695, %v677_v22 }
 0x171   : > { %v669_v24 = vpop.xlane.xlu0 %668  ;;  %v666_v25 = vpop.xlane.xlu1 %665 }
 0x172   : > { %1453 = vpow2.f32 %v689_v23  ;;  %v679_v26 = vsub.f32 %v647_v59, %v669_v24  ;;  %v678_v27 = vsub.f32 %v646_v3, %v666_v25 }
 0x174   : > { %v693_v28 = vmul.f32 1.442695, %v679_v26  ;;  %v691_v29 = vmul.f32 1.442695, %v678_v27  ;;  %v934_v26 = vld [vmem:[%s1731_s5] sm:$0xf] }
 0x175   : > { %v672_v30 = vpop.xlane.xlu1 %671  ;;  %v942_v27 = vsel %vm744_vm4, %v934_v26, 0 }
 0x176   : > { %1455 = vpow2.f32 %v693_v28  ;;  %v680_v31 = vsub.f32 %v648_v7, %v672_v30  ;;  %v935_v28 = vld [vmem:[%s1731_s5 + $0x4] sm:$0xf] }
 0x177   : > { %1457 = vpow2.f32 %v691_v29  ;;  %v1446_v32 = vpop.eup %1445  ;;  %v989_v29 = vsel %vm744_vm4, %v935_v28, 0 }
 0x178   : > { %v695_v33 = vmul.f32 1.442695, %v680_v31  ;;  %v697_v34 = vsel %vm444_vm1, %v1446_v32, 0.0  ;;  %v1609_v35 = vpop.eup %1447 }
 0x179   : > { %698 = vadd.xlane.f32.xlu0 %v697_v34  ;;  %v703_v37 = vsel %vm444_vm1, %v1609_v35, 0.0 }
 0x17a   : > { %1459 = vpow2.f32 %v695_v33 }
 0x17b   : > { %v1450_v36 = vpop.eup %1449 }
 0x17c   : > { %v700_v38 = vsel %vm444_vm1, %v1450_v36, 0.0  ;;  %v1452_v39 = vpop.eup %1451 }
 0x17d   : > { %704 = vadd.xlane.f32.xlu0 %v703_v37  ;;  %701 = vadd.xlane.f32.xlu1 %v700_v38  ;;  %v706_v42 = vsel %vm444_vm1, %v1452_v39, 0.0 }
 0x17f   : > { %v1614_v40 = vpop.eup %1453 }
 0x180   : > { %v709_v41 = vsel %vm444_vm1, %v1614_v40, 0.0 }
 0x181   : > { %710 = vadd.xlane.f32.xlu0 %v709_v41  ;;  %707 = vadd.xlane.f32.xlu1 %v706_v42 }
 0x183   : > { %v1619_v43 = vpop.eup %1455 }
 0x184   : > { %v1458_v44 = vpop.eup %1457  ;;  %v715_v45 = vsel %vm444_vm1, %v1619_v43, 0.0 }
 0x185   : > { %v712_v46 = vsel %vm444_vm1, %v1458_v44, 0.0  ;;  %716 = vadd.xlane.f32.xlu0 %v715_v45 }
 0x186   : > { %713 = vadd.xlane.f32.xlu1 %v712_v46 }
 0x187   : > { %v1624_v47 = vpop.eup %1459 }
 0x188   : > { %v718_v48 = vsel %vm444_vm1, %v1624_v47, 0.0 }
 0x18a   : > { %719 = vadd.xlane.f32.xlu1 %v718_v48 }
 0x202   : > { %v699_v55 = vpop.xlane.xlu0 %698 }
 0x203   : > { %1461 = vrcp.f32 %v699_v55 }
 0x206   : > { %v705_v56 = vpop.xlane.xlu0 %704  ;;  %v702_v57 = vpop.xlane.xlu1 %701 }
 0x207   : > { %1463 = vrcp.f32 %v702_v57 }
 0x208   : > { %1465 = vrcp.f32 %v705_v56 }
 0x20a   : > { %v711_v58 = vpop.xlane.xlu0 %710  ;;  %v708_v59 = vpop.xlane.xlu1 %707 }
 0x20b   : > { %1467 = vrcp.f32 %v708_v59 }
 0x20c   : > { %1469 = vrcp.f32 %v711_v58 }
 0x20e   : > { %v717_v60 = vpop.xlane.xlu0 %716 }
 0x20f   : > { %v714_v61 = vpop.xlane.xlu1 %713 }
 0x210   : > { %1471 = vrcp.f32 %v714_v61  ;;  %v1462_v1 = vpop.eup %1461 }
 0x211   : > { %1473 = vrcp.f32 %v717_v60  ;;  %v729_v5 = vmul.f32 %v1462_v1, %v1446_v32  ;;  %v936_v32 = vld [vmem:[%s1731_s5 + $0x8] sm:$0xf] }
 0x213   : > { %v720_v63 = vpop.xlane.xlu1 %719 }
 0x214   : > { %1475 = vrcp.f32 %v720_v63  ;;  %v1464_v3 = vpop.eup %1463 }
 0x215   : > { %v730_v6 = vmul.f32 %v1464_v3, %v1450_v36  ;;  %v1466_v7 = vpop.eup %1465  ;;  %v1036_v36 = vsel %vm744_vm4, %v936_v32, 0 }
 0x216   : > { %v731_v12 = vmul.f32 %v1466_v7, %v1609_v35 }
 0x217   : > { %v737_v8 = vpack.c.bf16 %v730_v6, %v729_v5 }
 0x218   : > { %v1468_v11 = vpop.eup %1467 }
 0x219   : > { %1389 = vmatmul.mubr.msk.bf16.vlgmr.msra.gmra.mxu0 %vm444_vm1, %v737_v8  ;;  %v732_v13 = vmul.f32 %v1468_v11, %v1452_v39  ;;  %v1470_v14 = vpop.eup %1469  ;;  %v937_v39 = vld [vmem:[%s1731_s5 + $0xc] sm:$0xf]  ;;  %v1328_v11 = vld [vmem:[%s1732_s6] ss:$0 sm:$0xff] }
 0x21a   : > { %1399 = vmatpush3.bf16.msra.mxu0 %v840_v9  ;;  %1400 = vmatprep.mubr.msk.bf16.mxu0 %vm1490_vm0, %v1489_v0  ;;  %v733_v19 = vmul.f32 %v1470_v14, %v1614_v40 }
 0x21b   : > { %v738_v15 = vpack.c.bf16 %v732_v13, %v731_v12  ;;  %1410 = vmatprep.subr.bf16.mxu0 %v1489_v0 }
 0x21d   : > { %v1472_v17 = vpop.eup %1471  ;;  %1395 = vmatmul.mubr.msk.bf16.vlgmr.msra.gmra.mxu1 %vm444_vm1, %v738_v15 }
 0x21e   : > { %v1474_v18 = vpop.eup %1473  ;;  %v734_v20 = vmul.f32 %v1472_v17, %v1458_v44  ;;  %1405 = vmatpush3.bf16.msra.mxu1 %v887_v16  ;;  %1406 = vmatprep.mubr.msk.bf16.mxu1 %vm1490_vm0, %v1489_v0  ;;  %v1150_v16 = vld [vmem:[%s401_s17] sm:$0xff] }
 0x21f   : > { %1416 = vmatprep.subr.bf16.mxu1 %v1489_v0  ;;  %v735_v23 = vmul.f32 %v1474_v18, %v1619_v43  ;;  %v1083_v43 = vsel %vm744_vm4, %v937_v39, 0 }
 0x220   : > { %v739_v22 = vpack.c.bf16 %v734_v20, %v733_v19 }
 0x221   : > { %v1476_v21 = vpop.eup %1475 }
 0x222   : > { %v736_v24 = vmul.f32 %v1476_v21, %v1624_v47  ;;  %1401 = vmatmul.mubr.msk.bf16.vlgmr.msra.gmra.mxu0 %vm444_vm1, %v739_v22 }
 0x223   : > { %1412 = vmatprep.mubr.msk.bf16.mxu0 %vm1490_vm0, %v1489_v0  ;;  %1411 = vmatpush3.bf16.msra.mxu0 %v942_v27 }
 0x224   : > { %v740_v25 = vpack.c.bf16 %v736_v24, %v735_v23  ;;  %1422 = vmatprep.subr.bf16.mxu0 %v1489_v0  ;;  %v1151_v24 = vld [vmem:[%s401_s17 + $0x8] sm:$0xff] }
 0x226   : > { %1407 = vmatmul.mubr.msk.bf16.vlgmr.msra.gmra.mxu1 %vm444_vm1, %v740_v25 }
 0x227   : > { %1418 = vmatprep.mubr.msk.bf16.mxu1 %vm1490_vm0, %v1489_v0  ;;  %1417 = vmatpush3.bf16.msra.mxu1 %v989_v29 }
 0x228   : > { %1428 = vmatprep.subr.bf16.mxu1 %v1489_v0 }
 0x2d9   : > { %v782_v30 = vpop.f32.mrf.mxu0 }
 0x2db   : > { %v1390_v31 = vpop.f32.mrf.mxu0 }
 0x2dd   : > { %v785_v33 = vpop.f32.mrf.mxu0  ;;  %v829_v34 = vpop.f32.mrf.mxu1 }
 0x2de   : > { %v930_v35 = vpack.c.bf16 %v785_v33, %v782_v30 }
 0x2df   : > { %v1391_v37 = vpop.f32.mrf.mxu0  ;;  %v1396_v38 = vpop.f32.mrf.mxu1 }
 0x2e0   : > { %1413 = vmatmul.mubr.msk.bf16.vlgmr.msra.gmra.mxu0 %vm444_vm1, %v930_v35 }
 0x2e1   : > { %v832_v40 = vpop.f32.mrf.mxu1  ;;  %1423 = vmatpush3.bf16.msra.mxu0 %v1036_v36  ;;  %1424 = vmatprep.mubr.msk.bf16.mxu0 %vm1490_vm0, %v1489_v0 }
 0x2e2   : > { %v876_v41 = vpop.f32.mrf.mxu0  ;;  %v931_v42 = vpack.c.bf16 %v832_v40, %v829_v34 }
 0x2e3   : > { %v1397_v44 = vpop.f32.mrf.mxu1 }
 0x2e4   : > { %v1402_v45 = vpop.f32.mrf.mxu0  ;;  %1419 = vmatmul.mubr.msk.bf16.vlgmr.msra.gmra.mxu1 %vm444_vm1, %v931_v42 }
 0x2e5   : > { %1429 = vmatpush3.bf16.msra.mxu1 %v1083_v43  ;;  %1430 = vmatprep.mubr.msk.bf16.mxu1 %vm1490_vm0, %v1489_v0 }
 0x2e6   : > { %v879_v46 = vpop.f32.mrf.mxu0  ;;  %v923_v47 = vpop.f32.mrf.mxu1 }
 0x2e7   : > { %v932_v48 = vpack.c.bf16 %v879_v46, %v876_v41  ;;  %v1329_v46 = vld [vmem:[%s1733_s7] ss:$0 sm:$0xff] }
 0x2e8   : > { %v1403_v49 = vpop.f32.mrf.mxu0  ;;  %v1408_v50 = vpop.f32.mrf.mxu1 }
 0x2e9   : > { %1425 = vmatmul.mubr.msk.bf16.vlgmr.msra.gmra.mxu0 %vm444_vm1, %v932_v48  ;;  %v1330_v48 = vld [vmem:[%s1734_s8] ss:$0 sm:$0xff] }
 0x2ea   : > { %v926_v51 = vpop.f32.mrf.mxu1 }
 0x2eb   : > { %v933_v52 = vpack.c.bf16 %v926_v51, %v923_v47 }
 0x2ec   : > { %v1409_v53 = vpop.f32.mrf.mxu1 }
 0x2ed   : > { %1431 = vmatmul.mubr.msk.bf16.vlgmr.msra.gmra.mxu1 %vm444_vm1, %v933_v52 }
 0x3a0   : > { %v978_v54 = vpop.f32.mrf.mxu0 }
 0x3a1   : > { %v1127_v62 = vsel %vm1126_vm5, %v978_v54, 0.0 }
 0x3a2   : > { %v1414_v55 = vpop.f32.mrf.mxu0 }
 0x3a4   : > { %v981_v56 = vpop.f32.mrf.mxu0  ;;  %v1025_v57 = vpop.f32.mrf.mxu1 }
 0x3a5   : > { %v1128_v0 = vsel %vm1126_vm5, %v1025_v57, 0.0  ;;  %v1134_v8 = vsel %vm1126_vm5, %v981_v56, 0.0 }
 0x3a6   : > { %v1415_v58 = vpop.f32.mrf.mxu0  ;;  %v1420_v59 = vpop.f32.mrf.mxu1  ;;  %v1129_v1 = vadd.f32 %v1128_v0, %v1127_v62 }
 0x3a8   : > { %v1028_v60 = vpop.f32.mrf.mxu1 }
 0x3a9   : > { %v1072_v61 = vpop.f32.mrf.mxu0  ;;  %v1135_v4 = vsel %vm1126_vm5, %v1028_v60, 0.0 }
 0x3aa   : > { %v1130_v63 = vsel %vm1126_vm5, %v1072_v61, 0.0  ;;  %v1421_v2 = vpop.f32.mrf.mxu1  ;;  %v1136_v12 = vadd.f32 %v1135_v4, %v1134_v8 }
 0x3ab   : > { %v1426_v3 = vpop.f32.mrf.mxu0  ;;  %v1131_v5 = vadd.f32 %v1130_v63, %v1129_v1 }
 0x3ad   : > { %v1075_v6 = vpop.f32.mrf.mxu0  ;;  %v1119_v7 = vpop.f32.mrf.mxu1 }
 0x3ae   : > { %v1137_v9 = vsel %vm1126_vm5, %v1075_v6, 0.0  ;;  %v1132_v10 = vsel %vm1126_vm5, %v1119_v7, 0.0 }
 0x3af   : > { %v1133_v13 = vadd.f32 %v1132_v10, %v1131_v5  ;;  %v1427_v14 = vpop.f32.mrf.mxu0  ;;  %v1432_v15 = vpop.f32.mrf.mxu1  ;;  %v1138_v17 = vadd.f32 %v1137_v9, %v1136_v12 }
 0x3b1   : > { %v1148_v18 = vadd.f32 %v1328_v11, %v1133_v13  ;;  %v1122_v19 = vpop.f32.mrf.mxu1 }
 0x3b2   : > { %v1139_v20 = vsel %vm1126_vm5, %v1122_v19, 0.0 }
 0x3b3   : > { %v1140_v21 = vadd.f32 %v1139_v20, %v1138_v17  ;;  %v1433_v22 = vpop.f32.mrf.mxu1  ;;  %v1152_v23 = vadd.f32 %v1150_v16, %v1148_v18 }
 0x3b5   : > { %v1149_v25 = vadd.f32 %v1328_v11, %v1140_v21  ;;  %v1156_v26 = vsel %vm1126_vm5, %v1152_v23, 0.0 }
 0x3b6   : > { %1157 = vadd.xlane.f32.xlu0 %v1156_v26 }
 0x3b7   : > { %v1153_v27 = vadd.f32 %v1151_v24, %v1149_v25 }
 0x3b9   : > { %v1159_v28 = vsel %vm1126_vm5, %v1153_v27, 0.0 }
 0x3ba   : > { %1160 = vadd.xlane.f32.xlu1 %v1159_v28 }
 0x43f   : > { %v1158_v29 = vpop.xlane.xlu0 %1157 }
 0x440   : > { %v1163_v30 = vmul.f32 0.03125, %v1158_v29 }
 0x442   : > { %v1165_v31 = vsub.f32 %v1152_v23, %v1163_v30 }
 0x443   : > { %v1161_v32 = vpop.xlane.xlu1 %1160 }
 0x444   : > { %v1164_v33 = vmul.f32 0.03125, %v1161_v32  ;;  %v1167_v34 = vmul.f32 %v1165_v31, %v1165_v31 }
 0x446   : > { %v1166_v35 = vsub.f32 %v1153_v27, %v1164_v33  ;;  %v1169_v36 = vsel %vm1126_vm5, %v1167_v34, 0.0 }
 0x447   : > { %1170 = vadd.xlane.f32.xlu0 %v1169_v36 }
 0x448   : > { %v1168_v37 = vmul.f32 %v1166_v35, %v1166_v35 }
 0x44a   : > { %v1172_v38 = vsel %vm1126_vm5, %v1168_v37, 0.0 }
 0x44b   : > { %1173 = vadd.xlane.f32.xlu1 %v1172_v38 }
 0x4d0   : > { %v1171_v39 = vpop.xlane.xlu0 %1170 }
 0x4d1   : > { %v1175_v40 = vmul.f32 0.03125, %v1171_v39 }
 0x4d3   : > { %v1177_v41 = vadd.f32 1e-06, %v1175_v40 }
 0x4d4   : > { %v1174_v42 = vpop.xlane.xlu1 %1173 }
 0x4d5   : > { %1477 = vrsqrt.f32 %v1177_v41  ;;  %v1176_v43 = vmul.f32 0.03125, %v1174_v42 }
 0x4d7   : > { %v1178_v44 = vadd.f32 1e-06, %v1176_v43 }
 0x4d9   : > { %1479 = vrsqrt.f32 %v1178_v44 }
 0x4e2   : > { %v1478_v45 = vpop.eup %1477 }
 0x4e3   : > { %v1181_v47 = vmul.f32 %v1478_v45, %v1165_v31 }
 0x4e5   : > { %v1189_v49 = vmul.f32 %v1329_v46, %v1181_v47 }
 0x4e6   : > { %v1480_v50 = vpop.eup %1479 }
 0x4e7   : > { %v1197_v51 = vadd.f32 %v1330_v48, %v1189_v49  ;;  %v1182_v52 = vmul.f32 %v1480_v50, %v1166_v35 }
 0x4e9   : > { %1199 = vst.msk [vmem:[%s406_s26] sm:$0xff] %vm1126_vm5, %v1197_v51  ;;  %v1190_v53 = vmul.f32 %v1329_v46, %v1182_v52 }
 0x4eb   : > { %v1198_v54 = vadd.f32 %v1330_v48, %v1190_v53 }
 0x4ed   : > { %1200 = vst.msk [vmem:[%s406_s26 + $0x8] sm:$0xff] %vm1126_vm5, %v1198_v54 }
 0x4ee PF: > { %s19_s30 = sadd.s32 1, %s1487_s30  }
 0x4ef   : > { %p16_p4 = scmp.ge.s32.totalorder %s19_s30, 4  }
 0x4f1   :  { %18 = sbr.rel (!%p16_p4) target bundleno = 1 (0x1), region = 98 }

// kernel: forward.51
= control target key start
LH: loop header
LB: loop body
LE: loop exit
PB: predicated region body
PF: predicated region fallthrough
CT: control target
= control target key end

     0   :  { %v183_v1 = vmov 0.0   ;;  %vm184_vm0 = vmmov 0   ;;  %vm20_vm1 = vcmask 74752   ;;  %s230_s0 = inlined_call_operand.vmem [shape: f32[2,64], index: 0, kind: input, shape index: {}]   ;;  %s231_s1 = inlined_call_operand.vmem [shape: bf16[64,10], index: 1, kind: input, shape index: {}]   ;;  %s232_s2 = inlined_call_operand.vmem [shape: f32[1,10], index: 2, kind: input, shape index: {}]   ;;  %s233_s3 = inlined_call_operand.hbm [shape: f32[2,10], index: 3, kind: output, shape index: {}]  }
   0x1   :  { %v157_v0 = vld [vmem:[%s231_s1 + $0x18] sm:$0xff]   ;;  %142 = vmatprep.subr.bf16.mxu0 %v183_v1  ;;  %v158_v2 = vld [vmem:[%s231_s1 + $0x10] sm:$0xff]   ;;  %150 = vmatprep.mubr.msk.bf16.mxu0 %vm184_vm0, %v183_v1  ;;  %21 = vst.msk [vmem:[#allocation2] sm:$0x3] %vm20_vm1, %v183_v1 }
   0x2   :  { %143 = vmatpush3.bf16.msra.mxu0 %v157_v0 }
   0x3   :  { %144 = vmatprep.subr.bf16.mxu0 %v183_v1 }
   0x4   :  { %8 = vsyncpa [#allocation4], 0  ;;  %v159_v3 = vld [vmem:[%s231_s1 + $0x8] sm:$0xff]   ;;  %v160_v4 = vld [vmem:[%s231_s1] sm:$0xff]   ;;  %vm57_vm2 = vcmask 523264   ;;  %s185_s1 = smov [#allocation3]  }
   0x5   :  { %v23_v5 = vld [vmem:[%s230_s0] sm:$0x3]  ;;  %s123_s24 = sshll.u32 %s185_s1, 4  ;;  %s124_s24 = int_to_ptr.vmem [resolvable:$true] %s123_s24 }
   0x6   :  { %145 = vmatpush3.bf16.msra.mxu0 %v158_v2  ;;  %v24_v6 = vpack.c.bf16 %v23_v5, %v23_v5  ;;  %v136_v13 = vld [vmem:[%s232_s2] ss:$0 sm:$0xff]  ;;  %s161_s0 = scalar_lea.vmem %s124_s24, 32  ;;  %p166_p1 = scmp.lt.s32.totalorder %s124_s24, %s124_s24 }
   0x7   :  { %146 = vmatprep.subr.bf16.mxu0 %v183_v1  ;;  %p162_p0 = scmp.ne.s32.totalorder %s124_s24, %s161_s0  ;;  %p167_p2 = scmp.lt.s32.totalorder %s161_s0, %s161_s0 }
   0x8   :  { %v22_v7 = vld [vmem:[#allocation2] sm:$0x3] }
   0x9   :  { %p168_p3 = por %p167_p2, %p166_p1 }
   0xa   :  { %147 = vmatpush3.bf16.msra.mxu0 %v159_v3 }
   0xb   :  { %148 = vmatprep.subr.bf16.mxu0 %v183_v1  ;;  %p169_p4 = pnand %p168_p3, %p162_p0 }
   0xe   :  { %149 = vmatpush3.bf16.msra.mxu0 %v160_v4 }
  0x11   :  { %151 = vmatmul.mubr.msk.bf16.vlgmr.msra.gmra.mxu0 %vm57_vm2, %v24_v6 }
  0xd1   :  { %v95_v8 = vpop.f32.mrf.mxu0 }
  0xd2   :  { %v101_v9 = vadd.f32 %v95_v8, %v22_v7 }
  0xd3   :  { %v152_v10 = vpop.f32.mrf.mxu0 }
  0xd4   :  { %103 = vst.msk [vmem:[#allocation2] sm:$0x3] %vm20_vm1, %v101_v9 }
  0xd5   :  { %v98_v11 = vpop.f32.mrf.mxu0 }
  0xd7   :  { %v153_v12 = vpop.f32.mrf.mxu0 }
  0xdb   :  { %v107_v14 = vld [vmem:[#allocation2] sm:$0x3] }
  0xdc   :  { %v115_v15 = vadd.f32 %v136_v13, %v107_v14 }
  0xde   :  { %116 = vst.msk [vmem:[#allocation3] sm:$0x3] %vm20_vm1, %v115_v15 }
  0xdf   :  { %172 = shalt.err (!%p169_p4)
}
  0xe0   :  { %126 = dma.vmem_to_hbm [thread:$0]  %s124_s24, 32, %s233_s3, [#allocation4]  }
  0xe1   :  { %181 = dma.done.wait [#allocation4], 32  }
  0xe2   :  { %182 = vsyncadd [#allocation4], 4294967264 }
  0xe3   :  { %130 = vsyncpa [#allocation4], 1 }

</bundles_post_ra>
